<compile_context>
chip_gen: v7x
topology: tpu7x:2x2x1
jax: 0.10.0
libtpu: 0.0.40
codegen_flags: <defaults>
</compile_context>

<pallas_src>
import functools

import jax
import jax.numpy as jnp
from jax.experimental import pallas as pl
from jax.experimental.pallas import tpu as pltpu

# Column offset (W axis of the halo scratch) where the un-padded interior is
# written.  8 keeps the interior store sublane-aligned; the halo columns used
# by the 3x3 taps are _HALO-1 and _HALO+W.
_HALO = 8


def _fused_pspnet_kernel(patch_ref, w1_ref, b1_ref, w2_ref, b2_ref, out_ref,
                         hpad_ref, *, H, W):
    """Fused encoder(conv3x3 + ReLU) + decoder(conv3x3) for one batch element.

    patch_ref : (1, HW, 9*Cin) bf16   encoder im2col patches (host-packed)
    w1_ref    : (9*Cin, C1)    bf16   encoder weights, im2col layout
    b1_ref    : (1, C1)        f32    encoder bias
    w2_ref    : (9, C1, Cp)    bf16   decoder weights, one (C1, Cp) slab per tap
    b2_ref    : (1, Cp)        f32    decoder bias (classes zero-padded to Cp)
    out_ref   : (1, HW, Cp)    f32    decoder output (flattened spatial)
    hpad_ref  : (H+2, _HALO+W+1, C1) bf16 VMEM zero-halo activation scratch
    """
    HW = H * W
    C1 = w1_ref.shape[-1]
    Cp = w2_ref.shape[-1]

    # ---------------- encoder: one im2col matmul, K = 9*Cin ----------------
    # bf16 operands, f32 accumulation on the MXU; bias + ReLU in f32 (VPU).
    h = jnp.dot(patch_ref[0], w1_ref[...], preferred_element_type=jnp.float32)
    h = jnp.maximum(h + b1_ref[...], 0.0)                     # (HW, C1) f32

    # ------------- stage activation into the zero-halo scratch -------------
    # Border-only zeroing (interior is fully overwritten below).  Repeated
    # every grid step so a megacore split of the batch axis stays correct.
    zrow = jnp.zeros(hpad_ref.shape[1:], dtype=hpad_ref.dtype)   # (Ws, C1)
    zcol = jnp.zeros((H, 1, C1), dtype=hpad_ref.dtype)
    hpad_ref[0, :, :] = zrow                                      # top halo row
    hpad_ref[H + 1, :, :] = zrow                                  # bottom halo row
    hpad_ref[1:H + 1, _HALO - 1:_HALO, :] = zcol                  # left halo col
    hpad_ref[1:H + 1, _HALO + W:_HALO + W + 1, :] = zcol          # right halo col
    hpad_ref[1:H + 1, _HALO:_HALO + W, :] = (
        h.reshape(H, W, C1).astype(hpad_ref.dtype))               # interior (bf16)

    # ---------------- decoder: 9 accumulating tap matmuls ------------------
    # Each 3x3 tap contributes dot(tap (HW,C1), w2[k] (C1,Cp)); accumulation
    # stays in f32 vregs (no concat to K=576, no big patch buffer).
    acc = jnp.zeros((HW, Cp), dtype=jnp.float32)
    for k in range(9):
        kh, kw = divmod(k, 3)
        c0 = _HALO - 1 + kw
        tap = hpad_ref[kh:kh + H, c0:c0 + W, :].reshape(HW, C1)   # bf16
        acc = acc + jnp.dot(tap, w2_ref[k],
                            preferred_element_type=jnp.float32)

    out_ref[0] = (acc + b2_ref[...]).astype(out_ref.dtype)


def init_params(num_classes, key):
    """Deterministic synthetic params matching nn.Conv2d shapes (OIHW), then
    transposed to HWIO for the channels-last kernel layout."""
    k1, k2, k3, k4 = jax.random.split(key, 4)
    w_enc_oihw = jax.random.normal(k1, (64, 3, 3, 3), jnp.float32) * 0.1
    b_enc = jax.random.normal(k2, (64,), jnp.float32) * 0.1
    w_dec_oihw = jax.random.normal(k3, (num_classes, 64, 3, 3), jnp.float32) * 0.1
    b_dec = jax.random.normal(k4, (num_classes,), jnp.float32) * 0.1
    w_enc = jnp.transpose(w_enc_oihw, (2, 3, 1, 0))   # (3, 3, 3, 64)   HWIO
    w_dec = jnp.transpose(w_dec_oihw, (2, 3, 1, 0))   # (3, 3, 64, nc)  HWIO
    return (w_enc, b_enc, w_dec, b_dec)


def pspnet_forward(x_nchw, params):
    """Matches PSPNet.forward: encoder(conv3x3+relu) -> decoder(conv3x3).
    Input/output are NCHW like PyTorch."""
    w_enc, b_enc, w_dec, b_dec = params
    N, Cin, H, W = x_nchw.shape
    C1 = w_enc.shape[-1]
    num_classes = w_dec.shape[-1]
    Cp = max(8, ((num_classes + 7) // 8) * 8)     # pad classes to 8, not 128
    HW = H * W
    K1 = 9 * Cin
    Ws = _HALO + W + 1                            # tight halo-scratch width

    # Host-side encoder im2col (cheap: Cin=3).  Order (kh, kw, cin) matches
    # the HWIO -> (9*Cin, C1) weight reshape below.
    x = jnp.transpose(x_nchw, (0, 2, 3, 1)).astype(jnp.float32)   # NHWC
    xp = jnp.pad(x, ((0, 0), (1, 1), (1, 1), (0, 0)))
    patches = jnp.concatenate(
        [xp[:, kh:kh + H, kw:kw + W, :].reshape(N, HW, Cin)
         for kh in range(3) for kw in range(3)], axis=-1)          # (N, HW, 27)
    patches = patches.astype(jnp.bfloat16)

    w1 = w_enc.reshape(K1, C1).astype(jnp.bfloat16)                # (27, 64)
    b1 = b_enc.reshape(1, C1).astype(jnp.float32)
    w2 = w_dec.reshape(9, C1, num_classes)                         # (9, 64, nc)
    w2 = jnp.pad(w2, ((0, 0), (0, 0), (0, Cp - num_classes))).astype(jnp.bfloat16)
    b2 = jnp.pad(b_dec.reshape(1, num_classes),
                 ((0, 0), (0, Cp - num_classes))).astype(jnp.float32)

    kernel = functools.partial(_fused_pspnet_kernel, H=H, W=W)
    out = pl.pallas_call(
        kernel,
        out_shape=jax.ShapeDtypeStruct((N, HW, Cp), jnp.float32),
        grid_spec=pltpu.PrefetchScalarGridSpec(
            num_scalar_prefetch=0,
            grid=(N,),
            in_specs=[
                pl.BlockSpec((1, HW, K1), lambda n: (n, 0, 0)),
                pl.BlockSpec((K1, C1), lambda n: (0, 0)),
                pl.BlockSpec((1, C1), lambda n: (0, 0)),
                pl.BlockSpec((9, C1, Cp), lambda n: (0, 0, 0)),
                pl.BlockSpec((1, Cp), lambda n: (0, 0)),
            ],
            out_specs=pl.BlockSpec((1, HW, Cp), lambda n: (n, 0, 0)),
            scratch_shapes=[
                pltpu.VMEM((H + 2, Ws, C1), jnp.bfloat16),
            ],
        ),
        compiler_params=pltpu.CompilerParams(
            dimension_semantics=("parallel",)),
    )(patches, w1, b1, w2, b2)

    # Only num_classes (+ <=7 zero pad) channels come back, so this slice and
    # transpose are negligible HBM traffic.
    y = out.reshape(N, H, W, Cp)[..., :num_classes]
    return jnp.transpose(y, (0, 3, 1, 2))          # NHWC -> NCHW


def _reference_forward(x_nchw, params):
    """Pure-JAX f32 reference (lax conv) for correctness checking."""
    w_enc, b_enc, w_dec, b_dec = params
    dn = jax.lax.conv_dimension_numbers(x_nchw.shape, w_enc.shape,
                                        ("NCHW", "HWIO", "NCHW"))
    h = jax.lax.conv_general_dilated(x_nchw, w_enc, (1, 1), "SAME",
                                     dimension_numbers=dn)
    h = jnp.maximum(h + b_enc.reshape(1, -1, 1, 1), 0.0)
    dn2 = jax.lax.conv_dimension_numbers(h.shape, w_dec.shape,
                                         ("NCHW", "HWIO", "NCHW"))
    y = jax.lax.conv_general_dilated(h, w_dec, (1, 1), "SAME",
                                     dimension_numbers=dn2)
    return y + b_dec.reshape(1, -1, 1, 1)


if __name__ == "__main__":
    key = jax.random.PRNGKey(0)
    kx, kp = jax.random.split(key)

    num_classes = 4
    N, C, H, W = 2, 3, 16, 16                 # Conv2d(3, ...) -> Cin must be 3
    x = jax.random.normal(kx, (N, C, H, W), jnp.float32)
    params = init_params(num_classes, kp)

    out = jax.jit(pspnet_forward)(x, params)
    out = jax.block_until_ready(out)

    ref = _reference_forward(x, params)
    assert out.shape == (N, num_classes, H, W), out.shape
    # Tolerance accounts for bf16 MXU operands (f32 accumulation); a real
    # indexing/halo bug would produce O(1) errors and still be caught.
    assert jnp.allclose(out, ref, atol=5e-2, rtol=5e-2), (
        "mismatch vs reference, max abs err = %f"
        % float(jnp.max(jnp.abs(out - ref))))

    print("KERNEL_OK")
</pallas_src>

<mosaic_0001>
module attributes {stable_mosaic.version = 11 : i64} {
  func.func @_fused_pspnet_kernel(%arg0: i32, %arg1: memref<1x256x27xbf16, #tpu.memory_space<vmem>>, %arg2: memref<27x64xbf16, #tpu.memory_space<vmem>>, %arg3: memref<1x64xf32, #tpu.memory_space<vmem>>, %arg4: memref<9x64x8xbf16, #tpu.memory_space<vmem>>, %arg5: memref<1x8xf32, #tpu.memory_space<vmem>>, %arg6: memref<1x256x8xf32, #tpu.memory_space<vmem>>, %arg7: memref<18x25x64xbf16, #tpu.memory_space<vmem>>) attributes {dimension_semantics = [#tpu.dimension_semantics<parallel>], iteration_bounds = array<i64: 2>, scalar_prefetch = 0 : i64, scratch_operands = 1 : i64, tpu.core_type = #tpu.core_type<tc>, window_params = [{transform_indices = @transform_0, window_bounds = array<i64: 1, 256, 27>}, {pipeline_mode = #tpu.pipeline_mode<synchronous>, transform_indices = @transform_1, window_bounds = array<i64: 27, 64>}, {pipeline_mode = #tpu.pipeline_mode<synchronous>, transform_indices = @transform_2, window_bounds = array<i64: 1, 64>}, {pipeline_mode = #tpu.pipeline_mode<synchronous>, transform_indices = @transform_3, window_bounds = array<i64: 9, 64, 8>}, {pipeline_mode = #tpu.pipeline_mode<synchronous>, transform_indices = @transform_4, window_bounds = array<i64: 1, 8>}, {transform_indices = @transform_5, window_bounds = array<i64: 1, 256, 8>}]} {
    %c0 = arith.constant 0 : index
    %c0_0 = arith.constant 0 : index
    %c0_1 = arith.constant 0 : index
    %0 = vector.load %arg1[%c0, %c0_0, %c0_1] : memref<1x256x27xbf16, #tpu.memory_space<vmem>>, vector<1x256x27xbf16>
    %1 = vector.shape_cast %0 : vector<1x256x27xbf16> to vector<256x27xbf16>
    %c0_2 = arith.constant 0 : index
    %c0_3 = arith.constant 0 : index
    %2 = vector.load %arg2[%c0_2, %c0_3] : memref<27x64xbf16, #tpu.memory_space<vmem>>, vector<27x64xbf16>
    %cst = arith.constant dense<0.000000e+00> : vector<256x64xf32>
    %3 = tpu.matmul %1, %2, %cst {dimension_numbers = #tpu.dot_dimension_numbers<[1], [0], [0], [1], [0, 0, 1, 1], [], []>} : vector<256x27xbf16>, vector<27x64xbf16>, vector<256x64xf32> -> vector<256x64xf32>
    %c0_4 = arith.constant 0 : index
    %c0_5 = arith.constant 0 : index
    %4 = vector.load %arg3[%c0_4, %c0_5] : memref<1x64xf32, #tpu.memory_space<vmem>>, vector<1x64xf32>
    %5 = vector.broadcast %4 : vector<1x64xf32> to vector<256x64xf32>
    %6 = arith.addf %3, %5 : vector<256x64xf32>
    %cst_6 = arith.constant 0.000000e+00 : f32
    %7 = vector.broadcast %cst_6 : f32 to vector<256x64xf32>
    %8 = arith.maximumf %6, %7 : vector<256x64xf32>
    %cst_7 = arith.constant 0.000000e+00 : bf16
    %9 = vector.broadcast %cst_7 : bf16 to vector<25x64xbf16>
    %cst_8 = arith.constant 0.000000e+00 : bf16
    %10 = vector.broadcast %cst_8 : bf16 to vector<16x1x64xbf16>
    %c0_9 = arith.constant 0 : index
    %c0_10 = arith.constant 0 : index
    %c0_11 = arith.constant 0 : index
    %11 = vector.load %arg7[%c0_9, %c0_10, %c0_11] : memref<18x25x64xbf16, #tpu.memory_space<vmem>>, vector<1x25x64xbf16>
    %12 = vector.shape_cast %11 : vector<1x25x64xbf16> to vector<25x64xbf16>
    %13 = vector.shape_cast %9 : vector<25x64xbf16> to vector<1x25x64xbf16>
    tpu.vector_store %arg7[%c0_9, %c0_10, %c0_11], %13 {strides = array<i32>} : memref<18x25x64xbf16, #tpu.memory_space<vmem>>, vector<1x25x64xbf16>,
    %c17 = arith.constant 17 : index
    %c0_12 = arith.constant 0 : index
    %c0_13 = arith.constant 0 : index
    %14 = vector.load %arg7[%c17, %c0_12, %c0_13] : memref<18x25x64xbf16, #tpu.memory_space<vmem>>, vector<1x25x64xbf16>
    %15 = vector.shape_cast %14 : vector<1x25x64xbf16> to vector<25x64xbf16>
    %16 = vector.shape_cast %9 : vector<25x64xbf16> to vector<1x25x64xbf16>
    tpu.vector_store %arg7[%c17, %c0_12, %c0_13], %16 {strides = array<i32>} : memref<18x25x64xbf16, #tpu.memory_space<vmem>>, vector<1x25x64xbf16>,
    %c1 = arith.constant 1 : index
    %c7 = arith.constant 7 : index
    %c0_14 = arith.constant 0 : index
    %17 = vector.load %arg7[%c1, %c7, %c0_14] : memref<18x25x64xbf16, #tpu.memory_space<vmem>>, vector<16x1x64xbf16>
    tpu.vector_store %arg7[%c1, %c7, %c0_14], %10 {strides = array<i32>} : memref<18x25x64xbf16, #tpu.memory_space<vmem>>, vector<16x1x64xbf16>,
    %c1_15 = arith.constant 1 : index
    %c24 = arith.constant 24 : index
    %c0_16 = arith.constant 0 : index
    %18 = vector.load %arg7[%c1_15, %c24, %c0_16] : memref<18x25x64xbf16, #tpu.memory_space<vmem>>, vector<16x1x64xbf16>
    tpu.vector_store %arg7[%c1_15, %c24, %c0_16], %10 {strides = array<i32>} : memref<18x25x64xbf16, #tpu.memory_space<vmem>>, vector<16x1x64xbf16>,
    %19 = vector.shape_cast %8 : vector<256x64xf32> to vector<16x16x64xf32>
    %20 = arith.truncf %19 : vector<16x16x64xf32> to vector<16x16x64xbf16>
    %c1_17 = arith.constant 1 : index
    %c8 = arith.constant 8 : index
    %c0_18 = arith.constant 0 : index
    %21 = vector.load %arg7[%c1_17, %c8, %c0_18] : memref<18x25x64xbf16, #tpu.memory_space<vmem>>, vector<16x16x64xbf16>
    tpu.vector_store %arg7[%c1_17, %c8, %c0_18], %20 {strides = array<i32>} : memref<18x25x64xbf16, #tpu.memory_space<vmem>>, vector<16x16x64xbf16>,
    %cst_19 = arith.constant 0.000000e+00 : f32
    %22 = vector.broadcast %cst_19 : f32 to vector<256x8xf32>
    %c0_20 = arith.constant 0 : index
    %c7_21 = arith.constant 7 : index
    %c0_22 = arith.constant 0 : index
    %23 = vector.load %arg7[%c0_20, %c7_21, %c0_22] : memref<18x25x64xbf16, #tpu.memory_space<vmem>>, vector<16x16x64xbf16>
    %24 = vector.shape_cast %23 : vector<16x16x64xbf16> to vector<256x64xbf16>
    %c0_23 = arith.constant 0 : index
    %c0_24 = arith.constant 0 : index
    %c0_25 = arith.constant 0 : index
    %25 = vector.load %arg4[%c0_23, %c0_24, %c0_25] : memref<9x64x8xbf16, #tpu.memory_space<vmem>>, vector<1x64x8xbf16>
    %26 = vector.shape_cast %25 : vector<1x64x8xbf16> to vector<64x8xbf16>
    %cst_26 = arith.constant dense<0.000000e+00> : vector<256x8xf32>
    %27 = tpu.matmul %24, %26, %cst_26 {dimension_numbers = #tpu.dot_dimension_numbers<[1], [0], [0], [1], [0, 0, 1, 1], [], []>} : vector<256x64xbf16>, vector<64x8xbf16>, vector<256x8xf32> -> vector<256x8xf32>
    %28 = arith.addf %22, %27 : vector<256x8xf32>
    %c0_27 = arith.constant 0 : index
    %c8_28 = arith.constant 8 : index
    %c0_29 = arith.constant 0 : index
    %29 = vector.load %arg7[%c0_27, %c8_28, %c0_29] : memref<18x25x64xbf16, #tpu.memory_space<vmem>>, vector<16x16x64xbf16>
    %30 = vector.shape_cast %29 : vector<16x16x64xbf16> to vector<256x64xbf16>
    %c1_30 = arith.constant 1 : index
    %c0_31 = arith.constant 0 : index
    %c0_32 = arith.constant 0 : index
    %31 = vector.load %arg4[%c1_30, %c0_31, %c0_32] : memref<9x64x8xbf16, #tpu.memory_space<vmem>>, vector<1x64x8xbf16>
    %32 = vector.shape_cast %31 : vector<1x64x8xbf16> to vector<64x8xbf16>
    %cst_33 = arith.constant dense<0.000000e+00> : vector<256x8xf32>
    %33 = tpu.matmul %30, %32, %cst_33 {dimension_numbers = #tpu.dot_dimension_numbers<[1], [0], [0], [1], [0, 0, 1, 1], [], []>} : vector<256x64xbf16>, vector<64x8xbf16>, vector<256x8xf32> -> vector<256x8xf32>
    %34 = arith.addf %28, %33 : vector<256x8xf32>
    %c0_34 = arith.constant 0 : index
    %c9 = arith.constant 9 : index
    %c0_35 = arith.constant 0 : index
    %35 = vector.load %arg7[%c0_34, %c9, %c0_35] : memref<18x25x64xbf16, #tpu.memory_space<vmem>>, vector<16x16x64xbf16>
    %36 = vector.shape_cast %35 : vector<16x16x64xbf16> to vector<256x64xbf16>
    %c2 = arith.constant 2 : index
    %c0_36 = arith.constant 0 : index
    %c0_37 = arith.constant 0 : index
    %37 = vector.load %arg4[%c2, %c0_36, %c0_37] : memref<9x64x8xbf16, #tpu.memory_space<vmem>>, vector<1x64x8xbf16>
    %38 = vector.shape_cast %37 : vector<1x64x8xbf16> to vector<64x8xbf16>
    %cst_38 = arith.constant dense<0.000000e+00> : vector<256x8xf32>
    %39 = tpu.matmul %36, %38, %cst_38 {dimension_numbers = #tpu.dot_dimension_numbers<[1], [0], [0], [1], [0, 0, 1, 1], [], []>} : vector<256x64xbf16>, vector<64x8xbf16>, vector<256x8xf32> -> vector<256x8xf32>
    %40 = arith.addf %34, %39 : vector<256x8xf32>
    %c1_39 = arith.constant 1 : index
    %c7_40 = arith.constant 7 : index
    %c0_41 = arith.constant 0 : index
    %41 = vector.load %arg7[%c1_39, %c7_40, %c0_41] : memref<18x25x64xbf16, #tpu.memory_space<vmem>>, vector<16x16x64xbf16>
    %42 = vector.shape_cast %41 : vector<16x16x64xbf16> to vector<256x64xbf16>
    %c3 = arith.constant 3 : index
    %c0_42 = arith.constant 0 : index
    %c0_43 = arith.constant 0 : index
    %43 = vector.load %arg4[%c3, %c0_42, %c0_43] : memref<9x64x8xbf16, #tpu.memory_space<vmem>>, vector<1x64x8xbf16>
    %44 = vector.shape_cast %43 : vector<1x64x8xbf16> to vector<64x8xbf16>
    %cst_44 = arith.constant dense<0.000000e+00> : vector<256x8xf32>
    %45 = tpu.matmul %42, %44, %cst_44 {dimension_numbers = #tpu.dot_dimension_numbers<[1], [0], [0], [1], [0, 0, 1, 1], [], []>} : vector<256x64xbf16>, vector<64x8xbf16>, vector<256x8xf32> -> vector<256x8xf32>
    %46 = arith.addf %40, %45 : vector<256x8xf32>
    %c1_45 = arith.constant 1 : index
    %c8_46 = arith.constant 8 : index
    %c0_47 = arith.constant 0 : index
    %47 = vector.load %arg7[%c1_45, %c8_46, %c0_47] : memref<18x25x64xbf16, #tpu.memory_space<vmem>>, vector<16x16x64xbf16>
    %48 = vector.shape_cast %47 : vector<16x16x64xbf16> to vector<256x64xbf16>
    %c4 = arith.constant 4 : index
    %c0_48 = arith.constant 0 : index
    %c0_49 = arith.constant 0 : index
    %49 = vector.load %arg4[%c4, %c0_48, %c0_49] : memref<9x64x8xbf16, #tpu.memory_space<vmem>>, vector<1x64x8xbf16>
    %50 = vector.shape_cast %49 : vector<1x64x8xbf16> to vector<64x8xbf16>
    %cst_50 = arith.constant dense<0.000000e+00> : vector<256x8xf32>
    %51 = tpu.matmul %48, %50, %cst_50 {dimension_numbers = #tpu.dot_dimension_numbers<[1], [0], [0], [1], [0, 0, 1, 1], [], []>} : vector<256x64xbf16>, vector<64x8xbf16>, vector<256x8xf32> -> vector<256x8xf32>
    %52 = arith.addf %46, %51 : vector<256x8xf32>
    %c1_51 = arith.constant 1 : index
    %c9_52 = arith.constant 9 : index
    %c0_53 = arith.constant 0 : index
    %53 = vector.load %arg7[%c1_51, %c9_52, %c0_53] : memref<18x25x64xbf16, #tpu.memory_space<vmem>>, vector<16x16x64xbf16>
    %54 = vector.shape_cast %53 : vector<16x16x64xbf16> to vector<256x64xbf16>
    %c5 = arith.constant 5 : index
    %c0_54 = arith.constant 0 : index
    %c0_55 = arith.constant 0 : index
    %55 = vector.load %arg4[%c5, %c0_54, %c0_55] : memref<9x64x8xbf16, #tpu.memory_space<vmem>>, vector<1x64x8xbf16>
    %56 = vector.shape_cast %55 : vector<1x64x8xbf16> to vector<64x8xbf16>
    %cst_56 = arith.constant dense<0.000000e+00> : vector<256x8xf32>
    %57 = tpu.matmul %54, %56, %cst_56 {dimension_numbers = #tpu.dot_dimension_numbers<[1], [0], [0], [1], [0, 0, 1, 1], [], []>} : vector<256x64xbf16>, vector<64x8xbf16>, vector<256x8xf32> -> vector<256x8xf32>
    %58 = arith.addf %52, %57 : vector<256x8xf32>
    %c2_57 = arith.constant 2 : index
    %c7_58 = arith.constant 7 : index
    %c0_59 = arith.constant 0 : index
    %59 = vector.load %arg7[%c2_57, %c7_58, %c0_59] : memref<18x25x64xbf16, #tpu.memory_space<vmem>>, vector<16x16x64xbf16>
    %60 = vector.shape_cast %59 : vector<16x16x64xbf16> to vector<256x64xbf16>
    %c6 = arith.constant 6 : index
    %c0_60 = arith.constant 0 : index
    %c0_61 = arith.constant 0 : index
    %61 = vector.load %arg4[%c6, %c0_60, %c0_61] : memref<9x64x8xbf16, #tpu.memory_space<vmem>>, vector<1x64x8xbf16>
    %62 = vector.shape_cast %61 : vector<1x64x8xbf16> to vector<64x8xbf16>
    %cst_62 = arith.constant dense<0.000000e+00> : vector<256x8xf32>
    %63 = tpu.matmul %60, %62, %cst_62 {dimension_numbers = #tpu.dot_dimension_numbers<[1], [0], [0], [1], [0, 0, 1, 1], [], []>} : vector<256x64xbf16>, vector<64x8xbf16>, vector<256x8xf32> -> vector<256x8xf32>
    %64 = arith.addf %58, %63 : vector<256x8xf32>
    %c2_63 = arith.constant 2 : index
    %c8_64 = arith.constant 8 : index
    %c0_65 = arith.constant 0 : index
    %65 = vector.load %arg7[%c2_63, %c8_64, %c0_65] : memref<18x25x64xbf16, #tpu.memory_space<vmem>>, vector<16x16x64xbf16>
    %66 = vector.shape_cast %65 : vector<16x16x64xbf16> to vector<256x64xbf16>
    %c7_66 = arith.constant 7 : index
    %c0_67 = arith.constant 0 : index
    %c0_68 = arith.constant 0 : index
    %67 = vector.load %arg4[%c7_66, %c0_67, %c0_68] : memref<9x64x8xbf16, #tpu.memory_space<vmem>>, vector<1x64x8xbf16>
    %68 = vector.shape_cast %67 : vector<1x64x8xbf16> to vector<64x8xbf16>
    %cst_69 = arith.constant dense<0.000000e+00> : vector<256x8xf32>
    %69 = tpu.matmul %66, %68, %cst_69 {dimension_numbers = #tpu.dot_dimension_numbers<[1], [0], [0], [1], [0, 0, 1, 1], [], []>} : vector<256x64xbf16>, vector<64x8xbf16>, vector<256x8xf32> -> vector<256x8xf32>
    %70 = arith.addf %64, %69 : vector<256x8xf32>
    %c2_70 = arith.constant 2 : index
    %c9_71 = arith.constant 9 : index
    %c0_72 = arith.constant 0 : index
    %71 = vector.load %arg7[%c2_70, %c9_71, %c0_72] : memref<18x25x64xbf16, #tpu.memory_space<vmem>>, vector<16x16x64xbf16>
    %72 = vector.shape_cast %71 : vector<16x16x64xbf16> to vector<256x64xbf16>
    %c8_73 = arith.constant 8 : index
    %c0_74 = arith.constant 0 : index
    %c0_75 = arith.constant 0 : index
    %73 = vector.load %arg4[%c8_73, %c0_74, %c0_75] : memref<9x64x8xbf16, #tpu.memory_space<vmem>>, vector<1x64x8xbf16>
    %74 = vector.shape_cast %73 : vector<1x64x8xbf16> to vector<64x8xbf16>
    %cst_76 = arith.constant dense<0.000000e+00> : vector<256x8xf32>
    %75 = tpu.matmul %72, %74, %cst_76 {dimension_numbers = #tpu.dot_dimension_numbers<[1], [0], [0], [1], [0, 0, 1, 1], [], []>} : vector<256x64xbf16>, vector<64x8xbf16>, vector<256x8xf32> -> vector<256x8xf32>
    %76 = arith.addf %70, %75 : vector<256x8xf32>
    %c0_77 = arith.constant 0 : index
    %c0_78 = arith.constant 0 : index
    %77 = vector.load %arg5[%c0_77, %c0_78] : memref<1x8xf32, #tpu.memory_space<vmem>>, vector<1x8xf32>
    %78 = vector.broadcast %77 : vector<1x8xf32> to vector<256x8xf32>
    %79 = arith.addf %76, %78 : vector<256x8xf32>
    %c0_79 = arith.constant 0 : index
    %c0_80 = arith.constant 0 : index
    %c0_81 = arith.constant 0 : index
    %80 = vector.load %arg6[%c0_79, %c0_80, %c0_81] : memref<1x256x8xf32, #tpu.memory_space<vmem>>, vector<1x256x8xf32>
    %81 = vector.shape_cast %80 : vector<1x256x8xf32> to vector<256x8xf32>
    %82 = vector.shape_cast %79 : vector<256x8xf32> to vector<1x256x8xf32>
    tpu.vector_store %arg6[%c0_79, %c0_80, %c0_81], %82 {strides = array<i32>} : memref<1x256x8xf32, #tpu.memory_space<vmem>>, vector<1x256x8xf32>,
    return
  }
  func.func @transform_0(%arg0: i32) -> (i32, i32, i32) {
    %c0_i32 = arith.constant 0 : i32
    %c0_i32_0 = arith.constant 0 : i32
    %c0_i32_1 = arith.constant 0 : i32
    return %arg0, %c0_i32, %c0_i32_0 : i32, i32, i32
  }
  func.func @transform_1(%arg0: i32) -> (i32, i32) {
    %c0_i32 = arith.constant 0 : i32
    %c0_i32_0 = arith.constant 0 : i32
    %c0_i32_1 = arith.constant 0 : i32
    return %c0_i32, %c0_i32_0 : i32, i32
  }
  func.func @transform_2(%arg0: i32) -> (i32, i32) {
    %c0_i32 = arith.constant 0 : i32
    %c0_i32_0 = arith.constant 0 : i32
    %c0_i32_1 = arith.constant 0 : i32
    return %c0_i32, %c0_i32_0 : i32, i32
  }
  func.func @transform_3(%arg0: i32) -> (i32, i32, i32) {
    %c0_i32 = arith.constant 0 : i32
    %c0_i32_0 = arith.constant 0 : i32
    %c0_i32_1 = arith.constant 0 : i32
    %c0_i32_2 = arith.constant 0 : i32
    return %c0_i32, %c0_i32_0, %c0_i32_1 : i32, i32, i32
  }
  func.func @transform_4(%arg0: i32) -> (i32, i32) {
    %c0_i32 = arith.constant 0 : i32
    %c0_i32_0 = arith.constant 0 : i32
    %c0_i32_1 = arith.constant 0 : i32
    return %c0_i32, %c0_i32_0 : i32, i32
  }
  func.func @transform_5(%arg0: i32) -> (i32, i32, i32) {
    %c0_i32 = arith.constant 0 : i32
    %c0_i32_0 = arith.constant 0 : i32
    %c0_i32_1 = arith.constant 0 : i32
    return %arg0, %c0_i32, %c0_i32_0 : i32, i32, i32
  }
}

</mosaic_0001>

<bundles_post_ra>
// kernel: pspnet_forward.1
= control target key start
LH: loop header
LB: loop body
LE: loop exit
PB: predicated region body
PF: predicated region fallthrough
CT: control target
= control target key end

     0   :  { %s8010_s18 = smov 0   ;;  %s9988_s0 = inlined_call_operand.vmem [shape: bf16[2,256,27], index: 0, kind: input, shape index: {}]   ;;  %s9989_s1 = inlined_call_operand.vmem [shape: bf16[27,64], index: 1, kind: input, shape index: {}]   ;;  %s9990_s2 = inlined_call_operand.vmem [shape: f32[1,64], index: 2, kind: input, shape index: {}]   ;;  %s9991_s3 = inlined_call_operand.vmem [shape: bf16[9,64,8], index: 3, kind: input, shape index: {}]   ;;  %s9992_s4 = inlined_call_operand.vmem [shape: f32[1,8], index: 4, kind: input, shape index: {}]   ;;  %s9993_s5 = inlined_call_operand.vmem [shape: f32[2,256,8], index: 5, kind: output, shape index: {}]  }
   0x1 LB: > { %s6445_s19 = sadd.s32 4294967295, %s7976_s18   ;;  %p6449_p0 = scmp.ge.s32.totalorder %s7976_s18, 1  ;;  %s7976_s18 = sphi %s8010_s18, %s15_s18  }
   0x2   : > { %p187_p1 = scmp.lt.s32.totalorder %s7976_s18, 3 }
   0x4   : > { %p188_p2 = pnand %p6449_p0, %p187_p1 }
   0x6   : > { %191 = sbr.rel (%p188_p2) target bundleno = 906 (0x38a), region = 40 }
   0xd   : > { %v7854_v0 = vld [vmem:[%s9989_s1] sm:$0xff]   ;;  %vm409_vm0 = vcmask 1044480   ;;  %v7855_v1 = vld [vmem:[%s9989_s1 + $0x8] sm:$0x3f]   ;;  %vm410_vm1 = vcmask 1045504   ;;  %p215_p3 = scmp.lt.s32.totalorder %s6445_s19, 1 }
   0xe   : > { %7192 = vmatprep.subr.bf16.mxu0 %v7854_v0  ;;  %v7978_v2 = vmov 65535   ;;  %vm360_vm2 = vcmask 220160   ;;  %v7872_v22 = vld [vmem:[%s9991_s3 + $0x20] sm:$0xff]   ;;  %v7874_v24 = vld [vmem:[%s9991_s3 + $0x28] sm:$0xff]   ;;  %vm609_vm3 = vcmask 519168   ;;  %v7979_v26 = vmov 0  }
   0xf   : > { %7193 = vmatpush3.bf16.msra.mxu0 %v7854_v0  ;;  %v411_v3 = vsel %vm409_vm0, 4294967295, %v7978_v2  ;;  %s10323_s19 = smov (!%p215_p3, %s6445_s19), 1  ;;  %v7873_v23 = vld [vmem:[%s9991_s3 + $0x80] sm:$0xff]   ;;  %v7875_v25 = vld [vmem:[%s9991_s3 + $0x88] sm:$0xff]   ;;  %611 = vst.msk [vmem:[#allocation2 + $0x4] sm:$0xf] %vm609_vm3, %v7979_v26 }
  0x10   : > { %v412_v4 = vsel %vm410_vm1, %v411_v3, 0  ;;  %s6960_s24 = sshll.u32 %s10323_s19, 7  ;;  %7388 = vmatprep.subr.bf16.mxu1 %v7873_v23  ;;  %612 = vst.msk [vmem:[#allocation2 + $0x8] sm:$0xf] %vm609_vm3, %v7979_v26  ;;  %610 = vst.msk [vmem:[#allocation2] sm:$0xf] %vm609_vm3, %v7979_v26 }
  0x11   : > { %v414_v5 = vand.u32 %v7855_v1, %v412_v4  ;;  %s8030_s27 = scalar_lea.vmem %s9988_s0, %s6960_s24  ;;  %7389 = vmatpush3.bf16.msra.mxu1 %v7873_v23  ;;  %620 = vst.msk [vmem:[#allocation2 + $0x110] sm:$0xf] %vm609_vm3, %v7979_v26  ;;  %621 = vst.msk [vmem:[#allocation2 + $0x114] sm:$0xf] %vm609_vm3, %v7979_v26  ;;  %v7876_v27 = vld [vmem:[%s9991_s3 + $0x30] sm:$0xff]   ;;  %v7878_v29 = vld [vmem:[%s9991_s3 + $0x38] sm:$0xff]  }
  0x12   : > { %v7856_v6 = vld [vmem:[%s8030_s27] sm:$0xff]   ;;  %v7857_v7 = vld [vmem:[%s8030_s27 + $0x8] sm:$0xff]   ;;  %v7858_v8 = vld [vmem:[%s8030_s27 + $0x10] sm:$0xff]   ;;  %7390 = vmatprep.subr.bf16.mxu1 %v7875_v25  ;;  %622 = vst.msk [vmem:[#allocation2 + $0x118] sm:$0xf] %vm609_vm3, %v7979_v26  ;;  %vm1409_vm4 = vcmask 523264  }
  0x13   : > { %7194 = vmatprep.subr.bf16.mxu0 %v414_v5  ;;  %7196 = vmatprep.mubr.msk.bf16.mxu0 %vm360_vm2, %v7856_v6  ;;  %v7859_v9 = vld [vmem:[%s8030_s27 + $0x18] sm:$0xff]   ;;  %v7860_v10 = vld [vmem:[%s8030_s27 + $0x20] sm:$0xff]   ;;  %v7861_v11 = vld [vmem:[%s8030_s27 + $0x28] sm:$0xff]   ;;  %vm613_vm5 = vcmask 516096   ;;  %vm614_vm6 = vsmask.f32 256 }
  0x14   : > { %7195 = vmatpush3.bf16.msra.mxu0 %v414_v5  ;;  %v7862_v12 = vld [vmem:[%s8030_s27 + $0x30] sm:$0xff]   ;;  %v7863_v13 = vld [vmem:[%s8030_s27 + $0x38] sm:$0xff]   ;;  %v7864_v14 = vld [vmem:[%s8030_s27 + $0x40] sm:$0xff]   ;;  %v10058_v35 = vmov 0  ;;  %vm627_vm8 = vcmask 519171   ;;  %v10061_v39 = vmov 0 }
  0x15   : > { %v7865_v15 = vld [vmem:[%s8030_s27 + $0x48] sm:$0xff]   ;;  %v7866_v16 = vld [vmem:[%s8030_s27 + $0x50] sm:$0xff]   ;;  %v7867_v17 = vld [vmem:[%s8030_s27 + $0x58] sm:$0xff]   ;;  %7228 = vmatprep.subr.bf16.mxu0 %v7872_v22  ;;  %7391 = vmatpush3.bf16.msra.mxu1 %v7875_v25  ;;  %vm628_vm9 = vsmask.f32 7950  ;;  %s6961_s10 = sshll.u32 %s10323_s19, 8 }
  0x16   : > { %v7868_v18 = vld [vmem:[%s8030_s27 + $0x60] sm:$0xff]   ;;  %v7869_v19 = vld [vmem:[%s8030_s27 + $0x68] sm:$0xff]   ;;  %v7870_v20 = vld [vmem:[%s8030_s27 + $0x70] sm:$0xff]   ;;  %vm934_vm11 = vsmask.f32 4368  ;;  %s9865_s15 = scalar_lea.vmem %s9993_s5, %s6961_s10  ;;  %vm6357_vm0 = vcmask 64512  }
  0x17   : > { %7197 = vmatmul.mubr.msk.bf16.vlgmr.msra.gmra.mrb[0].mxu0 %vm360_vm2, %v7857_v7  ;;  %v7871_v21 = vld [vmem:[%s8030_s27 + $0x78] sm:$0xff]   ;;  %v7877_v28 = vld [vmem:[%s9991_s3 + $0x90] sm:$0xff]   ;;  %v887_v31 = vld [vmem:[#allocation2 + $0x4] sm:$0xf]  ;;  %vm1948_vm13 = vsmask.f32 3328 }
  0x18   : > { %7200 = vmatprep.mubr.msk.bf16.mxu0 %vm360_vm2, %v7858_v8  ;;  %7229 = vmatpush3.bf16.msra.mxu0 %v7872_v22  ;;  %v7879_v30 = vld [vmem:[%s9991_s3 + $0x98] sm:$0xff]   ;;  %v888_v32 = vld [vmem:[#allocation2 + $0x8] sm:$0xf]  ;;  %v8098_v34 = vld [vmem:[%s9991_s3 + $0xa0] sm:$0xff]   ;;  %v942_v46 = vshrl.u32 %v887_v31, 16  ;;  %v945_v55 = vshll.u32 %v887_v31, 16 }
  0x19   : > { %7230 = vmatprep.subr.bf16.mxu0 %v7874_v24  ;;  %7392 = vmatprep.subr.bf16.mxu1 %v7877_v28  ;;  %v6545_v33 = vcombine.low %v887_v31, %v888_v32  ;;  %vm8102_vm7 = vmand %vm613_vm5, %vm614_vm6  ;;  %v678_v36 = vld [vmem:[#allocation2 + $0x1c] sm:$0x1]  ;;  %v8111_v38 = vld [vmem:[%s9991_s3] sm:$0xff]   ;;  %v951_v47 = vshrl.u32 %v888_v32, 16  ;;  %v954_v53 = vshll.u32 %v888_v32, 16 }
  0x1a   : > { %7393 = vmatpush3.bf16.msra.mxu1 %v7877_v28  ;;  %v10059_v35 = vsel %vm8102_vm7, 4294967295, %v10058_v35  ;;  %v679_v37 = vsel %vm8102_vm7, 0, %v678_v36  ;;  %vm8113_vm10 = vmand %vm627_vm8, %vm628_vm9  ;;  %v633_v40 = vld [vmem:[#allocation2 + $0x20] sm:$0x8]  ;;  %v630_v41 = vld [vmem:[#allocation2 + $0x10] sm:$0x8] }
  0x1b   : > { %7394 = vmatprep.subr.bf16.mxu1 %v7879_v30  ;;  %10060 = vst [vmem:[#allocation3_spill] sm:$0xff] %v10059_v35  ;;  %680 = vst [vmem:[#allocation2 + $0x1c] sm:$0x1] %v679_v37  ;;  %v10062_v39 = vsel %vm8113_vm10, 4294967295, %v10061_v39  ;;  %v634_v42 = vsel %vm8113_vm10, 0, %v633_v40  ;;  %v631_v43 = vsel %vm8113_vm10, 0, %v630_v41 }
  0x1c   : > { %7231 = vmatpush3.bf16.msra.mxu0 %v7874_v24  ;;  %10063 = vst [vmem:[#allocation4_spill] sm:$0xff] %v10062_v39  ;;  %635 = vst [vmem:[#allocation2 + $0x20] sm:$0x8] %v634_v42  ;;  %v681_v44 = vld [vmem:[#allocation2 + $0x2c] sm:$0x1]  ;;  %v944_v51 = vrot.slane %v942_v46, 7 }
  0x1d   : > { %7232 = vmatprep.subr.bf16.mxu0 %v7876_v27  ;;  %632 = vst [vmem:[#allocation2 + $0x10] sm:$0x8] %v631_v43  ;;  %v682_v45 = vsel %vm8102_vm7, 0, %v681_v44  ;;  %v639_v48 = vld [vmem:[#allocation2 + $0x40] sm:$0x8]  ;;  %v953_v52 = vrot.slane %v951_v47, 7  ;;  %vm8131_vm12 = vmor %vm614_vm6, %vm934_vm11 }
  0x1e   : > { %7395 = vmatpush3.bf16.msra.mxu1 %v7879_v30  ;;  %683 = vst [vmem:[#allocation2 + $0x2c] sm:$0x1] %v682_v45  ;;  %v636_v49 = vld [vmem:[#allocation2 + $0x30] sm:$0x8]  ;;  %v640_v50 = vsel %vm8113_vm10, 0, %v639_v48  ;;  %v949_v60 = vrot.slane %v944_v51, 4  ;;  %v947_v0 = vor.u32 %v945_v55, %v944_v51 }
  0x1f   : > { %7201 = vmatmul.mubr.msk.bf16.gmra.mrb[4].mxu0 %vm360_vm2, %v7859_v9  ;;  %7428 = vmatprep.subr.bf16.mxu1 %v8098_v34  ;;  %v637_v54 = vsel %vm8113_vm10, 0, %v636_v49  ;;  %641 = vst [vmem:[#allocation2 + $0x40] sm:$0x8] %v640_v50  ;;  %v687_v56 = vld [vmem:[#allocation2 + $0x4c] sm:$0x1]  ;;  %v956_v61 = vor.u32 %v954_v53, %v953_v52 }
  0x20   : > { %7204 = vmatprep.mubr.msk.bf16.mxu0 %vm360_vm2, %v7860_v10  ;;  %7233 = vmatpush3.bf16.msra.mxu0 %v7876_v27  ;;  %638 = vst [vmem:[#allocation2 + $0x30] sm:$0x8] %v637_v54  ;;  %v684_v57 = vld [vmem:[#allocation2 + $0x3c] sm:$0x1]  ;;  %v688_v58 = vsel %vm8102_vm7, 0, %v687_v56 }
  0x21   : > { %7234 = vmatprep.subr.bf16.mxu0 %v7878_v29  ;;  %v886_v59 = vld [vmem:[#allocation2] sm:$0x8]  ;;  %689 = vst [vmem:[#allocation2 + $0x4c] sm:$0x1] %v688_v58  ;;  %v685_v1 = vsel %vm8102_vm7, 0, %v684_v57  ;;  %v957_v2 = vsel %vm8131_vm12, %v949_v60, %v956_v61 }
  0x22   : > { %v937_v63 = vshrl.u32 %v886_v59, 16  ;;  %686 = vst [vmem:[#allocation2 + $0x3c] sm:$0x1] %v685_v1  ;;  %v645_v5 = vld [vmem:[#allocation2 + $0x60] sm:$0x8] }
  0x23   : > { %v642_v7 = vld [vmem:[#allocation2 + $0x50] sm:$0x8]  ;;  %v646_v8 = vsel %vm8113_vm10, 0, %v645_v5  ;;  %v693_v10 = vld [vmem:[#allocation2 + $0x6c] sm:$0x1] }
  0x24   : > { %7235 = vmatpush3.bf16.msra.mxu0 %v7878_v29  ;;  %v6521_v3 = vrot.slane %v937_v63, 11  ;;  %v643_v9 = vsel %vm8113_vm10, 0, %v642_v7  ;;  %647 = vst [vmem:[#allocation2 + $0x60] sm:$0x8] %v646_v8  ;;  %v699_v22 = vld [vmem:[#allocation2 + $0x8c] sm:$0x1] }
  0x25   : > { %7268 = vmatprep.subr.bf16.mxu0 %v8111_v38  ;;  %644 = vst [vmem:[#allocation2 + $0x50] sm:$0x8] %v643_v9  ;;  %v696_v25 = vld [vmem:[#allocation2 + $0x7c] sm:$0x1]  ;;  %v700_v26 = vsel %vm8102_vm7, 0, %v699_v22 }
  0x26   : > { %v948_v4 = vsel %vm8131_vm12, %v6521_v3, %v947_v0  ;;  %v898_v29 = vld [vmem:[#allocation2 + $0x40] sm:$0x8]  ;;  %v697_v30 = vsel %vm8102_vm7, 0, %v696_v25  ;;  %701 = vst [vmem:[#allocation2 + $0x8c] sm:$0x1] %v700_v26 }
  0x27   : > { %7205 = vmatmul.mubr.msk.bf16.gmra.mrb[8].mxu0 %vm360_vm2, %v7861_v11  ;;  %v8141_v6 = vcombine.low %v948_v4, %v957_v2  ;;  %v690_v11 = vld [vmem:[#allocation2 + $0x5c] sm:$0x1]  ;;  %v895_v28 = vld [vmem:[#allocation2 + $0x30] sm:$0x8]  ;;  %698 = vst [vmem:[#allocation2 + $0x7c] sm:$0x1] %v697_v30 }
  0x28   : > { %7208 = vmatprep.mubr.msk.bf16.mxu0 %vm360_vm2, %v7862_v12  ;;  %v694_v12 = vsel %vm8102_vm7, 0, %v693_v10  ;;  %v1025_v36 = vshrl.u32 %v898_v29, 16  ;;  %v8162_v37 = vld [vmem:[%s9990_s2] ss:$0 sm:$0xff]  ;;  %v3744_v45 = vld [vmem:[#allocation2 + $0x4c] sm:$0x1] }
  0x29   : > { %695 = vst [vmem:[#allocation2 + $0x6c] sm:$0x1] %v694_v12  ;;  %v3741_v32 = vld [vmem:[#allocation2 + $0x3c] sm:$0x1]  ;;  %v657_v46 = vld [vmem:[#allocation2 + $0xa0] sm:$0x8] }
  0x2a   : > { %v3849_v44 = vshll.u32 %v3741_v32, 16  ;;  %v654_v49 = vld [vmem:[#allocation2 + $0x90] sm:$0x8]  ;;  %v658_v50 = vsel %vm8113_vm10, 0, %v657_v46  ;;  %v8177_v54 = vrot.slane %v1025_v36, 11  ;;  %v3873_v59 = vshll.u32 %v3744_v45, 16 }
  0x2b   : > { %v904_v48 = vld [vmem:[#allocation2 + $0x60] sm:$0x8]  ;;  %v655_v56 = vsel %vm8113_vm10, 0, %v654_v49  ;;  %659 = vst [vmem:[#allocation2 + $0xa0] sm:$0x8] %v658_v50 }
  0x2c   : > { %v901_v55 = vld [vmem:[#allocation2 + $0x50] sm:$0x8]  ;;  %656 = vst [vmem:[#allocation2 + $0x90] sm:$0x8] %v655_v56  ;;  %v4488_v61 = vld [vmem:[#allocation2 + $0x20] sm:$0x8] }
  0x2d   : > { %v8183_v2 = vrot.slane %v3849_v44, 5  ;;  %v1069_v3 = vshrl.u32 %v904_v48, 16  ;;  %v705_v4 = vld [vmem:[#allocation2 + $0xac] sm:$0x1]  ;;  %v1047_v8 = vshrl.u32 %v901_v55, 16 }
  0x2e   : > { %v702_v9 = vld [vmem:[#allocation2 + $0x9c] sm:$0x1]  ;;  %v706_v10 = vsel %vm8102_vm7, 0, %v705_v4  ;;  %vm1949_vm14 = vsmask.f32 7440 }
  0x2f   : > { %7209 = vmatmul.mubr.msk.bf16.gmra.mrb[12].mxu0 %vm360_vm2, %v7863_v13  ;;  %v691_v13 = vsel %vm8102_vm7, 0, %v690_v11  ;;  %707 = vst [vmem:[#allocation2 + $0xac] sm:$0x1] %v706_v10  ;;  %v3753_v22 = vld [vmem:[#allocation2 + $0x7c] sm:$0x1]  ;;  %vm8794_vm15 = vmor %vm1948_vm13, %vm1949_vm14 }
  0x30   : > { %7212 = vmatprep.mubr.msk.bf16.mxu0 %vm360_vm2, %v7864_v14  ;;  %692 = vst [vmem:[#allocation2 + $0x5c] sm:$0x1] %v691_v13  ;;  %v651_v14 = vld [vmem:[#allocation2 + $0x80] sm:$0x8]  ;;  %v3945_v48 = vshll.u32 %v3753_v22, 16 }
  0x32   : > { %v916_v30 = vld [vmem:[#allocation2 + $0xa0] sm:$0x8]  ;;  %v8218_v10 = vrot.slane %v3945_v48, 5 }
  0x33   : > { %v913_v44 = vld [vmem:[#allocation2 + $0x90] sm:$0x8] }
  0x34   : > { %10072 = vst [vmem:[#allocation11_spill] sm:$0xff] %v8218_v10 }
  0x37   : > { %7213 = vmatmul.mubr.msk.bf16.gmra.mrb[16].mxu0 %vm360_vm2, %v7865_v15  ;;  %v648_v15 = vld [vmem:[#allocation2 + $0x70] sm:$0x8]  ;;  %v3747_v60 = vld [vmem:[#allocation2 + $0x5c] sm:$0x1] }
  0x38   : > { %7216 = vmatprep.mubr.msk.bf16.mxu0 %vm360_vm2, %v7866_v16  ;;  %v652_v16 = vsel %vm8113_vm10, 0, %v651_v14  ;;  %v3897_v13 = vshll.u32 %v3747_v60, 16  ;;  %v3750_v14 = vld [vmem:[#allocation2 + $0x6c] sm:$0x1] }
  0x39   : > { %653 = vst [vmem:[#allocation2 + $0x80] sm:$0x8] %v652_v16  ;;  %v3921_v29 = vshll.u32 %v3750_v14, 16 }
  0x3b   : > { %v8212_v4 = vrot.slane %v3921_v29, 5 }
  0x3d   : > { %10070 = vst [vmem:[#allocation9_spill] sm:$0xff] %v8212_v4 }
  0x3f   : > { %7217 = vmatmul.mubr.msk.bf16.gmra.mrb[20].mxu0 %vm360_vm2, %v7867_v17  ;;  %v889_v17 = vld [vmem:[#allocation2 + $0x10] sm:$0x8] }
  0x40   : > { %7220 = vmatprep.mubr.msk.bf16.mxu0 %vm360_vm2, %v7868_v18  ;;  %v892_v18 = vld [vmem:[#allocation2 + $0x20] sm:$0x8]  ;;  %v959_v23 = vshrl.u32 %v889_v17, 16 }
  0x41   : > { %v981_v24 = vshrl.u32 %v892_v18, 16  ;;  %v8188_v18 = vrot.slane %v3873_v59, 5 }
  0x42   : > { %v8166_v41 = vrot.slane %v959_v23, 11 }
  0x43   : > { %v8168_v42 = vrot.slane %v981_v24, 11  ;;  %10066 = vst [vmem:[#allocation5_spill] sm:$0xff] %v8188_v18  ;;  %v3756_v24 = vld [vmem:[#allocation2 + $0x8c] sm:$0x1] }
  0x44   : > { %v3969_v50 = vshll.u32 %v3756_v24, 16 }
  0x47   : > { %7221 = vmatmul.mubr.msk.bf16.gmra.mrb[24].mxu0 %vm360_vm2, %v7869_v19  ;;  %v649_v19 = vsel %vm8113_vm10, 0, %v648_v15  ;;  %v4537_v15 = vshrl.u32 %v4488_v61, 16 }
  0x48   : > { %7224 = vmatprep.mubr.msk.bf16.mxu0 %vm360_vm2, %v7870_v20  ;;  %v3735_v20 = vld [vmem:[#allocation2 + $0x1c] sm:$0x1]  ;;  %650 = vst [vmem:[#allocation2 + $0x70] sm:$0x8] %v649_v19  ;;  %v910_v19 = vld [vmem:[#allocation2 + $0x80] sm:$0x8] }
  0x49   : > { %v3801_v27 = vshll.u32 %v3735_v20, 16  ;;  %v703_v20 = vsel %vm8102_vm7, 0, %v702_v9  ;;  %v1113_v36 = vshrl.u32 %v910_v19, 16  ;;  %v8202_v45 = vrot.slane %v4537_v15, 11 }
  0x4a   : > { %704 = vst [vmem:[#allocation2 + $0x9c] sm:$0x1] %v703_v20  ;;  %v8225_v15 = vrot.slane %v3969_v50, 5 }
  0x4b   : > { %v8164_v40 = vrot.slane %v3801_v27, 5  ;;  %v8194_v27 = vrot.slane %v1047_v8, 11  ;;  %10069 = vst [vmem:[#allocation8_spill] sm:$0xff] %v8202_v45 }
  0x4c   : > { %10074 = vst [vmem:[#allocation13_spill] sm:$0xff] %v8225_v15 }
  0x4f   : > { %7225 = vmatmul.mubr.msk.bf16.gmra.mrb[28].mxu0 %vm360_vm2, %v7871_v21  ;;  %v3738_v21 = vld [vmem:[#allocation2 + $0x2c] sm:$0x1]  ;;  %v907_v23 = vld [vmem:[#allocation2 + $0x70] sm:$0x8] }
  0x50   : > { %7236 = vmatprep.mubr.msk.bf16.mxu0 %vm1409_vm4, %v6545_v33  ;;  %v3825_v31 = vshll.u32 %v3738_v21, 16  ;;  %v1003_v33 = vshrl.u32 %v895_v28, 16  ;;  %v8196_v28 = vrot.slane %v1069_v3, 11  ;;  %v1091_v49 = vshrl.u32 %v907_v23, 16 }
  0x52   : > { %v8170_v43 = vrot.slane %v3825_v31, 5  ;;  %v8175_v53 = vrot.slane %v1003_v33, 11  ;;  %10067 = vst [vmem:[#allocation6_spill] sm:$0xff] %v8196_v28  ;;  %v8200_v33 = vrot.slane %v3897_v13, 5 }
  0x54   : > { %10068 = vst [vmem:[#allocation7_spill] sm:$0xff] %v8200_v33 }
  0xea   : > { %v7198_v47 = vpop.f32.mrb[0].mxu0 }
  0xeb   : > { %v459_v51 = vadd.f32 %v7198_v47, %v8162_v37  ;;  %v450_v52 = vpop.f32.mrb[1].mxu0 }
  0xec   : > { %v451_v57 = vadd.f32 %v8162_v37, %v450_v52  ;;  %v7199_v58 = vpop.f32.mrb[2].mxu0 }
  0xed   : > { %v579_v63 = vmax.f32 %v459_v51, 0.0  ;;  %v462_v0 = vadd.f32 %v7199_v58, %v8162_v37  ;;  %v453_v1 = vpop.f32.mrb[3].mxu0  ;;  %v663_v51 = vld [vmem:[#allocation2 + $0xc0] sm:$0x8]  ;;  %v660_v58 = vld [vmem:[#allocation2 + $0xb0] sm:$0x8] }
  0xee   : > { %v577_v5 = vmax.f32 %v451_v57, 0.0  ;;  %v454_v7 = vadd.f32 %v8162_v37, %v453_v1  ;;  %v1157_v57 = vshrl.u32 %v916_v30, 16  ;;  %v664_v59 = vsel %vm8113_vm10, 0, %v663_v51 }
  0xef   : > { %v6964_v11 = vpack.c.bf16 %v579_v63, %v579_v63  ;;  %v580_v12 = vmax.f32 %v462_v0, 0.0  ;;  %v1135_v63 = vshrl.u32 %v913_v44, 16  ;;  %v661_v0 = vsel %vm8113_vm10, 0, %v660_v58  ;;  %665 = vst [vmem:[#allocation2 + $0xc0] sm:$0x8] %v664_v59 }
  0xf0   : > { %v6962_v16 = vpack.c.bf16 %v577_v5, %v577_v5  ;;  %v578_v17 = vmax.f32 %v454_v7, 0.0  ;;  %v8214_v5 = vrot.slane %v1113_v36, 11  ;;  %662 = vst [vmem:[#allocation2 + $0xb0] sm:$0x8] %v661_v0 }
  0xf1   : > { %856 = vst.msk [vmem:[#allocation2 + $0x24] sm:$0xf] %vm609_vm3, %v6964_v11  ;;  %v6965_v21 = vpack.c.bf16 %v580_v12, %v580_v12  ;;  %v8220_v11 = vrot.slane %v1091_v49, 11  ;;  %v8233_v23 = vrot.slane %v1135_v63, 11 }
  0xf2   : > { %854 = vst.msk [vmem:[#allocation2 + $0x14] sm:$0xf] %vm609_vm3, %v6962_v16  ;;  %v6963_v25 = vpack.c.bf16 %v578_v17, %v578_v17  ;;  %v7202_v26 = vpop.f32.mrb[4].mxu0  ;;  %10071 = vst [vmem:[#allocation10_spill] sm:$0xff] %v8214_v5  ;;  %v8227_v16 = vrot.slane %v1157_v57, 11 }
  0xf3   : > { %857 = vst.msk [vmem:[#allocation2 + $0x28] sm:$0xf] %vm609_vm3, %v6965_v21  ;;  %v475_v31 = vadd.f32 %v7202_v26, %v8162_v37  ;;  %v466_v32 = vpop.f32.mrb[5].mxu0  ;;  %10073 = vst [vmem:[#allocation12_spill] sm:$0xff] %v8220_v11 }
  0xf4   : > { %855 = vst.msk [vmem:[#allocation2 + $0x18] sm:$0xf] %vm609_vm3, %v6963_v25  ;;  %v467_v46 = vadd.f32 %v8162_v37, %v466_v32  ;;  %v7203_v47 = vpop.f32.mrb[6].mxu0  ;;  %10075 = vst [vmem:[#allocation14_spill] sm:$0xff] %v8227_v16 }
  0xf5   : > { %v583_v52 = vmax.f32 %v475_v31, 0.0  ;;  %v478_v55 = vadd.f32 %v7203_v47, %v8162_v37  ;;  %v469_v56 = vpop.f32.mrb[7].mxu0  ;;  %10076 = vst [vmem:[#allocation15_spill] sm:$0xff] %v8233_v23 }
  0xf6   : > { %v581_v60 = vmax.f32 %v467_v46, 0.0  ;;  %v470_v61 = vadd.f32 %v8162_v37, %v469_v56 }
  0xf7   : > { %v6968_v1 = vpack.c.bf16 %v583_v52, %v583_v52  ;;  %v584_v3 = vmax.f32 %v478_v55, 0.0  ;;  %v7914_v52 = vld [vmem:[%s9991_s3 + $0x8] sm:$0xff]  }
  0xf8   : > { %v6966_v7 = vpack.c.bf16 %v581_v60, %v581_v60  ;;  %v582_v8 = vmax.f32 %v470_v61, 0.0  ;;  %v8216_v9 = vld [vmem:[#allocation2 + $0x24] sm:$0xf] }
  0xf9   : > { %860 = vst.msk [vmem:[#allocation2 + $0x44] sm:$0xf] %vm609_vm3, %v6968_v1  ;;  %v6969_v12 = vpack.c.bf16 %v584_v3, %v584_v3  ;;  %v8223_v13 = vld [vmem:[#allocation2 + $0x14] sm:$0xf]  ;;  %v986_v22 = vshrl.u32 %v8216_v9, 16 }
  0xfa   : > { %v2658_v14 = vld [vmem:[#allocation2 + $0x14] sm:$0xf]  ;;  %858 = vst.msk [vmem:[#allocation2 + $0x34] sm:$0xf] %vm609_vm3, %v6966_v7  ;;  %v6967_v17 = vpack.c.bf16 %v582_v8, %v582_v8  ;;  %v7206_v19 = vpop.f32.mrb[8].mxu0  ;;  %v964_v29 = vshrl.u32 %v8223_v13, 16 }
  0xfb   : > { %v2711_v20 = vshrl.u32 %v2658_v14, 16  ;;  %v8230_v21 = vld [vmem:[#allocation2 + $0x28] sm:$0xf]  ;;  %861 = vst.msk [vmem:[#allocation2 + $0x48] sm:$0xf] %vm609_vm3, %v6969_v12  ;;  %v491_v24 = vadd.f32 %v7206_v19, %v8162_v37  ;;  %v482_v25 = vpop.f32.mrb[9].mxu0 }
  0xfc   : > { %v8237_v26 = vld [vmem:[#allocation2 + $0x18] sm:$0xf]  ;;  %859 = vst.msk [vmem:[#allocation2 + $0x38] sm:$0xf] %vm609_vm3, %v6967_v17  ;;  %v483_v31 = vadd.f32 %v8162_v37, %v482_v25  ;;  %v7207_v32 = vpop.f32.mrb[10].mxu0  ;;  %v6547_v46 = vcombine.low %v8216_v9, %v8230_v21  ;;  %v8256_v61 = vrot.slane %v964_v29, 7 }
  0xfd   : > { %v2659_v30 = vld [vmem:[#allocation2 + $0x18] sm:$0xf]  ;;  %v587_v47 = vmax.f32 %v491_v24, 0.0  ;;  %v494_v48 = vadd.f32 %v7207_v32, %v8162_v37  ;;  %v485_v49 = vpop.f32.mrb[11].mxu0  ;;  %v973_v50 = vshrl.u32 %v8237_v26, 16  ;;  %v6546_v51 = vcombine.low %v8223_v13, %v8237_v26  ;;  %v7916_v25 = vld [vmem:[%s9991_s3 + $0x10] sm:$0xff]  }
  0xfe   : > { %v585_v55 = vmax.f32 %v483_v31, 0.0  ;;  %v486_v56 = vadd.f32 %v8162_v37, %v485_v49  ;;  %v8254_v57 = vrot.slane %v2711_v20, 7  ;;  %v2720_v58 = vshrl.u32 %v2659_v30, 16  ;;  %v8259_v0 = vld [vmem:[#allocation2 + $0x24] sm:$0xf] }
  0xff   : > { %v6972_v59 = vpack.c.bf16 %v587_v47, %v587_v47  ;;  %v588_v60 = vmax.f32 %v494_v48, 0.0  ;;  %7237 = vmatmul.mubr.msk.bf16.vlgmr.msra.gmra.mrb[32].mxu0 %vm1409_vm4, %v6546_v51  ;;  %v2714_v63 = vshll.u32 %v2658_v14, 16  ;;  %v8263_v12 = vld [vmem:[#allocation2 + $0x28] sm:$0xf]  ;;  %v2723_v19 = vshll.u32 %v2659_v30, 16 }
 0x100   : > { %10077 = vst [vmem:[#allocation16_spill] sm:$0xff] %v8254_v57  ;;  %v6970_v1 = vpack.c.bf16 %v585_v55, %v585_v55  ;;  %v586_v3 = vmax.f32 %v486_v56, 0.0  ;;  %v2722_v8 = vrot.slane %v2720_v58, 7  ;;  %7240 = vmatprep.mubr.msk.bf16.mxu0 %vm1409_vm4, %v6547_v46  ;;  %7269 = vmatpush3.bf16.msra.mxu0 %v8111_v38  ;;  %v6729_v20 = vcombine.low %v2658_v14, %v2659_v30  ;;  %v8322_v7 = vld [vmem:[#allocation2 + $0x44] sm:$0xf] }
 0x101   : > { %864 = vst.msk [vmem:[#allocation2 + $0x64] sm:$0xf] %vm609_vm3, %v6972_v59  ;;  %v6973_v17 = vpack.c.bf16 %v588_v60, %v588_v60  ;;  %v995_v24 = vshrl.u32 %v8230_v21, 16  ;;  %7270 = vmatprep.subr.bf16.mxu0 %v7914_v52  ;;  %v8272_v31 = vrot.slane %v973_v50, 7  ;;  %v8275_v32 = vor.u32 %v2714_v63, %v8254_v57  ;;  %v8286_v50 = vld [vmem:[#allocation2 + $0x34] sm:$0xf] }
 0x102   : > { %862 = vst.msk [vmem:[#allocation2 + $0x54] sm:$0xf] %vm609_vm3, %v6970_v1  ;;  %v6971_v29 = vpack.c.bf16 %v586_v3, %v586_v3  ;;  %v2733_v38 = vshrl.u32 %v8259_v0, 16  ;;  %v7210_v46 = vpop.f32.mrb[12].mxu0  ;;  %v8280_v30 = vor.u32 %v2723_v19, %v2722_v8  ;;  %7396 = vmatprep.mubr.msk.bf16.mxu1 %vm1409_vm4, %v6729_v20  ;;  %v8283_v47 = vrot.slane %v986_v22, 7  ;;  %v7892_v22 = vld [vmem:[%s9991_s3 + $0xa8] sm:$0xff]  }
 0x103   : > { %10078 = vst [vmem:[#allocation17_spill] sm:$0xff] %v8275_v32  ;;  %865 = vst.msk [vmem:[#allocation2 + $0x68] sm:$0xf] %vm609_vm3, %v6973_v17  ;;  %v2742_v48 = vshrl.u32 %v8263_v12, 16  ;;  %v498_v49 = vpop.f32.mrb[13].mxu0  ;;  %v6730_v55 = vcombine.low %v8259_v0, %v8263_v12  ;;  %v507_v56 = vadd.f32 %v7210_v46, %v8162_v37  ;;  %v7919_v60 = vld [vmem:[%s9991_s3 + $0x18] sm:$0xff]  }
 0x104   : > { %10079 = vst [vmem:[#allocation18_spill] sm:$0xff] %v8280_v30  ;;  %863 = vst.msk [vmem:[#allocation2 + $0x58] sm:$0xf] %vm609_vm3, %v6971_v29  ;;  %v8289_v51 = vrot.slane %v2733_v38, 7  ;;  %v499_v58 = vadd.f32 %v8162_v37, %v498_v49  ;;  %v7211_v59 = vpop.f32.mrb[14].mxu0  ;;  %7271 = vmatpush3.bf16.msra.mxu0 %v7914_v52  ;;  %v8301_v63 = vrot.slane %v995_v24, 7 }
 0x105   : > { %v510_v8 = vadd.f32 %v7211_v59, %v8162_v37  ;;  %v501_v17 = vpop.f32.mrb[15].mxu0  ;;  %v8306_v19 = vld [vmem:[#allocation2 + $0x38] sm:$0xf]  ;;  %7272 = vmatprep.subr.bf16.mxu0 %v7916_v25  ;;  %7397 = vmatmul.mubr.msk.bf16.vlgmr.msra.gmra.mrb[0].mxu1 %vm1409_vm4, %v6730_v55  ;;  %v591_v52 = vmax.f32 %v507_v56, 0.0  ;;  %v1008_v38 = vshrl.u32 %v8286_v50, 16  ;;  %v8313_v46 = vrot.slane %v2742_v48, 7 }
 0x106   : > { %10080 = vst [vmem:[#allocation19_spill] sm:$0xff] %v8289_v51  ;;  %v589_v29 = vmax.f32 %v499_v58, 0.0  ;;  %v8311_v24 = vld [vmem:[#allocation2 + $0x34] sm:$0xf]  ;;  %7429 = vmatpush3.bf16.msra.mxu1 %v8098_v34  ;;  %v502_v59 = vadd.f32 %v8162_v37, %v501_v17  ;;  %v8318_v1 = vld [vmem:[#allocation2 + $0x38] sm:$0xf]  ;;  %v6548_v17 = vcombine.low %v8286_v50, %v8306_v19 }
 0x107   : > { %10081 = vst [vmem:[#allocation20_spill] sm:$0xff] %v8311_v24  ;;  %v592_v49 = vmax.f32 %v510_v8, 0.0  ;;  %10082 = vst [vmem:[#allocation21_spill] sm:$0xff] %v8318_v1  ;;  %v6976_v55 = vpack.c.bf16 %v591_v52, %v591_v52  ;;  %v1017_v58 = vshrl.u32 %v8306_v19, 16  ;;  %7430 = vmatprep.subr.bf16.mxu1 %v7892_v22  ;;  %v7901_v34 = vld [vmem:[%s9991_s3 + $0xb0] sm:$0xff]   ;;  %v2755_v14 = vshrl.u32 %v8311_v24, 16 }
 0x108   : > { %v6974_v56 = vpack.c.bf16 %v589_v29, %v589_v29  ;;  %7273 = vmatpush3.bf16.msra.mxu0 %v7916_v25  ;;  %v590_v8 = vmax.f32 %v502_v59, 0.0  ;;  %v8330_v44 = vld [vmem:[#allocation2 + $0x48] sm:$0xf]  ;;  %v8332_v52 = vld [vmem:[#allocation2 + $0x44] sm:$0xf]  ;;  %v8336_v29 = vrot.slane %v1008_v38, 7 }
 0x109   : > { %v6977_v48 = vpack.c.bf16 %v592_v49, %v592_v49  ;;  %10083 = vst [vmem:[#allocation22_spill] sm:$0xff] %v8332_v52  ;;  %7274 = vmatprep.subr.bf16.mxu0 %v7919_v60  ;;  %868 = vst.msk [vmem:[#allocation2 + $0x84] sm:$0xf] %vm609_vm3, %v6976_v55  ;;  %v8338_v36 = vrot.slane %v1017_v58, 7  ;;  %v2764_v49 = vshrl.u32 %v8318_v1, 16  ;;  %7241 = vmatmul.mubr.msk.bf16.gmra.mrb[36].mxu0 %vm1409_vm4, %v6548_v17  ;;  %v1030_v38 = vshrl.u32 %v8322_v7, 16 }
 0x10a   : > { %866 = vst.msk [vmem:[#allocation2 + $0x74] sm:$0xf] %vm609_vm3, %v6974_v56  ;;  %v7214_v59 = vpop.f32.mrb[16].mxu0  ;;  %v6975_v20 = vpack.c.bf16 %v590_v8, %v590_v8  ;;  %v6731_v55 = vcombine.low %v8311_v24, %v8318_v1  ;;  %v8348_v56 = vld [vmem:[#allocation2 + $0x48] sm:$0xf]  ;;  %7431 = vmatpush3.bf16.msra.mxu1 %v7892_v22  ;;  %v8350_v25 = vrot.slane %v2755_v14, 7 }
 0x10b   : > { %869 = vst.msk [vmem:[#allocation2 + $0x88] sm:$0xf] %vm609_vm3, %v6977_v48  ;;  %10084 = vst [vmem:[#allocation23_spill] sm:$0xff] %v8348_v56  ;;  %v514_v58 = vpop.f32.mrb[17].mxu0  ;;  %v8352_v32 = vrot.slane %v2764_v49, 7  ;;  %v1039_v8 = vshrl.u32 %v8330_v44, 16  ;;  %7432 = vmatprep.subr.bf16.mxu1 %v7901_v34  ;;  %v6549_v49 = vcombine.low %v8322_v7, %v8330_v44 }
 0x10c   : > { %10085 = vst [vmem:[#allocation24_spill] sm:$0xff] %v8350_v25  ;;  %v7215_v17 = vpop.f32.mrb[18].mxu0  ;;  %v7911_v3 = vld [vmem:[%s9991_s3 + $0xb8] sm:$0xff]   ;;  %7275 = vmatpush3.bf16.msra.mxu0 %v7919_v60  ;;  %867 = vst.msk [vmem:[#allocation2 + $0x78] sm:$0xf] %vm609_vm3, %v6975_v20  ;;  %7400 = vmatprep.mubr.msk.bf16.mxu1 %vm1409_vm4, %v6731_v55  ;;  %v2777_v48 = vshrl.u32 %v8332_v52, 16  ;;  %v6732_v55 = vcombine.low %v8332_v52, %v8348_v56  ;;  %v523_v25 = vadd.f32 %v7214_v59, %v8162_v37 }
 0x10d   : > { %10086 = vst [vmem:[#allocation25_spill] sm:$0xff] %v8352_v32  ;;  %v517_v1 = vpop.f32.mrb[19].mxu0  ;;  %v8366_v32 = vld [vmem:[#allocation2 + $0x54] sm:$0xf]  ;;  %v8368_v24 = vrot.slane %v1030_v38, 7  ;;  %v2786_v20 = vshrl.u32 %v8348_v56, 16  ;;  %7244 = vmatprep.mubr.msk.bf16.mxu0 %vm1409_vm4, %v6549_v49  ;;  %v515_v57 = vadd.f32 %v8162_v37, %v514_v58  ;;  %v526_v38 = vadd.f32 %v7215_v17, %v8162_v37 }
 0x10e   : > { %v8374_v14 = vld [vmem:[#allocation2 + $0x58] sm:$0xf]  ;;  %v8376_v22 = vrot.slane %v1039_v8, 7  ;;  %7433 = vmatpush3.bf16.msra.mxu1 %v7901_v34  ;;  %v8382_v30 = vrot.slane %v2777_v48, 7  ;;  %v518_v52 = vadd.f32 %v8162_v37, %v517_v1  ;;  %v1052_v8 = vshrl.u32 %v8366_v32, 16  ;;  %v8393_v59 = vld [vmem:[%s9991_s3 + $0xc0] sm:$0xff]  }
 0x10f   : > { %7401 = vmatmul.mubr.msk.bf16.gmra.mrb[4].mxu1 %vm1409_vm4, %v6732_v55  ;;  %v8388_v45 = vld [vmem:[#allocation2 + $0x54] sm:$0xf]  ;;  %7434 = vmatprep.subr.bf16.mxu1 %v7911_v3  ;;  %v595_v58 = vmax.f32 %v523_v25, 0.0  ;;  %v593_v34 = vmax.f32 %v515_v57, 0.0  ;;  %v596_v48 = vmax.f32 %v526_v38, 0.0  ;;  %v1061_v17 = vshrl.u32 %v8374_v14, 16 }
 0x110   : > { %10087 = vst [vmem:[#allocation26_spill] sm:$0xff] %v8382_v30  ;;  %10088 = vst [vmem:[#allocation27_spill] sm:$0xff] %v8388_v45  ;;  %v8396_v49 = vld [vmem:[#allocation2 + $0x58] sm:$0xf]  ;;  %v8398_v55 = vrot.slane %v2786_v20, 7  ;;  %v594_v1 = vmax.f32 %v518_v52, 0.0  ;;  %v6550_v56 = vcombine.low %v8366_v32, %v8374_v14 }
 0x111   : > { %10089 = vst [vmem:[#allocation28_spill] sm:$0xff] %v8396_v49  ;;  %v8403_v30 = vld [vmem:[#allocation2 + $0x64] sm:$0xf]  ;;  %v6980_v35 = vpack.c.bf16 %v595_v58, %v595_v58  ;;  %v6978_v16 = vpack.c.bf16 %v593_v34, %v593_v34  ;;  %v6981_v25 = vpack.c.bf16 %v596_v48, %v596_v48  ;;  %v8405_v57 = vrot.slane %v1052_v8, 7  ;;  %v8407_v38 = vld [vmem:[#allocation2 + $0x68] sm:$0xf] }
 0x112   : > { %10090 = vst [vmem:[#allocation29_spill] sm:$0xff] %v8398_v55  ;;  %10091 = vst [vmem:[#allocation30_spill] sm:$0xff] %v8403_v30  ;;  %v7218_v39 = vpop.f32.mrb[20].mxu0  ;;  %7435 = vmatpush3.bf16.msra.mxu1 %v7911_v3  ;;  %v6979_v20 = vpack.c.bf16 %v594_v1, %v594_v1  ;;  %7245 = vmatmul.mubr.msk.bf16.gmra.mrb[40].mxu0 %vm1409_vm4, %v6550_v56  ;;  %v2799_v60 = vshrl.u32 %v8388_v45, 16  ;;  %v2808_v55 = vshrl.u32 %v8396_v49, 16  ;;  %v8419_v3 = vrot.slane %v1061_v17, 7 }
 0x113   : > { %10092 = vst [vmem:[#allocation31_spill] sm:$0xff] %v8407_v38  ;;  %v530_v15 = vpop.f32.mrb[21].mxu0  ;;  %v8413_v23 = vld [vmem:[#allocation2 + $0x64] sm:$0xf]  ;;  %7468 = vmatprep.subr.bf16.mxu1 %v8393_v59  ;;  %872 = vst.msk [vmem:[#allocation2 + $0xa4] sm:$0xf] %vm609_vm3, %v6980_v35  ;;  %v6733_v56 = vcombine.low %v8388_v45, %v8396_v49  ;;  %v6551_v45 = vcombine.low %v8403_v30, %v8407_v38 }
 0x114   : > { %10093 = vst [vmem:[#allocation32_spill] sm:$0xff] %v8413_v23  ;;  %v7219_v58 = vpop.f32.mrb[22].mxu0  ;;  %870 = vst.msk [vmem:[#allocation2 + $0x94] sm:$0xf] %vm609_vm3, %v6978_v16  ;;  %v1074_v34 = vshrl.u32 %v8403_v30, 16  ;;  %v8428_v52 = vrot.slane %v2799_v60, 7 }
 0x115   : > { %873 = vst.msk [vmem:[#allocation2 + $0xa8] sm:$0xf] %vm609_vm3, %v6981_v25  ;;  %v8425_v48 = vld [vmem:[#allocation2 + $0x68] sm:$0xf]  ;;  %v533_v1 = vpop.f32.mrb[23].mxu0  ;;  %v1083_v17 = vshrl.u32 %v8407_v38, 16  ;;  %7404 = vmatprep.mubr.msk.bf16.mxu1 %vm1409_vm4, %v6733_v56  ;;  %7248 = vmatprep.mubr.msk.bf16.mxu0 %vm1409_vm4, %v6551_v45 }
 0x116   : > { %10094 = vst [vmem:[#allocation33_spill] sm:$0xff] %v8425_v48  ;;  %871 = vst.msk [vmem:[#allocation2 + $0x98] sm:$0xf] %vm609_vm3, %v6979_v20  ;;  %v8433_v25 = vrot.slane %v2808_v55, 7  ;;  %v2821_v10 = vshrl.u32 %v8413_v23, 16  ;;  %v8445_v60 = vld [vmem:[%s9991_s3 + $0x40] sm:$0xff]   ;;  %v6734_v8 = vcombine.low %v8413_v23, %v8425_v48 }
 0x117   : > { %10095 = vst [vmem:[#allocation34_spill] sm:$0xff] %v8428_v52  ;;  %v8440_v20 = vld [vmem:[#allocation2 + $0x74] sm:$0xf]  ;;  %v8447_v35 = vrot.slane %v1074_v34, 7  ;;  %v2830_v56 = vshrl.u32 %v8425_v48, 16  ;;  %v8455_v49 = vrot.slane %v1083_v17, 7  ;;  %v531_v52 = vadd.f32 %v8162_v37, %v530_v15  ;;  %7308 = vmatprep.subr.bf16.mxu0 %v8445_v60 }
 0x118   : > { %10096 = vst [vmem:[#allocation35_spill] sm:$0xff] %v8433_v25  ;;  %10097 = vst [vmem:[#allocation36_spill] sm:$0xff] %v8440_v20  ;;  %v8453_v16 = vld [vmem:[#allocation2 + $0x78] sm:$0xf]  ;;  %v539_v25 = vadd.f32 %v7218_v39, %v8162_v37  ;;  %v542_v34 = vadd.f32 %v7219_v58, %v8162_v37  ;;  %v8461_v5 = vld [vmem:[#allocation2 + $0x74] sm:$0xf]  ;;  %7405 = vmatmul.mubr.msk.bf16.gmra.mrb[8].mxu1 %vm1409_vm4, %v6734_v8  ;;  %v534_v17 = vadd.f32 %v8162_v37, %v533_v1 }
 0x119   : > { %10098 = vst [vmem:[#allocation37_spill] sm:$0xff] %v8447_v35  ;;  %10099 = vst [vmem:[#allocation38_spill] sm:$0xff] %v8453_v16  ;;  %v8464_v55 = vrot.slane %v2821_v10, 7  ;;  %v1096_v45 = vshrl.u32 %v8440_v20, 16  ;;  %v8470_v4 = vld [vmem:[#allocation2 + $0x78] sm:$0xf]  ;;  %v6552_v8 = vcombine.low %v8440_v20, %v8453_v16 }
 0x11a   : > { %10100 = vst [vmem:[#allocation39_spill] sm:$0xff] %v8455_v49  ;;  %10101 = vst [vmem:[#allocation40_spill] sm:$0xff] %v8461_v5  ;;  %v7222_v39 = vpop.f32.mrb[24].mxu0  ;;  %v599_v15 = vmax.f32 %v539_v25, 0.0  ;;  %v597_v11 = vmax.f32 %v531_v52, 0.0  ;;  %v600_v58 = vmax.f32 %v542_v34, 0.0 }
 0x11b   : > { %10102 = vst [vmem:[#allocation41_spill] sm:$0xff] %v8464_v55  ;;  %10103 = vst [vmem:[#allocation42_spill] sm:$0xff] %v8470_v4  ;;  %v1105_v33 = vshrl.u32 %v8453_v16, 16  ;;  %v546_v38 = vpop.f32.mrb[25].mxu0  ;;  %v8473_v49 = vrot.slane %v2830_v56, 7  ;;  %v598_v10 = vmax.f32 %v534_v17, 0.0  ;;  %7249 = vmatmul.mubr.msk.bf16.gmra.mrb[44].mxu0 %vm1409_vm4, %v6552_v8 }
 0x11c   : > { %v8478_v1 = vld [vmem:[#allocation2 + $0x84] sm:$0xf]  ;;  %v7223_v48 = vpop.f32.mrb[26].mxu0  ;;  %v6984_v55 = vpack.c.bf16 %v599_v15, %v599_v15  ;;  %v6982_v18 = vpack.c.bf16 %v597_v11, %v597_v11  ;;  %v6985_v28 = vpack.c.bf16 %v600_v58, %v600_v58  ;;  %v8480_v25 = vrot.slane %v1096_v45, 7  ;;  %v8482_v52 = vld [vmem:[#allocation2 + $0x88] sm:$0xf] }
 0x11d   : > { %10104 = vst [vmem:[#allocation43_spill] sm:$0xff] %v8473_v49  ;;  %10105 = vst [vmem:[#allocation44_spill] sm:$0xff] %v8478_v1  ;;  %v549_v34 = vpop.f32.mrb[27].mxu0  ;;  %v6983_v30 = vpack.c.bf16 %v598_v10, %v598_v10  ;;  %v2843_v17 = vshrl.u32 %v8461_v5, 16  ;;  %v2852_v23 = vshrl.u32 %v8470_v4, 16  ;;  %v8493_v11 = vrot.slane %v1105_v33, 7 }
 0x11e   : > { %10106 = vst [vmem:[#allocation45_spill] sm:$0xff] %v8480_v25  ;;  %10107 = vst [vmem:[#allocation46_spill] sm:$0xff] %v8482_v52  ;;  %v8488_v49 = vld [vmem:[#allocation2 + $0x84] sm:$0xf]  ;;  %v6735_v15 = vcombine.low %v8461_v5, %v8470_v4  ;;  %v1118_v58 = vshrl.u32 %v8478_v1, 16  ;;  %v6553_v56 = vcombine.low %v8478_v1, %v8482_v52 }
 0x11f   : > { %10108 = vst [vmem:[#allocation47_spill] sm:$0xff] %v8488_v49  ;;  %876 = vst.msk [vmem:[#allocation2 + $0xc4] sm:$0xf] %vm609_vm3, %v6984_v55  ;;  %v8499_v10 = vld [vmem:[#allocation2 + $0x88] sm:$0xf]  ;;  %v8502_v8 = vrot.slane %v2843_v17, 7 }
 0x120   : > { %874 = vst.msk [vmem:[#allocation2 + $0xb4] sm:$0xf] %vm609_vm3, %v6982_v18  ;;  %877 = vst.msk [vmem:[#allocation2 + $0xc8] sm:$0xf] %vm609_vm3, %v6985_v28  ;;  %v1127_v28 = vshrl.u32 %v8482_v52, 16  ;;  %v8507_v33 = vrot.slane %v2852_v23, 7  ;;  %7408 = vmatprep.mubr.msk.bf16.mxu1 %vm1409_vm4, %v6735_v15  ;;  %v6736_v23 = vcombine.low %v8488_v49, %v8499_v10  ;;  %7252 = vmatprep.mubr.msk.bf16.mxu0 %vm1409_vm4, %v6553_v56 }
 0x121   : > { %10109 = vst [vmem:[#allocation48_spill] sm:$0xff] %v8493_v11  ;;  %10110 = vst [vmem:[#allocation49_spill] sm:$0xff] %v8499_v10  ;;  %v2865_v5 = vshrl.u32 %v8488_v49, 16  ;;  %v8516_v17 = vrot.slane %v1118_v58, 7  ;;  %v2874_v18 = vshrl.u32 %v8499_v10, 16  ;;  %v558_v58 = vadd.f32 %v7223_v48, %v8162_v37 }
 0x122   : > { %875 = vst.msk [vmem:[#allocation2 + $0xb8] sm:$0xf] %vm609_vm3, %v6983_v30  ;;  %10111 = vst [vmem:[#allocation50_spill] sm:$0xff] %v8502_v8  ;;  %v8514_v30 = vld [vmem:[#allocation2 + $0x94] sm:$0xf]  ;;  %v7226_v15 = vpop.f32.mrb[28].mxu0  ;;  %v547_v8 = vadd.f32 %v8162_v37, %v546_v38  ;;  %7409 = vmatmul.mubr.msk.bf16.gmra.mrb[12].mxu1 %vm1409_vm4, %v6736_v23 }
 0x123   : > { %10112 = vst [vmem:[#allocation51_spill] sm:$0xff] %v8507_v33  ;;  %10113 = vst [vmem:[#allocation52_spill] sm:$0xff] %v8516_v17  ;;  %v8522_v4 = vld [vmem:[#allocation2 + $0x98] sm:$0xf]  ;;  %v8524_v45 = vrot.slane %v1127_v28, 7  ;;  %v555_v33 = vadd.f32 %v7222_v39, %v8162_v37  ;;  %v562_v55 = vpop.f32.mrb[29].mxu0  ;;  %v550_v28 = vadd.f32 %v8162_v37, %v549_v34 }
 0x124   : > { %v8530_v52 = vld [vmem:[#allocation2 + $0x94] sm:$0xf]  ;;  %v8532_v1 = vrot.slane %v2865_v5, 7  ;;  %v8538_v56 = vld [vmem:[#allocation2 + $0x98] sm:$0xf]  ;;  %v7227_v39 = vpop.f32.mrb[30].mxu0  ;;  %v6554_v23 = vcombine.low %v8514_v30, %v8522_v4 }
 0x125   : > { %10114 = vst [vmem:[#allocation53_spill] sm:$0xff] %v8524_v45  ;;  %10115 = vst [vmem:[#allocation54_spill] sm:$0xff] %v8530_v52  ;;  %v1140_v45 = vshrl.u32 %v8514_v30, 16  ;;  %v603_v17 = vmax.f32 %v555_v33, 0.0  ;;  %v601_v38 = vmax.f32 %v547_v8, 0.0  ;;  %v604_v16 = vmax.f32 %v558_v58, 0.0 }
 0x126   : > { %10116 = vst [vmem:[#allocation55_spill] sm:$0xff] %v8532_v1  ;;  %10117 = vst [vmem:[#allocation56_spill] sm:$0xff] %v8538_v56  ;;  %v1149_v48 = vshrl.u32 %v8522_v4, 16  ;;  %v565_v11 = vpop.f32.mrb[31].mxu0  ;;  %v8541_v20 = vrot.slane %v2874_v18, 7  ;;  %v602_v5 = vmax.f32 %v550_v28, 0.0  ;;  %7253 = vmatmul.mubr.msk.bf16.gmra.mrb[48].mxu0 %vm1409_vm4, %v6554_v23 }
 0x127   : > { %v8546_v34 = vld [vmem:[#allocation2 + $0xa4] sm:$0xf]  ;;  %v6988_v10 = vpack.c.bf16 %v603_v17, %v603_v17  ;;  %v6986_v1 = vpack.c.bf16 %v601_v38, %v601_v38  ;;  %v6989_v25 = vpack.c.bf16 %v604_v16, %v604_v16  ;;  %v8548_v35 = vrot.slane %v1140_v45, 7  ;;  %v8550_v8 = vld [vmem:[#allocation2 + $0xa8] sm:$0xf] }
 0x128   : > { %10118 = vst [vmem:[#allocation57_spill] sm:$0xff] %v8541_v20  ;;  %10119 = vst [vmem:[#allocation58_spill] sm:$0xff] %v8546_v34  ;;  %v6987_v33 = vpack.c.bf16 %v602_v5, %v602_v5  ;;  %v2887_v18 = vshrl.u32 %v8530_v52, 16  ;;  %v2896_v28 = vshrl.u32 %v8538_v56, 16  ;;  %v8556_v49 = vld [vmem:[#allocation2 + $0xa4] sm:$0xf]  ;;  %v6737_v17 = vcombine.low %v8530_v52, %v8538_v56 }
 0x129   : > { %10120 = vst [vmem:[#allocation59_spill] sm:$0xff] %v8550_v8  ;;  %10121 = vst [vmem:[#allocation60_spill] sm:$0xff] %v8556_v49  ;;  %v8561_v16 = vrot.slane %v1149_v48, 7  ;;  %v1162_v38 = vshrl.u32 %v8546_v34, 16  ;;  %v8567_v5 = vld [vmem:[#allocation2 + $0xa8] sm:$0xf]  ;;  %v6555_v58 = vcombine.low %v8546_v34, %v8550_v8  ;;  %v571_v45 = vadd.f32 %v7226_v15, %v8162_v37 }
 0x12a   : > { %880 = vst.msk [vmem:[#allocation2 + $0xe4] sm:$0xf] %vm609_vm3, %v6988_v10  ;;  %878 = vst.msk [vmem:[#allocation2 + $0xd4] sm:$0xf] %vm609_vm3, %v6986_v1  ;;  %v8570_v23 = vrot.slane %v2887_v18, 7  ;;  %v8575_v48 = vrot.slane %v2896_v28, 7  ;;  %7412 = vmatprep.mubr.msk.bf16.mxu1 %vm1409_vm4, %v6737_v17  ;;  %v6738_v28 = vcombine.low %v8556_v49, %v8567_v5 }
 0x12b   : > { %881 = vst.msk [vmem:[#allocation2 + $0xe8] sm:$0xf] %vm609_vm3, %v6989_v25  ;;  %10122 = vst [vmem:[#allocation61_spill] sm:$0xff] %v8567_v5  ;;  %v1171_v25 = vshrl.u32 %v8550_v8, 16  ;;  %v2909_v52 = vshrl.u32 %v8556_v49, 16  ;;  %v8584_v18 = vrot.slane %v1162_v38, 7  ;;  %7256 = vmatprep.mubr.msk.bf16.mxu0 %vm1409_vm4, %v6555_v58  ;;  %v574_v38 = vadd.f32 %v7227_v39, %v8162_v37 }
 0x12c   : > { %879 = vst.msk [vmem:[#allocation2 + $0xd8] sm:$0xf] %vm609_vm3, %v6987_v33  ;;  %10123 = vst [vmem:[#allocation62_spill] sm:$0xff] %v8570_v23  ;;  %v8582_v33 = vld [vmem:[#allocation2 + $0xb4] sm:$0xf]  ;;  %v2918_v1 = vshrl.u32 %v8567_v5, 16  ;;  %7413 = vmatmul.mubr.msk.bf16.gmra.mrb[16].mxu1 %vm1409_vm4, %v6738_v28  ;;  %v566_v49 = vadd.f32 %v8162_v37, %v565_v11 }
 0x12d   : > { %10124 = vst [vmem:[#allocation63_spill] sm:$0xff] %v8575_v48  ;;  %v8590_v56 = vld [vmem:[#allocation2 + $0xb8] sm:$0xf]  ;;  %v8592_v17 = vrot.slane %v1171_v25, 7  ;;  %v563_v48 = vadd.f32 %v8162_v37, %v562_v55  ;;  %v8598_v23 = vrot.slane %v2909_v52, 7  ;;  %v1184_v20 = vshrl.u32 %v8582_v33, 16 }
 0x12e   : > { %v8604_v25 = vld [vmem:[#allocation2 + $0xb4] sm:$0xf]  ;;  %v607_v8 = vmax.f32 %v571_v45, 0.0  ;;  %v1193_v15 = vshrl.u32 %v8590_v56, 16  ;;  %v8607_v55 = vld [vmem:[#allocation2 + $0xb8] sm:$0xf]  ;;  %v6556_v28 = vcombine.low %v8582_v33, %v8590_v56 }
 0x12f   : > { %10125 = vst [vmem:[#allocation64_spill] sm:$0xff] %v8592_v17  ;;  %10126 = vst [vmem:[#allocation65_spill] sm:$0xff] %v8598_v23  ;;  %v605_v58 = vmax.f32 %v563_v48, 0.0  ;;  %v608_v17 = vmax.f32 %v574_v38, 0.0  ;;  %v8609_v39 = vrot.slane %v2918_v1, 7  ;;  %v606_v52 = vmax.f32 %v566_v49, 0.0 }
 0x130   : > { %10127 = vst [vmem:[#allocation66_spill] sm:$0xff] %v8604_v25  ;;  %10128 = vst [vmem:[#allocation67_spill] sm:$0xff] %v8607_v55  ;;  %v8614_v37 = vld [vmem:[#allocation2 + $0xc4] sm:$0xf]  ;;  %v6992_v11 = vpack.c.bf16 %v607_v8, %v607_v8  ;;  %v8616_v45 = vrot.slane %v1184_v20, 7  ;;  %7257 = vmatmul.mubr.msk.bf16.gmra.mrb[52].mxu0 %vm1409_vm4, %v6556_v28  ;;  %v2931_v49 = vshrl.u32 %v8604_v25, 16 }
 0x131   : > { %10129 = vst [vmem:[#allocation68_spill] sm:$0xff] %v8609_v39  ;;  %10130 = vst [vmem:[#allocation69_spill] sm:$0xff] %v8614_v37  ;;  %v6990_v5 = vpack.c.bf16 %v605_v58, %v605_v58  ;;  %v6993_v23 = vpack.c.bf16 %v608_v17, %v608_v17  ;;  %v8618_v48 = vld [vmem:[#allocation2 + $0xc8] sm:$0xf]  ;;  %v8620_v38 = vld [vmem:[#allocation2 + $0xc4] sm:$0xf]  ;;  %v6991_v34 = vpack.c.bf16 %v606_v52, %v606_v52 }
 0x132   : > { %10131 = vst [vmem:[#allocation70_spill] sm:$0xff] %v8618_v48  ;;  %10132 = vst [vmem:[#allocation71_spill] sm:$0xff] %v8620_v38  ;;  %v2940_v10 = vshrl.u32 %v8607_v55, 16  ;;  %v8626_v39 = vld [vmem:[#allocation2 + $0xc8] sm:$0xf]  ;;  %v8631_v20 = vrot.slane %v1193_v15, 7  ;;  %v6739_v17 = vcombine.low %v8604_v25, %v8607_v55  ;;  %v6557_v25 = vcombine.low %v8614_v37, %v8618_v48 }
 0x133   : > { %10133 = vst [vmem:[#allocation72_spill] sm:$0xff] %v8626_v39  ;;  %884 = vst.msk [vmem:[#allocation2 + $0x104] sm:$0xf] %vm609_vm3, %v6992_v11  ;;  %v1206_v58 = vshrl.u32 %v8614_v37, 16  ;;  %v8637_v52 = vld [vmem:[#allocation2 + $0xd4] sm:$0xf] }
 0x134   : > { %882 = vst.msk [vmem:[#allocation2 + $0xf4] sm:$0xf] %vm609_vm3, %v6990_v5  ;;  %885 = vst.msk [vmem:[#allocation2 + $0x108] sm:$0xf] %vm609_vm3, %v6993_v23  ;;  %v8640_v28 = vrot.slane %v2931_v49, 7  ;;  %v1215_v23 = vshrl.u32 %v8618_v48, 16  ;;  %7416 = vmatprep.mubr.msk.bf16.mxu1 %vm1409_vm4, %v6739_v17  ;;  %7260 = vmatprep.mubr.msk.bf16.mxu0 %vm1409_vm4, %v6557_v25 }
 0x135   : > { %10134 = vst [vmem:[#allocation73_spill] sm:$0xff] %v8637_v52  ;;  %883 = vst.msk [vmem:[#allocation2 + $0xf8] sm:$0xf] %vm609_vm3, %v6991_v34  ;;  %v8645_v15 = vld [vmem:[#allocation2 + $0xd8] sm:$0xf]  ;;  %v8647_v8 = vrot.slane %v2940_v10, 7  ;;  %v6740_v10 = vcombine.low %v8620_v38, %v8626_v39 }
 0x136   : > { %10135 = vst [vmem:[#allocation74_spill] sm:$0xff] %v8640_v28  ;;  %10136 = vst [vmem:[#allocation75_spill] sm:$0xff] %v8645_v15  ;;  %v2953_v34 = vshrl.u32 %v8620_v38, 16  ;;  %v8654_v49 = vld [vmem:[#allocation2 + $0xd4] sm:$0xf]  ;;  %v8656_v11 = vrot.slane %v1206_v58, 7 }
 0x137   : > { %10137 = vst [vmem:[#allocation76_spill] sm:$0xff] %v8647_v8  ;;  %10138 = vst [vmem:[#allocation77_spill] sm:$0xff] %v8654_v49  ;;  %v2962_v55 = vshrl.u32 %v8626_v39, 16  ;;  %v8662_v8 = vld [vmem:[#allocation2 + $0xd8] sm:$0xf]  ;;  %v8664_v17 = vrot.slane %v1215_v23, 7  ;;  %7417 = vmatmul.mubr.msk.bf16.gmra.mrb[20].mxu1 %vm1409_vm4, %v6740_v10  ;;  %v6558_v23 = vcombine.low %v8637_v52, %v8645_v15 }
 0x138   : > { %10139 = vst [vmem:[#allocation78_spill] sm:$0xff] %v8656_v11  ;;  %10140 = vst [vmem:[#allocation79_spill] sm:$0xff] %v8662_v8  ;;  %v1228_v28 = vshrl.u32 %v8637_v52, 16  ;;  %v1237_v58 = vshrl.u32 %v8645_v15, 16  ;;  %v8670_v48 = vld [vmem:[#allocation2 + $0xe4] sm:$0xf]  ;;  %v6741_v52 = vcombine.low %v8654_v49, %v8662_v8 }
 0x139   : > { %10141 = vst [vmem:[#allocation80_spill] sm:$0xff] %v8664_v17  ;;  %10142 = vst [vmem:[#allocation81_spill] sm:$0xff] %v8670_v48  ;;  %v8672_v5 = vrot.slane %v2953_v34, 7  ;;  %v2975_v17 = vshrl.u32 %v8654_v49, 16  ;;  %v8679_v25 = vld [vmem:[#allocation2 + $0xe8] sm:$0xf]  ;;  %7261 = vmatmul.mubr.msk.bf16.gmra.mrb[56].mxu0 %vm1409_vm4, %v6558_v23 }
 0x13a   : > { %10144 = vst [vmem:[#allocation83_spill] sm:$0xff] %v8679_v25  ;;  %v8681_v1 = vrot.slane %v2962_v55, 7  ;;  %v8683_v39 = vrot.slane %v1228_v28, 7  ;;  %v2984_v34 = vshrl.u32 %v8662_v8, 16  ;;  %v8689_v10 = vrot.slane %v1237_v58, 7  ;;  %7420 = vmatprep.mubr.msk.bf16.mxu1 %vm1409_vm4, %v6741_v52 }
 0x13b   : > { %10143 = vst [vmem:[#allocation82_spill] sm:$0xff] %v8672_v5  ;;  %v8687_v5 = vld [vmem:[#allocation2 + $0xe4] sm:$0xf]  ;;  %v1250_v55 = vshrl.u32 %v8670_v48, 16  ;;  %v10150_v28 = vshll.u32 %v8259_v0, 16  ;;  %v10152_v58 = vshll.u32 %v8263_v12, 16  ;;  %v6559_v0 = vcombine.low %v8670_v48, %v8679_v25 }
 0x13c   : > { %10145 = vst [vmem:[#allocation84_spill] sm:$0xff] %v8681_v1  ;;  %10146 = vst [vmem:[#allocation85_spill] sm:$0xff] %v8683_v39  ;;  %v8696_v1 = vld [vmem:[#allocation2 + $0xe8] sm:$0xf]  ;;  %v8708_v23 = vrot.slane %v2975_v17, 7  ;;  %v1259_v38 = vshrl.u32 %v8679_v25, 16 }
 0x13d   : > { %10147 = vst [vmem:[#allocation86_spill] sm:$0xff] %v8687_v5  ;;  %10148 = vst [vmem:[#allocation87_spill] sm:$0xff] %v8689_v10  ;;  %v8701_v37 = vor.u32 %v10150_v28, %v8289_v51  ;;  %v8706_v15 = vor.u32 %v10152_v58, %v8313_v46  ;;  %v8711_v10 = vld [vmem:[#allocation2 + $0xf4] sm:$0xf]  ;;  %v8713_v49 = vld [vmem:[#allocation2 + $0xf8] sm:$0xf]  ;;  %7264 = vmatprep.mubr.msk.bf16.mxu0 %vm1409_vm4, %v6559_v0  ;;  %v6742_v11 = vcombine.low %v8687_v5, %v8696_v1 }
 0x13e   : > { %10149 = vst [vmem:[#allocation88_spill] sm:$0xff] %v8696_v1  ;;  %10154 = vst [vmem:[#allocation91_spill] sm:$0xff] %v8708_v23  ;;  %v8715_v39 = vrot.slane %v2984_v34, 7  ;;  %v2997_v12 = vshrl.u32 %v8687_v5, 16  ;;  %v8722_v46 = vld [vmem:[#allocation2 + $0xf4] sm:$0xf] }
 0x13f   : > { %10151 = vst [vmem:[#allocation89_spill] sm:$0xff] %v8701_v37  ;;  %10153 = vst [vmem:[#allocation90_spill] sm:$0xff] %v8706_v15  ;;  %v8724_v17 = vrot.slane %v1250_v55, 7  ;;  %v3006_v34 = vshrl.u32 %v8696_v1, 16  ;;  %v1272_v55 = vshrl.u32 %v8711_v10, 16  ;;  %v1281_v8 = vshrl.u32 %v8713_v49, 16  ;;  %7421 = vmatmul.mubr.msk.bf16.gmra.mrb[24].mxu1 %vm1409_vm4, %v6742_v11 }
 0x140   : > { %10155 = vst [vmem:[#allocation92_spill] sm:$0xff] %v8715_v39  ;;  %10156 = vst [vmem:[#allocation93_spill] sm:$0xff] %v8722_v46  ;;  %v8729_v39 = vld [vmem:[#allocation2 + $0xf8] sm:$0xf]  ;;  %v3733_v28 = vld [vmem:[#allocation2 + $0x14] sm:$0xf]  ;;  %v6560_v37 = vcombine.low %v8711_v10, %v8713_v49 }
 0x141   : > { %10157 = vst [vmem:[#allocation94_spill] sm:$0xff] %v8729_v39  ;;  %v8737_v23 = vrot.slane %v1259_v38, 7  ;;  %v3019_v51 = vshrl.u32 %v8722_v46, 16  ;;  %v8743_v0 = vld [vmem:[#allocation2 + $0x104] sm:$0xf]  ;;  %v8745_v52 = vrot.slane %v2997_v12, 7  ;;  %v6743_v48 = vcombine.low %v8722_v46, %v8729_v39 }
 0x142   : > { %v8747_v15 = vrot.slane %v3006_v34, 7  ;;  %v3028_v38 = vshrl.u32 %v8729_v39, 16  ;;  %v3734_v25 = vld [vmem:[#allocation2 + $0x18] sm:$0xf]  ;;  %v8754_v58 = vrot.slane %v1281_v8, 7  ;;  %7265 = vmatmul.mubr.msk.bf16.gmra.mrb[60].mxu0 %vm1409_vm4, %v6560_v37  ;;  %v3782_v1 = vshrl.u32 %v3733_v28, 16 }
 0x143   : > { %10158 = vst [vmem:[#allocation95_spill] sm:$0xff] %v8737_v23  ;;  %10159 = vst [vmem:[#allocation96_spill] sm:$0xff] %v8745_v52  ;;  %v8752_v23 = vrot.slane %v1272_v55, 7  ;;  %v2704_v12 = vld [vmem:[#allocation2 + $0x108] sm:$0xf]  ;;  %v8760_v34 = vrot.slane %v3019_v51, 7  ;;  %7424 = vmatprep.mubr.msk.bf16.mxu1 %vm1409_vm4, %v6743_v48  ;;  %7276 = vmatprep.mubr.msk.bf16.mxu0 %vm1409_vm4, %v8141_v6 }
 0x144   : > { %10160 = vst [vmem:[#allocation97_spill] sm:$0xff] %v8747_v15  ;;  %v8765_v55 = vrot.slane %v3028_v38, 7  ;;  %v3785_v52 = vshll.u32 %v3733_v28, 16  ;;  %v6744_v51 = vcombine.low %v8743_v0, %v2704_v12  ;;  %v3791_v37 = vshll.u32 %v3734_v25, 16  ;;  %v3736_v28 = vld [vmem:[#allocation2 + $0x24] sm:$0xf] }
 0x145   : > { %10161 = vst [vmem:[#allocation98_spill] sm:$0xff] %v8760_v34  ;;  %v3795_v34 = vshrl.u32 %v3734_v25, 16  ;;  %v10163_v5 = vshll.u32 %v8223_v13, 16  ;;  %v3784_v15 = vrot.slane %v3782_v1, 4  ;;  %v971_v39 = vrot.slane %v8256_v61, 4 }
 0x146   : > { %10162 = vst [vmem:[#allocation99_spill] sm:$0xff] %v8765_v55  ;;  %v3787_v38 = vrot.slane %v3785_v52, 5  ;;  %v10164_v48 = vshll.u32 %v8237_v26, 16  ;;  %v3793_v55 = vrot.slane %v3791_v37, 5  ;;  %v10165_v25 = vshll.u32 %v8216_v9, 16 }
 0x147   : > { %v969_v11 = vor.u32 %v10163_v5, %v8256_v61  ;;  %v3797_v46 = vrot.slane %v3795_v34, 4  ;;  %v3737_v5 = vld [vmem:[#allocation2 + $0x28] sm:$0xf]  ;;  %v993_v52 = vrot.slane %v8283_v47, 4  ;;  %v10166_v26 = vshll.u32 %v8230_v21, 16  ;;  %7425 = vmatmul.mubr.msk.bf16.gmra.mrb[28].mxu1 %vm1409_vm4, %v6744_v51 }
 0x148   : > { %v978_v8 = vor.u32 %v10164_v48, %v8272_v31  ;;  %v991_v13 = vor.u32 %v10165_v25, %v8283_v47  ;;  %v3788_v1 = vor.u32 %v3787_v38, %v3784_v15  ;;  %v3806_v15 = vshrl.u32 %v3736_v28, 16  ;;  %v3739_v47 = vld [vmem:[#allocation2 + $0x34] sm:$0xf]  ;;  %v7925_v21 = vld [vmem:[%s9991_s3 + $0x48] sm:$0xff]   ;;  %v3740_v51 = vld [vmem:[#allocation2 + $0x38] sm:$0xf] }
 0x149   : > { %v970_v6 = vsel %vm8131_vm12, %v8166_v41, %v969_v11  ;;  %v1000_v31 = vor.u32 %v10166_v26, %v8301_v63  ;;  %v3798_v9 = vor.u32 %v3797_v46, %v3793_v55  ;;  %v3809_v11 = vshll.u32 %v3736_v28, 16 }
 0x14a   : > { %v979_v61 = vsel %vm8131_vm12, %v971_v39, %v978_v8  ;;  %v992_v39 = vsel %vm8131_vm12, %v8168_v42, %v991_v13  ;;  %v3789_v63 = vrot.slane %v3788_v1, 4  ;;  %v3815_v8 = vshll.u32 %v3737_v5, 16 }
 0x14b   : > { %v6582_v12 = vcombine.low %v970_v6, %v979_v61  ;;  %v1001_v34 = vsel %vm8131_vm12, %v993_v52, %v1000_v31  ;;  %v3799_v37 = vrot.slane %v3798_v9, 4  ;;  %v3808_v38 = vrot.slane %v3806_v15, 4 }
 0x14c   : > { %v6583_v46 = vcombine.low %v992_v39, %v1001_v34  ;;  %v3819_v48 = vshrl.u32 %v3737_v5, 16  ;;  %v3794_v42 = vsel %vm8794_vm15, %v3789_v63, %v3793_v55  ;;  %v3811_v6 = vrot.slane %v3809_v11, 5  ;;  %v7926_v5 = vld [vmem:[%s9991_s3 + $0x50] sm:$0xff]  }
 0x14d   : > { %7277 = vmatmul.mubr.msk.bf16.vlgmr.msra.gmra.mrb[32].mxu0 %vm1409_vm4, %v6582_v12  ;;  %v3817_v25 = vrot.slane %v3815_v8, 5  ;;  %v3830_v13 = vshrl.u32 %v3739_v47, 16  ;;  %v3804_v28 = vsel %vm8794_vm15, %v3799_v37, %v8164_v40  ;;  %v3833_v61 = vshll.u32 %v3739_v47, 16 }
 0x14e   : > { %7309 = vmatpush3.bf16.msra.mxu0 %v8445_v60  ;;  %7280 = vmatprep.mubr.msk.bf16.mxu0 %vm1409_vm4, %v6583_v46  ;;  %v3821_v1 = vrot.slane %v3819_v48, 4  ;;  %v3839_v52 = vshll.u32 %v3740_v51, 16  ;;  %v6773_v55 = vcombine.low %v3794_v42, %v3804_v28  ;;  %v3812_v26 = vor.u32 %v3811_v6, %v3808_v38  ;;  %v3742_v48 = vld [vmem:[#allocation2 + $0x44] sm:$0xf] }
 0x14f   : > { %7310 = vmatprep.subr.bf16.mxu0 %v7925_v21  ;;  %v3832_v31 = vrot.slane %v3830_v13, 4  ;;  %v3843_v9 = vshrl.u32 %v3740_v51, 16  ;;  %v3835_v60 = vrot.slane %v3833_v61, 5  ;;  %v10169_v40 = vshll.u32 %v8286_v50, 16 }
 0x150   : > { %v3822_v12 = vor.u32 %v3821_v1, %v3817_v25  ;;  %v3841_v39 = vrot.slane %v3839_v52, 5  ;;  %7436 = vmatprep.mubr.msk.bf16.mxu1 %vm1409_vm4, %v6773_v55  ;;  %v3813_v47 = vrot.slane %v3812_v26, 4  ;;  %v1015_v34 = vrot.slane %v8336_v29, 4  ;;  %v3745_v1 = vld [vmem:[#allocation2 + $0x54] sm:$0xf] }
 0x151   : > { %v1013_v15 = vor.u32 %v10169_v40, %v8336_v29  ;;  %v3845_v63 = vrot.slane %v3843_v9, 4  ;;  %v10170_v11 = vshll.u32 %v8306_v19, 16  ;;  %v3836_v51 = vor.u32 %v3835_v60, %v3832_v31  ;;  %v7927_v29 = vld [vmem:[%s9991_s3 + $0x58] sm:$0xff]  }
 0x152   : > { %7311 = vmatpush3.bf16.msra.mxu0 %v7925_v21  ;;  %v3823_v37 = vrot.slane %v3822_v12, 4  ;;  %v10171_v50 = vshll.u32 %v8322_v7, 16  ;;  %v1037_v42 = vrot.slane %v8368_v24, 4  ;;  %v10172_v52 = vshll.u32 %v8330_v44, 16  ;;  %v3746_v12 = vld [vmem:[#allocation2 + $0x58] sm:$0xf] }
 0x153   : > { %v1022_v8 = vor.u32 %v10170_v11, %v8338_v36  ;;  %v1014_v46 = vsel %vm8131_vm12, %v8175_v53, %v1013_v15  ;;  %7312 = vmatprep.subr.bf16.mxu0 %v7926_v5  ;;  %v3818_v36 = vsel %vm8794_vm15, %v3813_v47, %v3817_v25  ;;  %v3846_v19 = vor.u32 %v3845_v63, %v3841_v39  ;;  %v3743_v53 = vld [vmem:[#allocation2 + $0x48] sm:$0xf] }
 0x154   : > { %v1035_v38 = vor.u32 %v10171_v50, %v8368_v24  ;;  %v3828_v7 = vsel %vm8794_vm15, %v3823_v37, %v8170_v43  ;;  %v3837_v6 = vrot.slane %v3836_v51, 4  ;;  %v1044_v55 = vor.u32 %v10172_v52, %v8376_v22  ;;  %v7921_v24 = vld [vmem:[%s9991_s3 + $0xc8] sm:$0xff]  }
 0x155   : > { %v1023_v21 = vsel %vm8131_vm12, %v1015_v34, %v1022_v8  ;;  %v6774_v61 = vcombine.low %v3818_v36, %v3828_v7  ;;  %v3847_v25 = vrot.slane %v3846_v19, 4  ;;  %v3854_v26 = vshrl.u32 %v3742_v48, 16  ;;  %v10175_v7 = vld [vmem:[#allocation37_spill] sm:$0xff] }
 0x156   : > { %v6584_v13 = vcombine.low %v1014_v46, %v1023_v21  ;;  %v1036_v28 = vsel %vm8131_vm12, %v8177_v54, %v1035_v38  ;;  %7313 = vmatpush3.bf16.msra.mxu0 %v7926_v5  ;;  %v3842_v43 = vsel %vm8794_vm15, %v3837_v6, %v3841_v39  ;;  %v3857_v31 = vshll.u32 %v3742_v48, 16  ;;  %v10176_v6 = vld [vmem:[#allocation30_spill] sm:$0xff] }
 0x157   : > { %v3863_v54 = vshll.u32 %v3743_v53, 16  ;;  %v3867_v9 = vshrl.u32 %v3743_v53, 16  ;;  %7314 = vmatprep.subr.bf16.mxu0 %v7927_v29  ;;  %7437 = vmatmul.mubr.msk.bf16.vlgmr.msra.gmra.mrb[0].mxu1 %vm1409_vm4, %v6774_v61  ;;  %v3852_v44 = vsel %vm8794_vm15, %v3847_v25, %v8183_v2  ;;  %v1045_v22 = vsel %vm8131_vm12, %v1037_v42, %v1044_v55  ;;  %v7922_v2 = vld [vmem:[%s9991_s3 + $0xd0] sm:$0xff]   ;;  %v7924_v25 = vld [vmem:[%s9991_s3 + $0xd8] sm:$0xff]  }
 0x158   : > { %7281 = vmatmul.mubr.msk.bf16.gmra.mrb[36].mxu0 %vm1409_vm4, %v6584_v13  ;;  %v3856_v5 = vrot.slane %v3854_v26, 4  ;;  %v3878_v60 = vshrl.u32 %v3745_v1, 16  ;;  %7469 = vmatpush3.bf16.msra.mxu1 %v8393_v59  ;;  %v6775_v39 = vcombine.low %v3842_v43, %v3852_v44  ;;  %v6585_v40 = vcombine.low %v1036_v28, %v1045_v22  ;;  %v3748_v28 = vld [vmem:[#allocation2 + $0x64] sm:$0xf]  ;;  %v10178_v26 = vld [vmem:[#allocation6_spill] sm:$0xff]  ;;  %v10179_v43 = vld [vmem:[#allocation5_spill] sm:$0xff] }
 0x159   : > { %v3859_v15 = vrot.slane %v3857_v31, 5  ;;  %v3865_v47 = vrot.slane %v3863_v54, 5  ;;  %v3869_v63 = vrot.slane %v3867_v9, 4  ;;  %v3881_v11 = vshll.u32 %v3745_v1, 16  ;;  %7470 = vmatprep.subr.bf16.mxu1 %v7921_v24  ;;  %v10180_v9 = vld [vmem:[#allocation39_spill] sm:$0xff] }
 0x15a   : > { %v3880_v34 = vrot.slane %v3878_v60, 4  ;;  %v3887_v8 = vshll.u32 %v3746_v12, 16  ;;  %7315 = vmatpush3.bf16.msra.mxu0 %v7927_v29  ;;  %7440 = vmatprep.mubr.msk.bf16.mxu1 %vm1409_vm4, %v6775_v39  ;;  %v3891_v59 = vshrl.u32 %v3746_v12, 16  ;;  %v10173_v51 = vshll.u32 %v8366_v32, 16  ;;  %v10181_v12 = vld [vmem:[#allocation31_spill] sm:$0xff] }
 0x15b   : > { %7284 = vmatprep.mubr.msk.bf16.mxu0 %vm1409_vm4, %v6585_v40  ;;  %v3860_v37 = vor.u32 %v3859_v15, %v3856_v5  ;;  %v1059_v50 = vrot.slane %v8405_v57, 4  ;;  %v3870_v38 = vor.u32 %v3869_v63, %v3865_v47  ;;  %v3883_v48 = vrot.slane %v3881_v11, 5 }
 0x15c   : > { %v1057_v46 = vor.u32 %v10173_v51, %v8405_v57  ;;  %v3889_v36 = vrot.slane %v3887_v8, 5  ;;  %v10174_v19 = vshll.u32 %v8374_v14, 16  ;;  %v3893_v42 = vrot.slane %v3891_v59, 4  ;;  %7471 = vmatpush3.bf16.msra.mxu1 %v7921_v24  ;;  %v8904_v59 = vld [vmem:[%s9991_s3 + $0xe0] sm:$0xff]  }
 0x15d   : > { %v3861_v29 = vrot.slane %v3860_v37, 4  ;;  %v10177_v13 = vshll.u32 %v10176_v6, 16  ;;  %v3871_v57 = vrot.slane %v3870_v38, 4  ;;  %v3884_v1 = vor.u32 %v3883_v48, %v3880_v34  ;;  %7472 = vmatprep.subr.bf16.mxu1 %v7922_v2  ;;  %v3752_v37 = vld [vmem:[#allocation2 + $0x78] sm:$0xf]  ;;  %v10183_v51 = vld [vmem:[#allocation7_spill] sm:$0xff] }
 0x15e   : > { %v1066_v21 = vor.u32 %v10174_v19, %v8419_v3  ;;  %v1058_v53 = vsel %vm8131_vm12, %v8194_v27, %v1057_v46  ;;  %v1081_v14 = vrot.slane %v10175_v7, 4  ;;  %v3749_v3 = vld [vmem:[#allocation2 + $0x68] sm:$0xf]  ;;  %v3894_v52 = vor.u32 %v3893_v42, %v3889_v36 }
 0x15f   : > { %v1079_v32 = vor.u32 %v10177_v13, %v10175_v7  ;;  %v3866_v27 = vsel %vm8794_vm15, %v3861_v29, %v3865_v47  ;;  %v3876_v31 = vsel %vm8794_vm15, %v3871_v57, %v10179_v43  ;;  %v3885_v54 = vrot.slane %v3884_v1, 4  ;;  %v3751_v47 = vld [vmem:[#allocation2 + $0x74] sm:$0xf]  ;;  %v10185_v6 = vld [vmem:[#allocation36_spill] sm:$0xff] }
 0x160   : > { %v1067_v61 = vsel %vm8131_vm12, %v1059_v50, %v1066_v21  ;;  %v10182_v44 = vshll.u32 %v10181_v12, 16  ;;  %v3902_v5 = vshrl.u32 %v3748_v28, 16  ;;  %v6776_v60 = vcombine.low %v3866_v27, %v3876_v31  ;;  %7473 = vmatpush3.bf16.msra.mxu1 %v7922_v2  ;;  %v10184_v7 = vld [vmem:[#allocation45_spill] sm:$0xff]  ;;  %v10188_v43 = vld [vmem:[#allocation48_spill] sm:$0xff] }
 0x161   : > { %v6586_v55 = vcombine.low %v1058_v53, %v1067_v61  ;;  %v1080_v24 = vsel %vm8131_vm12, %v10178_v26, %v1079_v32  ;;  %v3895_v39 = vrot.slane %v3894_v52, 4  ;;  %v3905_v40 = vshll.u32 %v3748_v28, 16  ;;  %7474 = vmatprep.subr.bf16.mxu1 %v7924_v25  ;;  %v10187_v52 = vld [vmem:[#allocation12_spill] sm:$0xff] }
 0x162   : > { %v1088_v22 = vor.u32 %v10182_v44, %v10180_v9  ;;  %v3911_v15 = vshll.u32 %v3749_v3, 16  ;;  %v3890_v63 = vsel %vm8794_vm15, %v3885_v54, %v3889_v36  ;;  %v3904_v11 = vrot.slane %v3902_v5, 4  ;;  %7441 = vmatmul.mubr.msk.bf16.gmra.mrb[4].mxu1 %vm1409_vm4, %v6776_v60  ;;  %v10191_v9 = vld [vmem:[#allocation52_spill] sm:$0xff] }
 0x163   : > { %7285 = vmatmul.mubr.msk.bf16.gmra.mrb[40].mxu0 %vm1409_vm4, %v6586_v55  ;;  %v3915_v8 = vshrl.u32 %v3749_v3, 16  ;;  %v3900_v2 = vsel %vm8794_vm15, %v3895_v39, %v10183_v51  ;;  %v3907_v50 = vrot.slane %v3905_v40, 5  ;;  %v3926_v19 = vshrl.u32 %v3751_v47, 16  ;;  %v10192_v12 = vld [vmem:[#allocation44_spill] sm:$0xff]  ;;  %v10194_v40 = vld [vmem:[#allocation53_spill] sm:$0xff] }
 0x164   : > { %v1089_v34 = vsel %vm8131_vm12, %v1081_v14, %v1088_v22  ;;  %v3913_v38 = vrot.slane %v3911_v15, 5  ;;  %v6777_v48 = vcombine.low %v3890_v63, %v3900_v2  ;;  %v3929_v21 = vshll.u32 %v3751_v47, 16  ;;  %7475 = vmatpush3.bf16.msra.mxu1 %v7924_v25  ;;  %v10189_v25 = vld [vmem:[#allocation38_spill] sm:$0xff] }
 0x165   : > { %v6587_v46 = vcombine.low %v1080_v24, %v1089_v34  ;;  %v3917_v36 = vrot.slane %v3915_v8, 4  ;;  %v3908_v29 = vor.u32 %v3907_v50, %v3904_v11  ;;  %v3935_v42 = vshll.u32 %v3752_v37, 16  ;;  %7508 = vmatprep.subr.bf16.mxu1 %v8904_v59  ;;  %v10195_v15 = vld [vmem:[#allocation46_spill] sm:$0xff]  ;;  %v3754_v34 = vld [vmem:[#allocation2 + $0x84] sm:$0xf]  ;;  %v10197_v11 = vld [vmem:[#allocation9_spill] sm:$0xff] }
 0x166   : > { %v3939_v53 = vshrl.u32 %v3752_v37, 16  ;;  %v10186_v13 = vshll.u32 %v10185_v6, 16  ;;  %7444 = vmatprep.mubr.msk.bf16.mxu1 %vm1409_vm4, %v6777_v48  ;;  %v3928_v57 = vrot.slane %v3926_v19, 4  ;;  %v3931_v1 = vrot.slane %v3929_v21, 5  ;;  %v10198_v2 = vld [vmem:[#allocation10_spill] sm:$0xff] }
 0x167   : > { %7288 = vmatprep.mubr.msk.bf16.mxu0 %vm1409_vm4, %v6587_v46  ;;  %v3918_v28 = vor.u32 %v3917_v36, %v3913_v38  ;;  %v1103_v61 = vrot.slane %v10184_v7, 4  ;;  %v3909_v14 = vrot.slane %v3908_v29, 4  ;;  %v3937_v3 = vrot.slane %v3935_v42, 5  ;;  %v3755_v50 = vld [vmem:[#allocation2 + $0x88] sm:$0xf] }
 0x168   : > { %v1101_v32 = vor.u32 %v10186_v13, %v10184_v7  ;;  %v3941_v27 = vrot.slane %v3939_v53, 4  ;;  %v3932_v24 = vor.u32 %v3931_v1, %v3928_v57  ;;  %v10190_v31 = vshll.u32 %v10189_v25, 16  ;;  %v3758_v6 = vld [vmem:[#allocation2 + $0x98] sm:$0xf]  ;;  %v10199_v13 = vld [vmem:[#allocation11_spill] sm:$0xff] }
 0x169   : > { %v3919_v26 = vrot.slane %v3918_v28, 4  ;;  %v10193_v44 = vshll.u32 %v10192_v12, 16  ;;  %v3914_v5 = vsel %vm8794_vm15, %v3909_v14, %v3913_v38  ;;  %v1125_v39 = vrot.slane %v10191_v9, 4  ;;  %v3757_v38 = vld [vmem:[#allocation2 + $0x94] sm:$0xf] }
 0x16a   : > { %v1102_v55 = vsel %vm8131_vm12, %v10187_v52, %v1101_v32  ;;  %v1110_v54 = vor.u32 %v10190_v31, %v10188_v43  ;;  %v3942_v60 = vor.u32 %v3941_v27, %v3937_v3  ;;  %v10196_v47 = vshll.u32 %v10195_v15, 16  ;;  %v3759_v1 = vld [vmem:[#allocation2 + $0x9c] sm:$0x1] }
 0x16b   : > { %v1123_v22 = vor.u32 %v10193_v44, %v10191_v9  ;;  %v3924_v8 = vsel %vm8794_vm15, %v3919_v26, %v10197_v11  ;;  %v3933_v37 = vrot.slane %v3932_v24, 4  ;;  %v3950_v53 = vshrl.u32 %v3754_v34, 16 }
 0x16c   : > { %v1132_v63 = vor.u32 %v10196_v47, %v10194_v40  ;;  %v1111_v51 = vsel %vm8131_vm12, %v1103_v61, %v1110_v54  ;;  %v6778_v48 = vcombine.low %v3914_v5, %v3924_v8  ;;  %v3943_v36 = vrot.slane %v3942_v60, 4 }
 0x16d   : > { %v1124_v46 = vsel %vm8131_vm12, %v10198_v2, %v1123_v22  ;;  %v6588_v19 = vcombine.low %v1102_v55, %v1111_v51  ;;  %v3938_v29 = vsel %vm8794_vm15, %v3933_v37, %v3937_v3  ;;  %v3953_v7 = vshll.u32 %v3754_v34, 16  ;;  %v10201_v34 = vld [vmem:[#allocation15_spill] sm:$0xff]  ;;  %v10203_v51 = vld [vmem:[#allocation58_spill] sm:$0xff] }
 0x16e   : > { %v1133_v21 = vsel %vm8131_vm12, %v1125_v39, %v1132_v63  ;;  %7445 = vmatmul.mubr.msk.bf16.gmra.mrb[8].mxu1 %vm1409_vm4, %v6778_v48  ;;  %v3948_v32 = vsel %vm8794_vm15, %v3943_v36, %v10199_v13  ;;  %v3959_v28 = vshll.u32 %v3755_v50, 16  ;;  %v3963_v57 = vshrl.u32 %v3755_v50, 16  ;;  %v3760_v48 = vld [vmem:[#allocation2 + $0xa4] sm:$0xf]  ;;  %v3761_v36 = vld [vmem:[#allocation2 + $0xa8] sm:$0xf] }
 0x16f   : > { %v6589_v42 = vcombine.low %v1124_v46, %v1133_v21  ;;  %7289 = vmatmul.mubr.msk.bf16.gmra.mrb[44].mxu0 %vm1409_vm4, %v6588_v19  ;;  %v3974_v61 = vshrl.u32 %v3757_v38, 16  ;;  %v6779_v14 = vcombine.low %v3938_v29, %v3948_v32  ;;  %v3952_v3 = vrot.slane %v3950_v53, 4  ;;  %v10205_v19 = vld [vmem:[#allocation13_spill] sm:$0xff]  ;;  %v10208_v53 = vld [vmem:[#allocation59_spill] sm:$0xff]  ;;  %v3762_v13 = vld [vmem:[#allocation2 + $0xac] sm:$0x1] }
 0x170   : > { %v3955_v27 = vrot.slane %v3953_v7, 5  ;;  %v3977_v52 = vshll.u32 %v3757_v38, 16  ;;  %v3961_v55 = vrot.slane %v3959_v28, 5  ;;  %v3965_v26 = vrot.slane %v3963_v57, 4 }
 0x171   : > { %7292 = vmatprep.mubr.msk.bf16.mxu0 %vm1409_vm4, %v6589_v42  ;;  %v3976_v24 = vrot.slane %v3974_v61, 4  ;;  %v3983_v43 = vshll.u32 %v3758_v6, 16  ;;  %7448 = vmatprep.mubr.msk.bf16.mxu1 %vm1409_vm4, %v6779_v14  ;;  %v3987_v54 = vshrl.u32 %v3758_v6, 16  ;;  %v3993_v9 = vshll.u32 %v3759_v1, 16  ;;  %v10207_v42 = vld [vmem:[#allocation64_spill] sm:$0xff] }
 0x172   : > { %v3956_v25 = vor.u32 %v3955_v27, %v3952_v3  ;;  %v3979_v31 = vrot.slane %v3977_v52, 5  ;;  %v3966_v12 = vor.u32 %v3965_v26, %v3961_v55  ;;  %v10200_v22 = vshll.u32 %v8514_v30, 16  ;;  %v708_v1 = vld [vmem:[#allocation2 + $0xbc] sm:$0x1]  ;;  %v3763_v52 = vld [vmem:[#allocation2 + $0xb4] sm:$0xf] }
 0x173   : > { %v3985_v44 = vrot.slane %v3983_v43, 5  ;;  %v1147_v60 = vrot.slane %v8548_v35, 4  ;;  %v3989_v15 = vrot.slane %v3987_v54, 4  ;;  %v3995_v47 = vrot.slane %v3993_v9, 5 }
 0x174   : > { %v1145_v5 = vor.u32 %v10200_v22, %v8548_v35  ;;  %v3957_v39 = vrot.slane %v3956_v25, 4  ;;  %v3980_v40 = vor.u32 %v3979_v31, %v3976_v24  ;;  %v3967_v63 = vrot.slane %v3966_v12, 4  ;;  %v3764_v25 = vld [vmem:[#allocation2 + $0xb8] sm:$0xf] }
 0x175   : > { %v10202_v8 = vshll.u32 %v8522_v4, 16  ;;  %v10204_v2 = vshll.u32 %v10203_v51, 16  ;;  %v3990_v50 = vor.u32 %v3989_v15, %v3985_v44  ;;  %v1169_v38 = vrot.slane %v8584_v18, 4 }
 0x176   : > { %v1146_v11 = vsel %vm8131_vm12, %v10201_v34, %v1145_v5  ;;  %v3962_v35 = vsel %vm8794_vm15, %v3957_v39, %v3961_v55  ;;  %v3981_v46 = vrot.slane %v3980_v40, 4  ;;  %v3972_v21 = vsel %vm8794_vm15, %v3967_v63, %v10205_v19 }
 0x177   : > { %v1154_v37 = vor.u32 %v10202_v8, %v8561_v16  ;;  %v1167_v30 = vor.u32 %v10204_v2, %v8584_v18  ;;  %v10206_v16 = vld [vmem:[#allocation14_spill] sm:$0xff]  ;;  %v10209_v7 = vshll.u32 %v10208_v53, 16  ;;  %v6780_v32 = vcombine.low %v3962_v35, %v3972_v21  ;;  %v711_v53 = vld [vmem:[#allocation2 + $0xcc] sm:$0x1] }
 0x178   : > { %v3986_v18 = vsel %vm8794_vm15, %v3981_v46, %v3985_v44  ;;  %v3991_v28 = vrot.slane %v3990_v50, 4  ;;  %v3998_v14 = vshrl.u32 %v3760_v48, 16  ;;  %v4001_v3 = vshll.u32 %v3760_v48, 16  ;;  %v919_v44 = vld [vmem:[#allocation2 + $0xb0] sm:$0x8] }
 0x179   : > { %v1155_v4 = vsel %vm8131_vm12, %v1147_v60, %v1154_v37  ;;  %v1168_v29 = vsel %vm8131_vm12, %v10206_v16, %v1167_v30  ;;  %v1176_v6 = vor.u32 %v10209_v7, %v10207_v42  ;;  %v4007_v27 = vshll.u32 %v3761_v36, 16  ;;  %7449 = vmatmul.mubr.msk.bf16.gmra.mrb[12].mxu1 %vm1409_vm4, %v6780_v32  ;;  %v922_v30 = vld [vmem:[#allocation2 + $0xc0] sm:$0x8]  ;;  %v10214_v32 = vld [vmem:[#allocation69_spill] sm:$0xff] }
 0x17a   : > { %v6590_v57 = vcombine.low %v1146_v11, %v1155_v4  ;;  %v3996_v55 = vsel %vm8794_vm15, %v3991_v28, %v3995_v47  ;;  %v4011_v24 = vshrl.u32 %v3761_v36, 16  ;;  %v4017_v43 = vshll.u32 %v3762_v13, 16  ;;  %v10213_v13 = vld [vmem:[#allocation78_spill] sm:$0xff] }
 0x17b   : > { %v1177_v61 = vsel %vm8131_vm12, %v1169_v38, %v1176_v6  ;;  %v6781_v31 = vcombine.low %v3986_v18, %v3996_v55  ;;  %v4000_v54 = vrot.slane %v3998_v14, 4  ;;  %v4003_v9 = vrot.slane %v4001_v3, 5  ;;  %v3766_v18 = vld [vmem:[#allocation2 + $0xc4] sm:$0xf]  ;;  %v3767_v14 = vld [vmem:[#allocation2 + $0xc8] sm:$0xf] }
 0x17c   : > { %7293 = vmatmul.mubr.msk.bf16.gmra.mrb[48].mxu0 %vm1409_vm4, %v6590_v57  ;;  %v6591_v26 = vcombine.low %v1168_v29, %v1177_v61  ;;  %v4009_v12 = vrot.slane %v4007_v27, 5  ;;  %v4013_v22 = vrot.slane %v4011_v24, 4  ;;  %v4019_v5 = vrot.slane %v4017_v43, 5  ;;  %v714_v3 = vld [vmem:[#allocation2 + $0xdc] sm:$0x1] }
 0x17d   : > { %v709_v39 = vsel %vm8102_vm7, 0, %v708_v1  ;;  %v4022_v40 = vshrl.u32 %v3763_v52, 16  ;;  %7452 = vmatprep.mubr.msk.bf16.mxu1 %vm1409_vm4, %v6781_v31  ;;  %v4004_v15 = vor.u32 %v4003_v9, %v4000_v54  ;;  %v4025_v47 = vshll.u32 %v3763_v52, 16  ;;  %v10217_v24 = vld [vmem:[#allocation70_spill] sm:$0xff] }
 0x17e   : > { %7296 = vmatprep.mubr.msk.bf16.mxu0 %vm1409_vm4, %v6591_v26  ;;  %710 = vst [vmem:[#allocation2 + $0xbc] sm:$0x1] %v709_v39  ;;  %v4031_v63 = vshll.u32 %v3764_v25, 16  ;;  %v4035_v34 = vshrl.u32 %v3764_v25, 16  ;;  %v4014_v11 = vor.u32 %v4013_v22, %v4009_v12  ;;  %v1179_v37 = vshrl.u32 %v919_v44, 16  ;;  %v10216_v26 = vld [vmem:[#allocation80_spill] sm:$0xff] }
 0x17f   : > { %v4024_v8 = vrot.slane %v4022_v40, 4  ;;  %v10211_v51 = vshll.u32 %v8582_v33, 16  ;;  %v4005_v35 = vrot.slane %v4004_v15, 4  ;;  %v4027_v46 = vrot.slane %v4025_v47, 5  ;;  %v3769_v22 = vld [vmem:[#allocation2 + $0xd4] sm:$0xf] }
 0x180   : > { %v4033_v50 = vrot.slane %v4031_v63, 5  ;;  %v4037_v38 = vrot.slane %v4035_v34, 4  ;;  %v4015_v48 = vrot.slane %v4014_v11, 4  ;;  %v6532_v36 = vrot.slane %v1179_v37, 11  ;;  %v3770_v47 = vld [vmem:[#allocation2 + $0xd8] sm:$0xf] }
 0x181   : > { %v1189_v2 = vor.u32 %v10211_v51, %v8616_v45  ;;  %v1191_v19 = vrot.slane %v8616_v45, 4  ;;  %v10212_v21 = vshll.u32 %v8590_v56, 16  ;;  %v4010_v16 = vsel %vm8794_vm15, %v4005_v35, %v4009_v12  ;;  %v666_v35 = vld [vmem:[#allocation2 + $0xd0] sm:$0x8] }
 0x182   : > { %v4028_v29 = vor.u32 %v4027_v46, %v4024_v8  ;;  %v4038_v42 = vor.u32 %v4037_v38, %v4033_v50  ;;  %v1201_v33 = vshrl.u32 %v922_v30, 16  ;;  %v4020_v7 = vsel %vm8794_vm15, %v4015_v48, %v4019_v5 }
 0x183   : > { %v1198_v4 = vor.u32 %v10212_v21, %v8631_v20  ;;  %v1190_v6 = vsel %vm8131_vm12, %v6532_v36, %v1189_v2  ;;  %v10215_v56 = vshll.u32 %v10214_v32, 16  ;;  %v6782_v28 = vcombine.low %v4010_v16, %v4020_v7  ;;  %v669_v7 = vld [vmem:[#allocation2 + $0xe0] sm:$0x8]  ;;  %v10220_v32 = vld [vmem:[#allocation85_spill] sm:$0xff] }
 0x184   : > { %v4029_v57 = vrot.slane %v4028_v29, 4  ;;  %v4039_v1 = vrot.slane %v4038_v42, 4  ;;  %v6533_v52 = vrot.slane %v1201_v33, 11  ;;  %v1213_v55 = vrot.slane %v10213_v13, 4 }
 0x185   : > { %v1199_v45 = vsel %vm8131_vm12, %v1191_v19, %v1198_v4  ;;  %v1211_v20 = vor.u32 %v10215_v56, %v10213_v13  ;;  %v3765_v27 = vld [vmem:[#allocation2 + $0xbc] sm:$0x1]  ;;  %v10218_v43 = vshll.u32 %v10217_v24, 16  ;;  %v712_v31 = vsel %vm8102_vm7, 0, %v711_v53  ;;  %7453 = vmatmul.mubr.msk.bf16.gmra.mrb[16].mxu1 %vm1409_vm4, %v6782_v28  ;;  %v10221_v56 = vld [vmem:[#allocation73_spill] sm:$0xff] }
 0x186   : > { %v6592_v61 = vcombine.low %v1190_v6, %v1199_v45  ;;  %v4034_v54 = vsel %vm8794_vm15, %v4029_v57, %v4033_v50  ;;  %v4041_v9 = vshll.u32 %v3765_v27, 16  ;;  %713 = vst [vmem:[#allocation2 + $0xcc] sm:$0x1] %v712_v31  ;;  %v4046_v12 = vshrl.u32 %v3766_v18, 16 }
 0x187   : > { %v1220_v25 = vor.u32 %v10218_v43, %v10216_v26  ;;  %v4049_v44 = vshll.u32 %v3766_v18, 16  ;;  %v1212_v5 = vsel %vm8131_vm12, %v6533_v52, %v1211_v20  ;;  %v4055_v40 = vshll.u32 %v3767_v14, 16  ;;  %v3772_v26 = vld [vmem:[#allocation2 + $0xe4] sm:$0xf] }
 0x188   : > { %7297 = vmatmul.mubr.msk.bf16.gmra.mrb[52].mxu0 %vm1409_vm4, %v6592_v61  ;;  %v4059_v15 = vshrl.u32 %v3767_v14, 16  ;;  %v4043_v63 = vrot.slane %v4041_v9, 5  ;;  %v4048_v11 = vrot.slane %v4046_v12, 4  ;;  %v715_v2 = vsel %vm8102_vm7, 0, %v714_v3  ;;  %v10223_v14 = vld [vmem:[#allocation87_spill] sm:$0xff] }
 0x189   : > { %v1221_v39 = vsel %vm8131_vm12, %v1213_v55, %v1220_v25  ;;  %v4051_v8 = vrot.slane %v4049_v44, 5  ;;  %v4057_v37 = vrot.slane %v4055_v40, 5  ;;  %v4070_v30 = vshrl.u32 %v3769_v22, 16  ;;  %716 = vst [vmem:[#allocation2 + $0xdc] sm:$0x1] %v715_v2  ;;  %v10224_v3 = vld [vmem:[#allocation75_spill] sm:$0xff] }
 0x18a   : > { %v6593_v34 = vcombine.low %v1212_v5, %v1221_v39  ;;  %v4061_v51 = vrot.slane %v4059_v15, 4  ;;  %v4044_v46 = vsel %vm8794_vm15, %v4039_v1, %v4043_v63  ;;  %v4073_v38 = vshll.u32 %v3769_v22, 16  ;;  %v717_v55 = vld [vmem:[#allocation2 + $0xec] sm:$0x1]  ;;  %v10226_v25 = vld [vmem:[#allocation81_spill] sm:$0xff]  ;;  %v10228_v39 = vld [vmem:[#allocation95_spill] sm:$0xff] }
 0x18b   : > { %v4052_v50 = vor.u32 %v4051_v8, %v4048_v11  ;;  %v4079_v48 = vshll.u32 %v3770_v47, 16  ;;  %v6783_v36 = vcombine.low %v4034_v54, %v4044_v46  ;;  %v4072_v21 = vrot.slane %v4070_v30, 4  ;;  %v3773_v12 = vld [vmem:[#allocation2 + $0xe8] sm:$0xf]  ;;  %v10229_v40 = vld [vmem:[#allocation83_spill] sm:$0xff] }
 0x18c   : > { %7300 = vmatprep.mubr.msk.bf16.mxu0 %vm1409_vm4, %v6593_v34  ;;  %v4062_v19 = vor.u32 %v4061_v51, %v4057_v37  ;;  %v4083_v4 = vshrl.u32 %v3770_v47, 16  ;;  %v4075_v29 = vrot.slane %v4073_v38, 5  ;;  %v667_v53 = vsel %vm8113_vm10, 0, %v666_v35  ;;  %v720_v63 = vld [vmem:[#allocation2 + $0xfc] sm:$0x1] }
 0x18d   : > { %v4053_v16 = vrot.slane %v4052_v50, 4  ;;  %v4081_v42 = vrot.slane %v4079_v48, 5  ;;  %7456 = vmatprep.mubr.msk.bf16.mxu1 %vm1409_vm4, %v6783_v36  ;;  %v3768_v6 = vld [vmem:[#allocation2 + $0xcc] sm:$0x1]  ;;  %668 = vst [vmem:[#allocation2 + $0xd0] sm:$0x8] %v667_v53 }
 0x18e   : > { %v4063_v45 = vrot.slane %v4062_v19, 4  ;;  %v4085_v13 = vrot.slane %v4083_v4, 4  ;;  %v10222_v20 = vshll.u32 %v10221_v56, 16  ;;  %v1235_v28 = vrot.slane %v10220_v32, 4  ;;  %v3775_v34 = vld [vmem:[#allocation2 + $0xf4] sm:$0xf] }
 0x18f   : > { %v4058_v57 = vsel %vm8794_vm15, %v4053_v16, %v4057_v37  ;;  %v4065_v1 = vshll.u32 %v3768_v6, 16  ;;  %v4076_v61 = vor.u32 %v4075_v29, %v4072_v21  ;;  %v10225_v27 = vshll.u32 %v10224_v3, 16  ;;  %v3776_v19 = vld [vmem:[#allocation2 + $0xf8] sm:$0xf] }
 0x190   : > { %v9033_v18 = vor.u32 %v10222_v20, %v10220_v32  ;;  %v4086_v24 = vor.u32 %v4085_v13, %v4081_v42  ;;  %v670_v43 = vsel %vm8113_vm10, 0, %v669_v7  ;;  %v10227_v31 = vshll.u32 %v10226_v25, 16  ;;  %v3771_v11 = vld [vmem:[#allocation2 + $0xdc] sm:$0x1]  ;;  %v9068_v13 = vld [vmem:[%s9991_s3 + $0x60] sm:$0xff]  }
 0x191   : > { %v1242_v52 = vor.u32 %v10225_v27, %v10223_v14  ;;  %v1257_v9 = vrot.slane %v8724_v17, 4  ;;  %v4067_v44 = vrot.slane %v4065_v1, 5  ;;  %v4077_v22 = vrot.slane %v4076_v61, 4  ;;  %671 = vst [vmem:[#allocation2 + $0xe0] sm:$0x8] %v670_v43  ;;  %7348 = vmatprep.subr.bf16.mxu0 %v9068_v13 }
 0x192   : > { %v9046_v54 = vor.u32 %v10227_v31, %v8724_v17  ;;  %v10230_v15 = vshll.u32 %v10229_v40, 16  ;;  %v4087_v8 = vrot.slane %v4086_v24, 4  ;;  %v718_v37 = vsel %vm8102_vm7, 0, %v717_v55 }
 0x193   : > { %v1243_v5 = vsel %vm8131_vm12, %v1235_v28, %v1242_v52  ;;  %v4094_v51 = vshrl.u32 %v3772_v26, 16  ;;  %v4097_v17 = vshll.u32 %v3772_v26, 16  ;;  %v4068_v2 = vsel %vm8794_vm15, %v4063_v45, %v4067_v44  ;;  %719 = vst [vmem:[#allocation2 + $0xec] sm:$0x1] %v718_v37  ;;  %v723_v44 = vld [vmem:[#allocation2 + $0x10c] sm:$0x1] }
 0x194   : > { %v1264_v47 = vor.u32 %v10230_v15, %v10228_v39  ;;  %v4082_v30 = vsel %vm8794_vm15, %v4077_v22, %v4081_v42  ;;  %v4089_v35 = vshll.u32 %v3771_v11, 16  ;;  %v6784_v50 = vcombine.low %v4058_v57, %v4068_v2  ;;  %v925_v4 = vld [vmem:[#allocation2 + $0xd0] sm:$0x8] }
 0x195   : > { %v4096_v38 = vrot.slane %v4094_v51, 4  ;;  %v4099_v48 = vrot.slane %v4097_v17, 5  ;;  %v4103_v36 = vshll.u32 %v3773_v12, 16  ;;  %v4107_v16 = vshrl.u32 %v3773_v12, 16  ;;  %v672_v57 = vld [vmem:[#allocation2 + $0xf0] sm:$0x8] }
 0x196   : > { %v1265_v46 = vsel %vm8131_vm12, %v1257_v9, %v1264_v47  ;;  %v4091_v21 = vrot.slane %v4089_v35, 5  ;;  %v721_v29 = vsel %vm8102_vm7, 0, %v720_v63  ;;  %v4118_v53 = vshrl.u32 %v3775_v34, 16  ;;  %7457 = vmatmul.mubr.msk.bf16.gmra.mrb[20].mxu1 %vm1409_vm4, %v6784_v50 }
 0x197   : > { %v1223_v42 = vshrl.u32 %v925_v4, 16  ;;  %v4100_v7 = vor.u32 %v4099_v48, %v4096_v38  ;;  %v4105_v6 = vrot.slane %v4103_v36, 5  ;;  %722 = vst [vmem:[#allocation2 + $0xfc] sm:$0x1] %v721_v29  ;;  %v4121_v45 = vshll.u32 %v3775_v34, 16 }
 0x198   : > { %v4092_v32 = vsel %vm8794_vm15, %v4087_v8, %v4091_v21  ;;  %v4109_v56 = vrot.slane %v4107_v16, 4  ;;  %v4120_v20 = vrot.slane %v4118_v53, 4  ;;  %v4127_v28 = vshll.u32 %v3776_v19, 16  ;;  %v928_v14 = vld [vmem:[#allocation2 + $0xe0] sm:$0x8] }
 0x199   : > { %v6785_v1 = vcombine.low %v4082_v30, %v4092_v32  ;;  %v6534_v61 = vrot.slane %v1223_v42, 11  ;;  %v4101_v3 = vrot.slane %v4100_v7, 4  ;;  %v4123_v27 = vrot.slane %v4121_v45, 5  ;;  %v3778_v8 = vld [vmem:[#allocation2 + $0x104] sm:$0xf] }
 0x19a   : > { %v1245_v52 = vshrl.u32 %v928_v14, 16  ;;  %v4110_v55 = vor.u32 %v4109_v56, %v4105_v6  ;;  %v4129_v26 = vrot.slane %v4127_v28, 5  ;;  %v4131_v24 = vshrl.u32 %v3776_v19, 16  ;;  %v3774_v25 = vld [vmem:[#allocation2 + $0xec] sm:$0x1] }
 0x19b   : > { %7460 = vmatprep.mubr.msk.bf16.mxu1 %vm1409_vm4, %v6785_v1  ;;  %v1234_v43 = vsel %vm8131_vm12, %v6534_v61, %v9033_v18  ;;  %v4106_v31 = vsel %vm8794_vm15, %v4101_v3, %v4105_v6  ;;  %v4124_v9 = vor.u32 %v4123_v27, %v4120_v20  ;;  %v673_v12 = vsel %vm8113_vm10, 0, %v672_v57  ;;  %v3779_v30 = vld [vmem:[#allocation2 + $0x108] sm:$0xf]  ;;  %v4489_v48 = vld [vmem:[#allocation2 + $0x24] sm:$0xf] }
 0x19c   : > { %v6594_v22 = vcombine.low %v1234_v43, %v1243_v5  ;;  %v6535_v39 = vrot.slane %v1245_v52, 11  ;;  %v4111_v40 = vrot.slane %v4110_v55, 4  ;;  %v4113_v15 = vshll.u32 %v3774_v25, 16  ;;  %674 = vst [vmem:[#allocation2 + $0xf0] sm:$0x8] %v673_v12 }
 0x19d   : > { %v4125_v47 = vrot.slane %v4124_v9, 4  ;;  %v4133_v63 = vrot.slane %v4131_v24, 4  ;;  %v10231_v34 = vshll.u32 %v8711_v10, 16  ;;  %v1279_v11 = vrot.slane %v8752_v23, 4  ;;  %v4490_v19 = vld [vmem:[#allocation2 + $0x28] sm:$0xf] }
 0x19e   : > { %7301 = vmatmul.mubr.msk.bf16.gmra.mrb[56].mxu0 %vm1409_vm4, %v6594_v22  ;;  %v1256_v5 = vsel %vm8131_vm12, %v6535_v39, %v9046_v54  ;;  %v4115_v37 = vrot.slane %v4113_v15, 5  ;;  %v3777_v51 = vld [vmem:[#allocation2 + $0xfc] sm:$0x1]  ;;  %v10232_v17 = vshll.u32 %v8713_v49, 16  ;;  %v724_v10 = vsel %vm8102_vm7, 0, %v723_v44 }
 0x19f   : > { %v9084_v18 = vor.u32 %v10231_v34, %v8752_v23  ;;  %v6595_v35 = vcombine.low %v1256_v5, %v1265_v46  ;;  %v4130_v23 = vsel %vm8794_vm15, %v4125_v47, %v4129_v26  ;;  %v4134_v50 = vor.u32 %v4133_v63, %v4129_v26  ;;  %725 = vst [vmem:[#allocation2 + $0x10c] sm:$0x1] %v724_v10  ;;  %v616_v29 = vld [vmem:[#allocation2 + $0xc] sm:$0x1]  ;;  %v1900_v45 = vld [vmem:[#allocation2 + $0x4] sm:$0xf] }
 0x1a0   : > { %v1286_v2 = vor.u32 %v10232_v17, %v8754_v58  ;;  %v4137_v38 = vshll.u32 %v3777_v51, 16  ;;  %v4116_v54 = vsel %vm8794_vm15, %v4111_v40, %v4115_v37  ;;  %v4142_v49 = vshrl.u32 %v3778_v8, 16  ;;  %v1901_v40 = vld [vmem:[#allocation2 + $0x8] sm:$0xf] }
 0x1a1   : > { %v4145_v58 = vshll.u32 %v3778_v8, 16  ;;  %7304 = vmatprep.mubr.msk.bf16.mxu0 %vm1409_vm4, %v6595_v35  ;;  %v6786_v21 = vcombine.low %v4106_v31, %v4116_v54  ;;  %v4135_v46 = vrot.slane %v4134_v50, 4  ;;  %v4151_v16 = vshll.u32 %v3779_v30, 16  ;;  %v1904_v8 = vld [vmem:[#allocation2 + $0x18] sm:$0xf]  ;;  %v10233_v51 = vld [vmem:[#allocation8_spill] sm:$0xff] }
 0x1a2   : > { %v1287_v36 = vsel %vm8131_vm12, %v1279_v11, %v1286_v2  ;;  %v4139_v4 = vrot.slane %v4137_v38, 5  ;;  %v4144_v53 = vrot.slane %v4142_v49, 4  ;;  %v4155_v7 = vshrl.u32 %v3779_v30, 16  ;;  %v1903_v11 = vld [vmem:[#allocation2 + $0x14] sm:$0xf] }
 0x1a3   : > { %v4147_v42 = vrot.slane %v4145_v58, 5  ;;  %v4542_v6 = vshrl.u32 %v4489_v48, 16  ;;  %7461 = vmatmul.mubr.msk.bf16.gmra.mrb[24].mxu1 %vm1409_vm4, %v6786_v21  ;;  %v931_v56 = vld [vmem:[#allocation2 + $0xf0] sm:$0x8]  ;;  %v4153_v20 = vrot.slane %v4151_v16, 5  ;;  %v4545_v28 = vshll.u32 %v4489_v48, 16 }
 0x1a4   : > { %v4140_v32 = vsel %vm8794_vm15, %v4135_v46, %v4139_v4  ;;  %v4551_v57 = vshrl.u32 %v4490_v19, 16  ;;  %v1267_v61 = vshrl.u32 %v931_v56, 16  ;;  %v4157_v3 = vrot.slane %v4155_v7, 4  ;;  %v1905_v50 = vld [vmem:[#allocation2 + $0x1c] sm:$0x1] }
 0x1a5   : > { %v6787_v1 = vcombine.low %v4130_v23, %v4140_v32  ;;  %v4148_v14 = vor.u32 %v4147_v42, %v4144_v53  ;;  %v4544_v27 = vrot.slane %v4542_v6, 7  ;;  %v4554_v55 = vshll.u32 %v4490_v19, 16  ;;  %v1906_v21 = vld [vmem:[#allocation2 + $0x24] sm:$0xf] }
 0x1a6   : > { %v4553_v52 = vrot.slane %v4551_v57, 7  ;;  %v617_v26 = vsel %vm8102_vm7, 0, %v616_v29  ;;  %v6536_v24 = vrot.slane %v1267_v61, 11  ;;  %v3780_v43 = vld [vmem:[#allocation2 + $0x10c] sm:$0x1]  ;;  %v4158_v31 = vor.u32 %v4157_v3, %v4153_v20 }
 0x1a7   : > { %7464 = vmatprep.mubr.msk.bf16.mxu1 %vm1409_vm4, %v6787_v1  ;;  %v4149_v25 = vrot.slane %v4148_v14, 4  ;;  %618 = vst [vmem:[#allocation2 + $0xc] sm:$0x1] %v617_v26  ;;  %v1952_v9 = vshrl.u32 %v1900_v45, 16  ;;  %v4161_v12 = vshll.u32 %v3780_v43, 16  ;;  %v4547_v44 = vor.u32 %v4545_v28, %v4544_v27 }
 0x1a8   : > { %v4549_v22 = vrot.slane %v4544_v27, 4  ;;  %v4556_v39 = vor.u32 %v4554_v55, %v4553_v52  ;;  %v1278_v15 = vsel %vm8131_vm12, %v6536_v24, %v9084_v18  ;;  %v4159_v63 = vrot.slane %v4158_v31, 4  ;;  %v1908_v27 = vld [vmem:[#allocation2 + $0x2c] sm:$0x1]  ;;  %v4491_v43 = vld [vmem:[#allocation2 + $0x30] sm:$0x8] }
 0x1a9   : > { %v4154_v47 = vsel %vm8794_vm15, %v4149_v25, %v4153_v20  ;;  %v1954_v34 = vrot.slane %v1952_v9, 4  ;;  %v6596_v5 = vcombine.low %v1278_v15, %v1287_v36  ;;  %v4163_v37 = vrot.slane %v4161_v12, 5  ;;  %v1907_v20 = vld [vmem:[#allocation2 + $0x28] sm:$0xf] }
 0x1aa   : > { %v4548_v17 = vsel %vm8131_vm12, %v10233_v51, %v4547_v44  ;;  %v4557_v2 = vsel %vm8131_vm12, %v4549_v22, %v4556_v39  ;;  %v1955_v30 = vshll.u32 %v1900_v45, 16  ;;  %v1961_v35 = vshll.u32 %v1901_v40, 16  ;;  %v4492_v44 = vld [vmem:[#allocation2 + $0x34] sm:$0xf] }
 0x1ab   : > { %v6833_v10 = vcombine.low %v4548_v17, %v4557_v2  ;;  %v1965_v18 = vshrl.u32 %v1901_v40, 16  ;;  %7305 = vmatmul.mubr.msk.bf16.gmra.mrb[60].mxu0 %vm1409_vm4, %v6596_v5  ;;  %v4164_v23 = vsel %vm8794_vm15, %v4159_v63, %v4163_v37  ;;  %v1976_v38 = vshrl.u32 %v1903_v11, 16  ;;  %v4494_v5 = vld [vmem:[#allocation2 + $0x40] sm:$0x8] }
 0x1ac   : > { %v1979_v48 = vshll.u32 %v1903_v11, 16  ;;  %v1985_v54 = vshll.u32 %v1904_v8, 16  ;;  %v6788_v36 = vcombine.low %v4154_v47, %v4164_v23  ;;  %v1957_v49 = vrot.slane %v1955_v30, 5  ;;  %v4493_v47 = vld [vmem:[#allocation2 + $0x38] sm:$0xf] }
 0x1ad   : > { %v1963_v58 = vrot.slane %v1961_v35, 5  ;;  %v1967_v19 = vrot.slane %v1965_v18, 4  ;;  %v1978_v4 = vrot.slane %v1976_v38, 4  ;;  %v1989_v53 = vshrl.u32 %v1904_v8, 16  ;;  %v7933_v38 = vld [vmem:[%s9991_s3 + $0x68] sm:$0xff]  }
 0x1ae   : > { %v1902_v46 = vld [vmem:[#allocation2 + $0xc] sm:$0x1]  ;;  %v1981_v16 = vrot.slane %v1979_v48, 5  ;;  %v1987_v29 = vrot.slane %v1985_v54, 5  ;;  %7465 = vmatmul.mubr.msk.bf16.gmra.mrb[28].mxu1 %vm1409_vm4, %v6788_v36  ;;  %v1958_v42 = vor.u32 %v1957_v49, %v1954_v34  ;;  %v1995_v45 = vshll.u32 %v1905_v50, 16 }
 0x1af   : > { %v1968_v7 = vor.u32 %v1967_v19, %v1963_v58  ;;  %v1971_v6 = vshll.u32 %v1902_v46, 16  ;;  %7476 = vmatprep.mubr.msk.bf16.mxu1 %vm1409_vm4, %v6833_v10  ;;  %v1991_v56 = vrot.slane %v1989_v53, 4  ;;  %v2000_v28 = vshrl.u32 %v1906_v21, 16  ;;  %v4495_v10 = vld [vmem:[#allocation2 + $0x44] sm:$0xf] }
 0x1b0   : > { %v1982_v32 = vor.u32 %v1981_v16, %v1978_v4  ;;  %v2003_v57 = vshll.u32 %v1906_v21, 16  ;;  %v1959_v1 = vrot.slane %v1958_v42, 4  ;;  %v1997_v3 = vrot.slane %v1995_v45, 5  ;;  %v4496_v50 = vld [vmem:[#allocation2 + $0x48] sm:$0xf] }
 0x1b1   : > { %v1969_v61 = vrot.slane %v1968_v7, 4  ;;  %v1973_v14 = vrot.slane %v1971_v6, 5  ;;  %v1992_v55 = vor.u32 %v1991_v56, %v1987_v29  ;;  %v2002_v26 = vrot.slane %v2000_v28, 4  ;;  %v1909_v42 = vld [vmem:[#allocation2 + $0x34] sm:$0xf] }
 0x1b2   : > { %v1983_v52 = vrot.slane %v1982_v32, 4  ;;  %v2005_v24 = vrot.slane %v2003_v57, 5  ;;  %v1964_v25 = vsel %vm8794_vm15, %v1959_v1, %v1963_v58  ;;  %v2009_v9 = vshll.u32 %v1907_v20, 16  ;;  %v1910_v56 = vld [vmem:[#allocation2 + $0x38] sm:$0xf] }
 0x1b3   : > { %v1974_v31 = vsel %vm8794_vm15, %v1969_v61, %v1973_v14  ;;  %v2013_v12 = vshrl.u32 %v1907_v20, 16  ;;  %v1993_v40 = vrot.slane %v1992_v55, 4  ;;  %v2019_v11 = vshll.u32 %v1908_v27, 16  ;;  %v7934_v20 = vld [vmem:[%s9991_s3 + $0x70] sm:$0xff]  }
 0x1b4   : > { %v6625_v22 = vcombine.low %v1964_v25, %v1974_v31  ;;  %v1988_v39 = vsel %vm8794_vm15, %v1983_v52, %v1987_v29  ;;  %v2006_v15 = vor.u32 %v2005_v24, %v2002_v26  ;;  %v2011_v63 = vrot.slane %v2009_v9, 5  ;;  %v1912_v25 = vld [vmem:[#allocation2 + $0x44] sm:$0xf] }
 0x1b5   : > { %v2015_v34 = vrot.slane %v2013_v12, 4  ;;  %v4559_v8 = vshrl.u32 %v4491_v43, 16  ;;  %v1998_v37 = vsel %vm8794_vm15, %v1993_v40, %v1997_v3  ;;  %v4564_v17 = vshrl.u32 %v4492_v44, 16  ;;  %v1911_v3 = vld [vmem:[#allocation2 + $0x3c] sm:$0x1] }
 0x1b6   : > { %7316 = vmatprep.mubr.msk.bf16.mxu0 %vm1409_vm4, %v6625_v22  ;;  %v2007_v51 = vrot.slane %v2006_v15, 4  ;;  %v4567_v2 = vshll.u32 %v4492_v44, 16  ;;  %v6626_v30 = vcombine.low %v1988_v39, %v1998_v37  ;;  %v2021_v18 = vrot.slane %v2019_v11, 5  ;;  %v1913_v22 = vld [vmem:[#allocation2 + $0x48] sm:$0xf]  ;;  %v7936_v11 = vld [vmem:[%s9991_s3 + $0x78] sm:$0xff]  }
 0x1b7   : > { %v2016_v35 = vor.u32 %v2015_v34, %v2011_v63  ;;  %v6810_v23 = vrot.slane %v4559_v8, 11  ;;  %v4566_v54 = vrot.slane %v4564_v17, 7  ;;  %v4573_v36 = vshrl.u32 %v4493_v47, 16  ;;  %v7929_v39 = vld [vmem:[%s9991_s3 + $0xe8] sm:$0xff]   ;;  %v4497_v17 = vld [vmem:[#allocation2 + $0x50] sm:$0x8] }
 0x1b8   : > { %v2012_v48 = vsel %vm8794_vm15, %v2007_v51, %v2011_v63  ;;  %v4576_v49 = vshll.u32 %v4493_v47, 16  ;;  %7317 = vmatmul.mubr.msk.bf16.vlgmr.msra.gmra.mrb[32].mxu0 %vm1409_vm4, %v6626_v30  ;;  %v4581_v19 = vshrl.u32 %v4494_v5, 16  ;;  %v4586_v21 = vshrl.u32 %v4495_v10, 16  ;;  %v1914_v34 = vld [vmem:[#allocation2 + $0x4c] sm:$0x1] }
 0x1b9   : > { %v2017_v58 = vrot.slane %v2016_v35, 4  ;;  %v4589_v46 = vshll.u32 %v4495_v10, 16  ;;  %v4569_v4 = vor.u32 %v4567_v2, %v4566_v54  ;;  %v4571_v16 = vrot.slane %v4566_v54, 4  ;;  %7349 = vmatpush3.bf16.msra.mxu0 %v9068_v13  ;;  %v7930_v54 = vld [vmem:[%s9991_s3 + $0xf0] sm:$0xff]  }
 0x1ba   : > { %v4575_v29 = vrot.slane %v4573_v36, 7  ;;  %v4595_v53 = vshrl.u32 %v4496_v50, 16  ;;  %v6811_v6 = vrot.slane %v4581_v19, 11  ;;  %v4588_v45 = vrot.slane %v4586_v21, 7  ;;  %7350 = vmatprep.subr.bf16.mxu0 %v7933_v38 }
 0x1bb   : > { %v2022_v7 = vsel %vm8794_vm15, %v2017_v58, %v2021_v18  ;;  %v4598_v32 = vshll.u32 %v4496_v50, 16  ;;  %v4570_v57 = vsel %vm8131_vm12, %v6810_v23, %v4569_v4  ;;  %v2024_v27 = vshrl.u32 %v1909_v42, 16  ;;  %v4498_v18 = vld [vmem:[#allocation2 + $0x54] sm:$0xf]  ;;  %v4499_v58 = vld [vmem:[#allocation2 + $0x58] sm:$0xf] }
 0x1bc   : > { %v6627_v28 = vcombine.low %v2012_v48, %v2022_v7  ;;  %v4578_v1 = vor.u32 %v4576_v49, %v4575_v29  ;;  %v4597_v61 = vrot.slane %v4595_v53, 7  ;;  %v4591_v14 = vor.u32 %v4589_v46, %v4588_v45  ;;  %v4500_v29 = vld [vmem:[#allocation2 + $0x60] sm:$0x8]  ;;  %v4501_v53 = vld [vmem:[#allocation2 + $0x64] sm:$0xf] }
 0x1bd   : > { %v4593_v13 = vrot.slane %v4588_v45, 4  ;;  %v2027_v52 = vshll.u32 %v1909_v42, 16  ;;  %v2033_v24 = vshll.u32 %v1910_v56, 16  ;;  %v2037_v43 = vshrl.u32 %v1910_v56, 16  ;;  %7351 = vmatpush3.bf16.msra.mxu0 %v7933_v38 }
 0x1be   : > { %7320 = vmatprep.mubr.msk.bf16.mxu0 %vm1409_vm4, %v6627_v28  ;;  %v4579_v55 = vsel %vm8131_vm12, %v4571_v16, %v4578_v1  ;;  %v4600_v26 = vor.u32 %v4598_v32, %v4597_v61  ;;  %v4592_v9 = vsel %vm8131_vm12, %v6811_v6, %v4591_v14  ;;  %v2026_v12 = vrot.slane %v2024_v27, 4  ;;  %7352 = vmatprep.subr.bf16.mxu0 %v7934_v20  ;;  %v4502_v14 = vld [vmem:[#allocation2 + $0x68] sm:$0xf] }
 0x1bf   : > { %v6834_v31 = vcombine.low %v4570_v57, %v4579_v55  ;;  %v2029_v44 = vrot.slane %v2027_v52, 5  ;;  %v2035_v15 = vrot.slane %v2033_v24, 5  ;;  %v2039_v47 = vrot.slane %v2037_v43, 4  ;;  %v7932_v57 = vld [vmem:[%s9991_s3 + $0xf8] sm:$0xff]   ;;  %v1915_v24 = vld [vmem:[#allocation2 + $0x54] sm:$0xf] }
 0x1c0   : > { %v4601_v40 = vsel %vm8131_vm12, %v4593_v13, %v4600_v26  ;;  %v2043_v63 = vshll.u32 %v1911_v3, 16  ;;  %v2048_v37 = vshrl.u32 %v1912_v25, 16  ;;  %v2051_v51 = vshll.u32 %v1912_v25, 16 }
 0x1c1   : > { %7477 = vmatmul.mubr.msk.bf16.vlgmr.msra.gmra.mrb[0].mxu1 %vm1409_vm4, %v6834_v31  ;;  %v6835_v8 = vcombine.low %v4592_v9, %v4601_v40  ;;  %v2030_v5 = vor.u32 %v2029_v44, %v2026_v12  ;;  %v2040_v2 = vor.u32 %v2039_v47, %v2035_v15  ;;  %v2057_v30 = vshll.u32 %v1913_v22, 16  ;;  %7353 = vmatpush3.bf16.msra.mxu0 %v7934_v20  ;;  %v1916_v12 = vld [vmem:[#allocation2 + $0x58] sm:$0xf]  ;;  %v7937_v47 = vld [vmem:[%s9991_s3 + $0x100] sm:$0xff]  }
 0x1c2   : > { %7509 = vmatpush3.bf16.msra.mxu1 %v8904_v59  ;;  %v2045_v10 = vrot.slane %v2043_v63, 5  ;;  %v2061_v35 = vshrl.u32 %v1913_v22, 16  ;;  %v2050_v50 = vrot.slane %v2048_v37, 4  ;;  %v2053_v38 = vrot.slane %v2051_v51, 5  ;;  %7354 = vmatprep.subr.bf16.mxu0 %v7936_v11 }
 0x1c3   : > { %7480 = vmatprep.mubr.msk.bf16.mxu1 %vm1409_vm4, %v6835_v8  ;;  %v2031_v23 = vrot.slane %v2030_v5, 4  ;;  %v2067_v48 = vshll.u32 %v1914_v34, 16  ;;  %7510 = vmatprep.subr.bf16.mxu1 %v7929_v39  ;;  %v2041_v36 = vrot.slane %v2040_v2, 4  ;;  %v2059_v49 = vrot.slane %v2057_v30, 5  ;;  %v1918_v5 = vld [vmem:[#allocation2 + $0x64] sm:$0xf] }
 0x1c4   : > { %v2063_v59 = vrot.slane %v2061_v35, 4  ;;  %v4603_v19 = vshrl.u32 %v4497_v17, 16  ;;  %v2054_v46 = vor.u32 %v2053_v38, %v2050_v50  ;;  %v4608_v16 = vshrl.u32 %v4498_v18, 16 }
 0x1c5   : > { %v2036_v21 = vsel %vm8794_vm15, %v2031_v23, %v2035_v15  ;;  %v2069_v4 = vrot.slane %v2067_v48, 5  ;;  %v2046_v42 = vsel %vm8794_vm15, %v2041_v36, %v2045_v10  ;;  %v4611_v45 = vshll.u32 %v4498_v18, 16  ;;  %7355 = vmatpush3.bf16.msra.mxu0 %v7936_v11  ;;  %v1917_v15 = vld [vmem:[#allocation2 + $0x5c] sm:$0x1]  ;;  %v1919_v10 = vld [vmem:[#allocation2 + $0x68] sm:$0xf] }
 0x1c6   : > { %v2064_v7 = vor.u32 %v2063_v59, %v2059_v49  ;;  %v6812_v6 = vrot.slane %v4603_v19, 11  ;;  %7511 = vmatpush3.bf16.msra.mxu1 %v7929_v39  ;;  %v6628_v32 = vcombine.low %v2036_v21, %v2046_v42  ;;  %v2055_v56 = vrot.slane %v2054_v46, 4 }
 0x1c7   : > { %v4610_v20 = vrot.slane %v4608_v16, 7  ;;  %v4617_v28 = vshrl.u32 %v4499_v58, 16  ;;  %7512 = vmatprep.subr.bf16.mxu1 %v7930_v54  ;;  %v4620_v61 = vshll.u32 %v4499_v58, 16  ;;  %v4625_v13 = vshrl.u32 %v4500_v29, 16  ;;  %v4503_v29 = vld [vmem:[#allocation2 + $0x70] sm:$0x8] }
 0x1c8   : > { %v2065_v1 = vrot.slane %v2064_v7, 4  ;;  %v4630_v3 = vshrl.u32 %v4501_v53, 16  ;;  %7321 = vmatmul.mubr.msk.bf16.gmra.mrb[36].mxu0 %vm1409_vm4, %v6628_v32  ;;  %v2060_v27 = vsel %vm8794_vm15, %v2055_v56, %v2059_v49  ;;  %v4633_v9 = vshll.u32 %v4501_v53, 16  ;;  %v1920_v49 = vld [vmem:[#allocation2 + $0x6c] sm:$0x1] }
 0x1c9   : > { %v4613_v52 = vor.u32 %v4611_v45, %v4610_v20  ;;  %v4615_v55 = vrot.slane %v4610_v20, 4  ;;  %v4619_v26 = vrot.slane %v4617_v28, 7  ;;  %v6813_v25 = vrot.slane %v4625_v13, 11  ;;  %v4504_v53 = vld [vmem:[#allocation2 + $0x74] sm:$0xf] }
 0x1ca   : > { %v2070_v43 = vsel %vm8794_vm15, %v2065_v1, %v2069_v4  ;;  %v4632_v31 = vrot.slane %v4630_v3, 7  ;;  %7513 = vmatpush3.bf16.msra.mxu1 %v7930_v54  ;;  %v4639_v40 = vshrl.u32 %v4502_v14, 16  ;;  %v4642_v11 = vshll.u32 %v4502_v14, 16 }
 0x1cb   : > { %v6629_v44 = vcombine.low %v2060_v27, %v2070_v43  ;;  %v4614_v22 = vsel %vm8131_vm12, %v6812_v6, %v4613_v52  ;;  %v4622_v39 = vor.u32 %v4620_v61, %v4619_v26  ;;  %7514 = vmatprep.subr.bf16.mxu1 %v7932_v57  ;;  %v2072_v8 = vshrl.u32 %v1915_v24, 16  ;;  %v9192_v61 = vld [vmem:[#allocation2 + $0x78] sm:$0xf]  ;;  %v4506_v26 = vld [vmem:[#allocation2 + $0x80] sm:$0x8] }
 0x1cc   : > { %v4635_v63 = vor.u32 %v4633_v9, %v4632_v31  ;;  %v4637_v34 = vrot.slane %v4632_v31, 4  ;;  %v4641_v51 = vrot.slane %v4639_v40, 7  ;;  %v2075_v17 = vshll.u32 %v1915_v24, 16  ;;  %v9198_v9 = vld [vmem:[#allocation2 + $0x84] sm:$0xf] }
 0x1cd   : > { %7324 = vmatprep.mubr.msk.bf16.mxu0 %vm1409_vm4, %v6629_v44  ;;  %v4623_v37 = vsel %vm8131_vm12, %v4615_v55, %v4622_v39  ;;  %v2081_v2 = vshll.u32 %v1916_v12, 16  ;;  %v2074_v18 = vrot.slane %v2072_v8, 4  ;;  %v2085_v23 = vshrl.u32 %v1916_v12, 16  ;;  %v9202_v40 = vld [vmem:[#allocation2 + $0x88] sm:$0xf] }
 0x1ce   : > { %v6836_v30 = vcombine.low %v4614_v22, %v4623_v37  ;;  %v4636_v35 = vsel %vm8131_vm12, %v6813_v25, %v4635_v63  ;;  %7515 = vmatpush3.bf16.msra.mxu1 %v7932_v57  ;;  %v4644_v50 = vor.u32 %v4642_v11, %v4641_v51  ;;  %v2077_v38 = vrot.slane %v2075_v17, 5  ;;  %v1921_v11 = vld [vmem:[#allocation2 + $0x74] sm:$0xf]  ;;  %v1922_v17 = vld [vmem:[#allocation2 + $0x78] sm:$0xf] }
 0x1cf   : > { %v2083_v48 = vrot.slane %v2081_v2, 5  ;;  %v2091_v54 = vshll.u32 %v1917_v15, 16  ;;  %7548 = vmatprep.subr.bf16.mxu1 %v7937_v47  ;;  %v2087_v36 = vrot.slane %v2085_v23, 4  ;;  %v2096_v59 = vshrl.u32 %v1918_v5, 16 }
 0x1d0   : > { %7481 = vmatmul.mubr.msk.bf16.gmra.mrb[4].mxu1 %vm1409_vm4, %v6836_v30  ;;  %v2099_v58 = vshll.u32 %v1918_v5, 16  ;;  %v2105_v19 = vshll.u32 %v1919_v10, 16  ;;  %v4645_v21 = vsel %vm8131_vm12, %v4637_v34, %v4644_v50  ;;  %v2078_v46 = vor.u32 %v2077_v38, %v2074_v18  ;;  %v1923_v38 = vld [vmem:[#allocation2 + $0x7c] sm:$0x1] }
 0x1d1   : > { %v2093_v4 = vrot.slane %v2091_v54, 5  ;;  %v2109_v16 = vshrl.u32 %v1919_v10, 16  ;;  %v6837_v42 = vcombine.low %v4636_v35, %v4645_v21  ;;  %v2088_v7 = vor.u32 %v2087_v36, %v2083_v48 }
 0x1d2   : > { %v2098_v6 = vrot.slane %v2096_v59, 4  ;;  %v2101_v45 = vrot.slane %v2099_v58, 5  ;;  %v2079_v32 = vrot.slane %v2078_v46, 4  ;;  %v2107_v56 = vrot.slane %v2105_v19, 5  ;;  %v1924_v58 = vld [vmem:[#allocation2 + $0x84] sm:$0xf] }
 0x1d3   : > { %v2111_v20 = vrot.slane %v2109_v16, 4  ;;  %v2115_v28 = vshll.u32 %v1920_v49, 16  ;;  %7484 = vmatprep.mubr.msk.bf16.mxu1 %vm1409_vm4, %v6837_v42  ;;  %v2089_v57 = vrot.slane %v2088_v7, 4  ;;  %v4647_v14 = vshrl.u32 %v4503_v29, 16  ;;  %v1925_v16 = vld [vmem:[#allocation2 + $0x88] sm:$0xf] }
 0x1d4   : > { %v2102_v1 = vor.u32 %v2101_v45, %v2098_v6  ;;  %v4652_v13 = vshrl.u32 %v4504_v53, 16  ;;  %v2084_v3 = vsel %vm8794_vm15, %v2079_v32, %v2083_v48  ;;  %v4655_v55 = vshll.u32 %v4504_v53, 16 }
 0x1d5   : > { %v2112_v27 = vor.u32 %v2111_v20, %v2107_v56  ;;  %v2117_v52 = vrot.slane %v2115_v28, 5  ;;  %v2094_v24 = vsel %vm8794_vm15, %v2089_v57, %v2093_v4  ;;  %v6814_v25 = vrot.slane %v4647_v14, 11 }
 0x1d6   : > { %v2103_v43 = vrot.slane %v2102_v1, 4  ;;  %v4654_v31 = vrot.slane %v4652_v13, 7  ;;  %v6630_v12 = vcombine.low %v2084_v3, %v2094_v24  ;;  %v4661_v22 = vshrl.u32 %v9192_v61, 16  ;;  %v4509_v13 = vld [vmem:[#allocation2 + $0x90] sm:$0x8] }
 0x1d7   : > { %v2113_v44 = vrot.slane %v2112_v27, 4  ;;  %v4664_v39 = vshll.u32 %v9192_v61, 16  ;;  %v4669_v34 = vshrl.u32 %v4506_v26, 16  ;;  %v4674_v37 = vshrl.u32 %v9198_v9, 16  ;;  %v4510_v3 = vld [vmem:[#allocation2 + $0x94] sm:$0xf] }
 0x1d8   : > { %v2108_v15 = vsel %vm8794_vm15, %v2103_v43, %v2107_v56  ;;  %v4657_v47 = vor.u32 %v4655_v55, %v4654_v31  ;;  %v4659_v63 = vrot.slane %v4654_v31, 4  ;;  %7325 = vmatmul.mubr.msk.bf16.gmra.mrb[40].mxu0 %vm1409_vm4, %v6630_v12  ;;  %v4663_v5 = vrot.slane %v4661_v22, 7  ;;  %v1926_v56 = vld [vmem:[#allocation2 + $0x8c] sm:$0x1]  ;;  %v9224_v22 = vld [vmem:[#allocation2 + $0x98] sm:$0xf] }
 0x1d9   : > { %v2118_v8 = vsel %vm8794_vm15, %v2113_v44, %v2117_v52  ;;  %v4677_v51 = vshll.u32 %v9198_v9, 16  ;;  %v6815_v30 = vrot.slane %v4669_v34, 11  ;;  %v4683_v35 = vshrl.u32 %v9202_v40, 16 }
 0x1da   : > { %v6631_v2 = vcombine.low %v2108_v15, %v2118_v8  ;;  %v4658_v10 = vsel %vm8131_vm12, %v6814_v25, %v4657_v47  ;;  %v4666_v18 = vor.u32 %v4664_v39, %v4663_v5  ;;  %v4676_v23 = vrot.slane %v4674_v37, 7  ;;  %v4512_v8 = vld [vmem:[#allocation2 + $0xa0] sm:$0x8] }
 0x1db   : > { %v4686_v50 = vshll.u32 %v9202_v40, 16  ;;  %v2120_v48 = vshrl.u32 %v1921_v11, 16  ;;  %v4685_v54 = vrot.slane %v4683_v35, 7  ;;  %v2123_v36 = vshll.u32 %v1921_v11, 16 }
 0x1dc   : > { %7328 = vmatprep.mubr.msk.bf16.mxu0 %vm1409_vm4, %v6631_v2  ;;  %v2129_v49 = vshll.u32 %v1922_v17, 16  ;;  %v2133_v59 = vshrl.u32 %v1922_v17, 16  ;;  %v4667_v19 = vsel %vm8131_vm12, %v4659_v63, %v4666_v18  ;;  %v4679_v21 = vor.u32 %v4677_v51, %v4676_v23  ;;  %v9230_v2 = vld [vmem:[#allocation2 + $0xa4] sm:$0xf] }
 0x1dd   : > { %v4681_v46 = vrot.slane %v4676_v23, 4  ;;  %v2122_v4 = vrot.slane %v2120_v48, 4  ;;  %v6838_v29 = vcombine.low %v4658_v10, %v4667_v19  ;;  %v4688_v53 = vor.u32 %v4686_v50, %v4685_v54  ;;  %v9233_v23 = vld [vmem:[#allocation2 + $0xa8] sm:$0xf]  ;;  %v1927_v19 = vld [vmem:[#allocation2 + $0x94] sm:$0xf] }
 0x1de   : > { %v2125_v42 = vrot.slane %v2123_v36, 5  ;;  %v2131_v7 = vrot.slane %v2129_v49, 5  ;;  %v4680_v6 = vsel %vm8131_vm12, %v6815_v30, %v4679_v21  ;;  %v2135_v45 = vrot.slane %v2133_v59, 4 }
 0x1df   : > { %v2139_v32 = vshll.u32 %v1923_v38, 16  ;;  %v2144_v20 = vshrl.u32 %v1924_v58, 16  ;;  %7485 = vmatmul.mubr.msk.bf16.gmra.mrb[8].mxu1 %vm1409_vm4, %v6838_v29  ;;  %v4689_v28 = vsel %vm8131_vm12, %v4681_v46, %v4688_v53  ;;  %v2147_v1 = vshll.u32 %v1924_v58, 16  ;;  %v1928_v29 = vld [vmem:[#allocation2 + $0x98] sm:$0xf] }
 0x1e0   : > { %v2126_v57 = vor.u32 %v2125_v42, %v2122_v4  ;;  %v2153_v14 = vshll.u32 %v1925_v16, 16  ;;  %v6839_v27 = vcombine.low %v4680_v6, %v4689_v28  ;;  %v2136_v52 = vor.u32 %v2135_v45, %v2131_v7 }
 0x1e1   : > { %v2141_v55 = vrot.slane %v2139_v32, 5  ;;  %v2146_v26 = vrot.slane %v2144_v20, 4  ;;  %v2149_v43 = vrot.slane %v2147_v1, 5  ;;  %v2157_v31 = vshrl.u32 %v1925_v16, 16 }
 0x1e2   : > { %v2127_v24 = vrot.slane %v2126_v57, 4  ;;  %v2155_v25 = vrot.slane %v2153_v14, 5  ;;  %7488 = vmatprep.mubr.msk.bf16.mxu1 %vm1409_vm4, %v6839_v27  ;;  %v2137_v12 = vrot.slane %v2136_v52, 4  ;;  %v2163_v44 = vshll.u32 %v1926_v56, 16  ;;  %v1929_v56 = vld [vmem:[#allocation2 + $0x9c] sm:$0x1] }
 0x1e3   : > { %v4691_v39 = vshrl.u32 %v4509_v13, 16  ;;  %v4696_v15 = vshrl.u32 %v4510_v3, 16  ;;  %v2150_v63 = vor.u32 %v2149_v43, %v2146_v26  ;;  %v2159_v34 = vrot.slane %v2157_v31, 4 }
 0x1e4   : > { %v2132_v47 = vsel %vm8794_vm15, %v2127_v24, %v2131_v7  ;;  %v4699_v11 = vshll.u32 %v4510_v3, 16  ;;  %v2142_v5 = vsel %vm8794_vm15, %v2137_v12, %v2141_v55  ;;  %v2165_v37 = vrot.slane %v2163_v44, 5  ;;  %v1930_v3 = vld [vmem:[#allocation2 + $0xa4] sm:$0xf]  ;;  %v1931_v24 = vld [vmem:[#allocation2 + $0xa8] sm:$0xf] }
 0x1e5   : > { %v6816_v51 = vrot.slane %v4691_v39, 11  ;;  %v4698_v17 = vrot.slane %v4696_v15, 7  ;;  %v6632_v10 = vcombine.low %v2132_v47, %v2142_v5  ;;  %v2151_v30 = vrot.slane %v2150_v63, 4  ;;  %v1932_v15 = vld [vmem:[#allocation2 + $0xac] sm:$0x1] }
 0x1e6   : > { %v2160_v35 = vor.u32 %v2159_v34, %v2155_v25  ;;  %v4705_v18 = vshrl.u32 %v9224_v22, 16  ;;  %v4708_v48 = vshll.u32 %v9224_v22, 16  ;;  %v4713_v54 = vshrl.u32 %v4512_v8, 16  ;;  %v4515_v34 = vld [vmem:[#allocation2 + $0xb0] sm:$0x8] }
 0x1e7   : > { %v4701_v50 = vor.u32 %v4699_v11, %v4698_v17  ;;  %v4703_v38 = vrot.slane %v4698_v17, 4  ;;  %7329 = vmatmul.mubr.msk.bf16.gmra.mrb[44].mxu0 %vm1409_vm4, %v6632_v10  ;;  %v2156_v36 = vsel %vm8794_vm15, %v2151_v30, %v2155_v25  ;;  %v4718_v58 = vshrl.u32 %v9230_v2, 16 }
 0x1e8   : > { %v2161_v49 = vrot.slane %v2160_v35, 4  ;;  %v4707_v59 = vrot.slane %v4705_v18, 7  ;;  %v6817_v46 = vrot.slane %v4713_v54, 11  ;;  %v4721_v4 = vshll.u32 %v9230_v2, 16 }
 0x1e9   : > { %v4702_v21 = vsel %vm8131_vm12, %v6816_v51, %v4701_v50  ;;  %v4727_v16 = vshrl.u32 %v9233_v23, 16  ;;  %v4720_v7 = vrot.slane %v4718_v58, 7  ;;  %v4730_v6 = vshll.u32 %v9233_v23, 16  ;;  %v9255_v51 = vld [vmem:[#allocation2 + $0xb4] sm:$0xf] }
 0x1ea   : > { %v2166_v53 = vsel %vm8794_vm15, %v2161_v49, %v2165_v37  ;;  %v4710_v42 = vor.u32 %v4708_v48, %v4707_v59  ;;  %v2168_v20 = vshrl.u32 %v1927_v19, 16  ;;  %v2171_v28 = vshll.u32 %v1927_v19, 16  ;;  %v9258_v48 = vld [vmem:[#allocation2 + $0xb8] sm:$0xf]  ;;  %v4518_v19 = vld [vmem:[#allocation2 + $0xc0] sm:$0x8] }
 0x1eb   : > { %v6633_v45 = vcombine.low %v2156_v36, %v2166_v53  ;;  %v4729_v32 = vrot.slane %v4727_v16, 7  ;;  %v4723_v1 = vor.u32 %v4721_v4, %v4720_v7  ;;  %v4725_v14 = vrot.slane %v4720_v7, 4 }
 0x1ec   : > { %v4711_v57 = vsel %vm8131_vm12, %v4703_v38, %v4710_v42  ;;  %v2177_v13 = vshll.u32 %v1928_v29, 16  ;;  %v2170_v55 = vrot.slane %v2168_v20, 4  ;;  %v2173_v26 = vrot.slane %v2171_v28, 5 }
 0x1ed   : > { %7332 = vmatprep.mubr.msk.bf16.mxu0 %vm1409_vm4, %v6633_v45  ;;  %v6840_v27 = vcombine.low %v4702_v21, %v4711_v57  ;;  %v4732_v52 = vor.u32 %v4730_v6, %v4729_v32  ;;  %v4724_v43 = vsel %vm8131_vm12, %v6817_v46, %v4723_v1  ;;  %v2181_v31 = vshrl.u32 %v1928_v29, 16  ;;  %v9263_v21 = vld [vmem:[#allocation2 + $0xc4] sm:$0xf] }
 0x1ee   : > { %v2179_v25 = vrot.slane %v2177_v13, 5  ;;  %v2187_v12 = vshll.u32 %v1929_v56, 16  ;;  %v2174_v39 = vor.u32 %v2173_v26, %v2170_v55  ;;  %v2192_v47 = vshrl.u32 %v1930_v3, 16  ;;  %v9270_v56 = vld [vmem:[#allocation2 + $0xc8] sm:$0xf] }
 0x1ef   : > { %7489 = vmatmul.mubr.msk.bf16.gmra.mrb[12].mxu1 %vm1409_vm4, %v6840_v27  ;;  %v4733_v44 = vsel %vm8131_vm12, %v4725_v14, %v4732_v52  ;;  %v2195_v63 = vshll.u32 %v1930_v3, 16  ;;  %v2183_v8 = vrot.slane %v2181_v31, 4  ;;  %v2201_v37 = vshll.u32 %v1931_v24, 16  ;;  %v1933_v26 = vld [vmem:[#allocation2 + $0xb4] sm:$0xf] }
 0x1f0   : > { %v6841_v11 = vcombine.low %v4724_v43, %v4733_v44  ;;  %v2189_v5 = vrot.slane %v2187_v12, 5  ;;  %v2175_v17 = vrot.slane %v2174_v39, 4  ;;  %v2194_v10 = vrot.slane %v2192_v47, 4  ;;  %v1934_v12 = vld [vmem:[#allocation2 + $0xb8] sm:$0xf] }
 0x1f1   : > { %v2197_v30 = vrot.slane %v2195_v63, 5  ;;  %v2205_v35 = vshrl.u32 %v1931_v24, 16  ;;  %v2184_v18 = vor.u32 %v2183_v8, %v2179_v25  ;;  %v2203_v50 = vrot.slane %v2201_v37, 5  ;;  %v1935_v44 = vld [vmem:[#allocation2 + $0xbc] sm:$0x1] }
 0x1f2   : > { %7492 = vmatprep.mubr.msk.bf16.mxu1 %vm1409_vm4, %v6841_v11  ;;  %v2211_v38 = vshll.u32 %v1932_v15, 16  ;;  %v4735_v54 = vshrl.u32 %v4515_v34, 16  ;;  %v2180_v36 = vsel %vm8794_vm15, %v2175_v17, %v2179_v25  ;;  %v4740_v58 = vshrl.u32 %v9255_v51, 16  ;;  %v1936_v37 = vld [vmem:[#allocation2 + $0xc4] sm:$0xf] }
 0x1f3   : > { %v2198_v49 = vor.u32 %v2197_v30, %v2194_v10  ;;  %v2207_v59 = vrot.slane %v2205_v35, 4  ;;  %v2185_v46 = vrot.slane %v2184_v18, 4  ;;  %v4743_v29 = vshll.u32 %v9255_v51, 16  ;;  %v1937_v18 = vld [vmem:[#allocation2 + $0xc8] sm:$0xf] }
 0x1f4   : > { %v2213_v4 = vrot.slane %v2211_v38, 5  ;;  %v6818_v16 = vrot.slane %v4735_v54, 11  ;;  %v4742_v7 = vrot.slane %v4740_v58, 7  ;;  %v4749_v6 = vshrl.u32 %v9258_v48, 16 }
 0x1f5   : > { %v2199_v53 = vrot.slane %v2198_v49, 4  ;;  %v2208_v42 = vor.u32 %v2207_v59, %v2203_v50  ;;  %v2190_v45 = vsel %vm8794_vm15, %v2185_v46, %v2189_v5  ;;  %v4752_v32 = vshll.u32 %v9258_v48, 16  ;;  %v1938_v46 = vld [vmem:[#allocation2 + $0xcc] sm:$0x1] }
 0x1f6   : > { %v4757_v20 = vshrl.u32 %v4518_v19, 16  ;;  %v4762_v28 = vshrl.u32 %v9263_v21, 16  ;;  %v6634_v57 = vcombine.low %v2180_v36, %v2190_v45  ;;  %v4745_v13 = vor.u32 %v4743_v29, %v4742_v7 }
 0x1f7   : > { %v2204_v1 = vsel %vm8794_vm15, %v2199_v53, %v2203_v50  ;;  %v2209_v14 = vrot.slane %v2208_v42, 4  ;;  %v4747_v3 = vrot.slane %v4742_v7, 4  ;;  %v4751_v27 = vrot.slane %v4749_v6, 7  ;;  %v4521_v42 = vld [vmem:[#allocation2 + $0xd0] sm:$0x8] }
 0x1f8   : > { %v6819_v52 = vrot.slane %v4757_v20, 11  ;;  %v4764_v55 = vrot.slane %v4762_v28, 7  ;;  %7333 = vmatmul.mubr.msk.bf16.gmra.mrb[48].mxu0 %vm1409_vm4, %v6634_v57  ;;  %v4746_v43 = vsel %vm8131_vm12, %v6818_v16, %v4745_v13  ;;  %v4765_v25 = vshll.u32 %v9263_v21, 16  ;;  %v9291_v20 = vld [vmem:[#allocation2 + $0xd4] sm:$0xf] }
 0x1f9   : > { %v2214_v24 = vsel %vm8794_vm15, %v2209_v14, %v2213_v4  ;;  %v4771_v31 = vshrl.u32 %v9270_v56, 16  ;;  %v4754_v15 = vor.u32 %v4752_v32, %v4751_v27  ;;  %v4774_v63 = vshll.u32 %v9270_v56, 16  ;;  %v9293_v13 = vld [vmem:[#allocation2 + $0xe4] sm:$0xf] }
 0x1fa   : > { %v6635_v39 = vcombine.low %v2204_v1, %v2214_v24  ;;  %v4769_v47 = vrot.slane %v4764_v55, 4  ;;  %v4767_v34 = vor.u32 %v4765_v25, %v4764_v55  ;;  %v2216_v8 = vshrl.u32 %v1933_v26, 16  ;;  %v9296_v55 = vld [vmem:[#allocation2 + $0xd8] sm:$0xf] }
 0x1fb   : > { %v4773_v11 = vrot.slane %v4771_v31, 7  ;;  %v2219_v5 = vshll.u32 %v1933_v26, 16  ;;  %v4755_v17 = vsel %vm8131_vm12, %v4747_v3, %v4754_v15  ;;  %v2225_v10 = vshll.u32 %v1934_v12, 16 }
 0x1fc   : > { %7336 = vmatprep.mubr.msk.bf16.mxu0 %vm1409_vm4, %v6635_v39  ;;  %v2229_v30 = vshrl.u32 %v1934_v12, 16  ;;  %v2235_v35 = vshll.u32 %v1935_v44, 16  ;;  %v6842_v50 = vcombine.low %v4746_v43, %v4755_v17  ;;  %v4768_v38 = vsel %vm8131_vm12, %v6819_v52, %v4767_v34  ;;  %v4524_v12 = vld [vmem:[#allocation2 + $0xe0] sm:$0x8]  ;;  %v9306_v17 = vld [vmem:[#allocation2 + $0xe8] sm:$0xf] }
 0x1fd   : > { %v4776_v54 = vor.u32 %v4774_v63, %v4773_v11  ;;  %v2218_v36 = vrot.slane %v2216_v8, 4  ;;  %v2221_v49 = vrot.slane %v2219_v5, 5  ;;  %v2227_v59 = vrot.slane %v2225_v10, 5 }
 0x1fe   : > { %v2231_v58 = vrot.slane %v2229_v30, 4  ;;  %v2237_v19 = vrot.slane %v2235_v35, 5  ;;  %7493 = vmatmul.mubr.msk.bf16.gmra.mrb[16].mxu1 %vm1409_vm4, %v6842_v50  ;;  %v2240_v16 = vshrl.u32 %v1936_v37, 16  ;;  %v2243_v29 = vshll.u32 %v1936_v37, 16 }
 0x1ff   : > { %v4777_v4 = vsel %vm8131_vm12, %v4769_v47, %v4776_v54  ;;  %v2249_v53 = vshll.u32 %v1937_v18, 16  ;;  %v2222_v6 = vor.u32 %v2221_v49, %v2218_v36  ;;  %v2253_v32 = vshrl.u32 %v1937_v18, 16  ;;  %v1939_v54 = vld [vmem:[#allocation2 + $0xd4] sm:$0xf] }
 0x200   : > { %v6843_v7 = vcombine.low %v4768_v38, %v4777_v4  ;;  %v2232_v45 = vor.u32 %v2231_v58, %v2227_v59  ;;  %v2242_v28 = vrot.slane %v2240_v16, 4  ;;  %v2245_v57 = vrot.slane %v2243_v29, 5 }
 0x201   : > { %v2251_v1 = vrot.slane %v2249_v53, 5  ;;  %v2259_v14 = vshll.u32 %v1938_v46, 16  ;;  %v2223_v3 = vrot.slane %v2222_v6, 4  ;;  %v2255_v52 = vrot.slane %v2253_v32, 4  ;;  %v1942_v53 = vld [vmem:[#allocation2 + $0xe4] sm:$0xf] }
 0x202   : > { %7496 = vmatprep.mubr.msk.bf16.mxu1 %vm1409_vm4, %v6843_v7  ;;  %v2233_v27 = vrot.slane %v2232_v45, 4  ;;  %v4779_v26 = vshrl.u32 %v4521_v42, 16  ;;  %v2246_v24 = vor.u32 %v2245_v57, %v2242_v28  ;;  %v4784_v25 = vshrl.u32 %v9291_v20, 16  ;;  %v1941_v45 = vld [vmem:[#allocation2 + $0xdc] sm:$0x1] }
 0x203   : > { %v2261_v43 = vrot.slane %v2259_v14, 5  ;;  %v4787_v31 = vshll.u32 %v9291_v20, 16  ;;  %v2228_v44 = vsel %vm8794_vm15, %v2223_v3, %v2227_v59  ;;  %v2256_v15 = vor.u32 %v2255_v52, %v2251_v1  ;;  %v1943_v3 = vld [vmem:[#allocation2 + $0xe8] sm:$0xf] }
 0x204   : > { %v2238_v39 = vsel %vm8794_vm15, %v2233_v27, %v2237_v19  ;;  %v6820_v47 = vrot.slane %v4779_v26, 11  ;;  %v2247_v34 = vrot.slane %v2246_v24, 4  ;;  %v4786_v11 = vrot.slane %v4784_v25, 7  ;;  %v1940_v19 = vld [vmem:[#allocation2 + $0xd8] sm:$0xf] }
 0x205   : > { %v6636_v63 = vcombine.low %v2228_v44, %v2238_v39  ;;  %v4793_v8 = vshrl.u32 %v9296_v55, 16  ;;  %v2257_v5 = vrot.slane %v2256_v15, 4  ;;  %v4796_v37 = vshll.u32 %v9296_v55, 16  ;;  %v1944_v39 = vld [vmem:[#allocation2 + $0xec] sm:$0x1] }
 0x206   : > { %v4801_v10 = vshrl.u32 %v4524_v12, 16  ;;  %v4806_v30 = vshrl.u32 %v9293_v13, 16  ;;  %v2252_v35 = vsel %vm8794_vm15, %v2247_v34, %v2251_v1  ;;  %v4789_v18 = vor.u32 %v4787_v31, %v4786_v11 }
 0x207   : > { %7337 = vmatmul.mubr.msk.bf16.gmra.mrb[52].mxu0 %vm1409_vm4, %v6636_v63  ;;  %v4791_v50 = vrot.slane %v4786_v11, 4  ;;  %v4795_v38 = vrot.slane %v4793_v8, 7  ;;  %v2262_v36 = vsel %vm8794_vm15, %v2257_v5, %v2261_v43  ;;  %v4809_v58 = vshll.u32 %v9293_v13, 16 }
 0x208   : > { %v6821_v49 = vrot.slane %v4801_v10, 11  ;;  %v4808_v59 = vrot.slane %v4806_v30, 7  ;;  %v6637_v46 = vcombine.low %v2252_v35, %v2262_v36  ;;  %v4790_v4 = vsel %vm8131_vm12, %v6820_v47, %v4789_v18  ;;  %v9327_v10 = vld [vmem:[#allocation2 + $0xf4] sm:$0xf] }
 0x209   : > { %v4798_v16 = vor.u32 %v4796_v37, %v4795_v38  ;;  %v4815_v29 = vshrl.u32 %v9306_v17, 16  ;;  %v4818_v6 = vshll.u32 %v9306_v17, 16  ;;  %v2264_v32 = vshrl.u32 %v1939_v54, 16  ;;  %v4527_v37 = vld [vmem:[#allocation2 + $0xf0] sm:$0x8] }
 0x20a   : > { %v4811_v42 = vor.u32 %v4809_v58, %v4808_v59  ;;  %v4813_v7 = vrot.slane %v4808_v59, 4  ;;  %7340 = vmatprep.mubr.msk.bf16.mxu0 %vm1409_vm4, %v6637_v46  ;;  %v2267_v1 = vshll.u32 %v1939_v54, 16  ;;  %v2273_v14 = vshll.u32 %v1940_v19, 16 }
 0x20b   : > { %v4799_v28 = vsel %vm8131_vm12, %v4791_v50, %v4798_v16  ;;  %v4817_v57 = vrot.slane %v4815_v29, 7  ;;  %v2266_v26 = vrot.slane %v2264_v32, 4  ;;  %v2277_v24 = vshrl.u32 %v1940_v19, 16  ;;  %v9330_v19 = vld [vmem:[#allocation2 + $0xf8] sm:$0xf] }
 0x20c   : > { %v6844_v27 = vcombine.low %v4790_v4, %v4799_v28  ;;  %v4812_v52 = vsel %vm8131_vm12, %v6821_v49, %v4811_v42  ;;  %v2269_v25 = vrot.slane %v2267_v1, 5  ;;  %v2275_v31 = vrot.slane %v2273_v14, 5 }
 0x20d   : > { %v4820_v43 = vor.u32 %v4818_v6, %v4817_v57  ;;  %v2283_v12 = vshll.u32 %v1941_v45, 16  ;;  %v2279_v44 = vrot.slane %v2277_v24, 4  ;;  %v2288_v15 = vshrl.u32 %v1942_v53, 16  ;;  %v9338_v57 = vld [vmem:[#allocation2 + $0x104] sm:$0xf] }
 0x20e   : > { %7497 = vmatmul.mubr.msk.bf16.gmra.mrb[20].mxu1 %vm1409_vm4, %v6844_v27  ;;  %v2291_v47 = vshll.u32 %v1942_v53, 16  ;;  %v2297_v63 = vshll.u32 %v1943_v3, 16  ;;  %v2270_v11 = vor.u32 %v2269_v25, %v2266_v26  ;;  %v2301_v5 = vshrl.u32 %v1943_v3, 16 }
 0x20f   : > { %v4821_v34 = vsel %vm8131_vm12, %v4813_v7, %v4820_v43  ;;  %v2285_v8 = vrot.slane %v2283_v12, 5  ;;  %v2280_v35 = vor.u32 %v2279_v44, %v2275_v31  ;;  %v2290_v18 = vrot.slane %v2288_v15, 4  ;;  %v675_v7 = vld [vmem:[#allocation2 + $0x100] sm:$0x8]  ;;  %v1946_v12 = vld [vmem:[#allocation2 + $0xf8] sm:$0xf] }
 0x210   : > { %v6845_v30 = vcombine.low %v4812_v52, %v4821_v34  ;;  %v2293_v50 = vrot.slane %v2291_v47, 5  ;;  %v2271_v38 = vrot.slane %v2270_v11, 4  ;;  %v2299_v54 = vrot.slane %v2297_v63, 5  ;;  %v9342_v52 = vld [vmem:[#allocation2 + $0x108] sm:$0xf] }
 0x211   : > { %v2303_v36 = vrot.slane %v2301_v5, 4  ;;  %v2307_v49 = vshll.u32 %v1944_v39, 16  ;;  %v2281_v59 = vrot.slane %v2280_v35, 4  ;;  %v4823_v46 = vshrl.u32 %v4527_v37, 16  ;;  %v1947_v63 = vld [vmem:[#allocation2 + $0xfc] sm:$0x1] }
 0x212   : > { %7500 = vmatprep.mubr.msk.bf16.mxu1 %vm1409_vm4, %v6845_v30  ;;  %v2294_v58 = vor.u32 %v2293_v50, %v2290_v18  ;;  %v4828_v4 = vshrl.u32 %v9327_v10, 16  ;;  %v2276_v16 = vsel %vm8794_vm15, %v2271_v38, %v2275_v31  ;;  %v4831_v42 = vshll.u32 %v9327_v10, 16  ;;  %v1945_v31 = vld [vmem:[#allocation2 + $0xf4] sm:$0xf] }
 0x213   : > { %v2304_v29 = vor.u32 %v2303_v36, %v2299_v54  ;;  %v2309_v53 = vrot.slane %v2307_v49, 5  ;;  %v2286_v6 = vsel %vm8794_vm15, %v2281_v59, %v2285_v8  ;;  %v6822_v32 = vrot.slane %v4823_v46, 11  ;;  %v2657_v36 = vld [vmem:[#allocation2 + $0x10] sm:$0x8] }
 0x214   : > { %v2295_v45 = vrot.slane %v2294_v58, 4  ;;  %v4830_v28 = vrot.slane %v4828_v4, 7  ;;  %v6638_v1 = vcombine.low %v2276_v16, %v2286_v6  ;;  %v4837_v3 = vshrl.u32 %v9330_v19, 16  ;;  %v4533_v4 = vld [vmem:[#allocation2 + $0x110] sm:$0x8] }
 0x215   : > { %v2305_v14 = vrot.slane %v2304_v29, 4  ;;  %v4840_v27 = vshll.u32 %v9330_v19, 16  ;;  %v676_v25 = vsel %vm8113_vm10, 0, %v675_v7  ;;  %v4850_v15 = vshrl.u32 %v9338_v57, 16  ;;  %v9360_v16 = vld [vmem:[#allocation2 + $0x114] sm:$0xf] }
 0x216   : > { %v2300_v26 = vsel %vm8794_vm15, %v2295_v45, %v2299_v54  ;;  %v4833_v24 = vor.u32 %v4831_v42, %v4830_v28  ;;  %v4835_v43 = vrot.slane %v4830_v28, 4  ;;  %7341 = vmatmul.mubr.msk.bf16.gmra.mrb[56].mxu0 %vm1409_vm4, %v6638_v1  ;;  %v4839_v39 = vrot.slane %v4837_v3, 7  ;;  %677 = vst [vmem:[#allocation2 + $0x100] sm:$0x8] %v676_v25  ;;  %v10234_v28 = vld [vmem:[#allocation18_spill] sm:$0xff]  ;;  %v10235_v1 = vld [vmem:[#allocation16_spill] sm:$0xff] }
 0x217   : > { %v2310_v44 = vsel %vm8794_vm15, %v2305_v14, %v2309_v53  ;;  %v4853_v47 = vshll.u32 %v9338_v57, 16  ;;  %v4859_v33 = vshrl.u32 %v9342_v52, 16  ;;  %v4862_v8 = vshll.u32 %v9342_v52, 16 }
 0x218   : > { %v6639_v34 = vcombine.low %v2300_v26, %v2310_v44  ;;  %v4834_v11 = vsel %vm8131_vm12, %v6822_v32, %v4833_v24  ;;  %v4842_v5 = vor.u32 %v4840_v27, %v4839_v39  ;;  %v4852_v37 = vrot.slane %v4850_v15, 7  ;;  %v9367_v27 = vld [vmem:[#allocation2 + $0x118] sm:$0xf] }
 0x219   : > { %v2312_v30 = vshrl.u32 %v1945_v31, 16  ;;  %v2315_v35 = vshll.u32 %v1945_v31, 16  ;;  %v4861_v18 = vrot.slane %v4859_v33, 7  ;;  %v2321_v50 = vshll.u32 %v1946_v12, 16 }
 0x21a   : > { %7344 = vmatprep.mubr.msk.bf16.mxu0 %vm1409_vm4, %v6639_v34  ;;  %v2325_v38 = vshrl.u32 %v1946_v12, 16  ;;  %v2331_v54 = vshll.u32 %v1947_v63, 16  ;;  %v4843_v49 = vsel %vm8131_vm12, %v4835_v43, %v4842_v5  ;;  %v4855_v59 = vor.u32 %v4853_v47, %v4852_v37  ;;  %v10237_v5 = vld [vmem:[#allocation17_spill] sm:$0xff] }
 0x21b   : > { %v4857_v58 = vrot.slane %v4852_v37, 4  ;;  %v2314_v46 = vrot.slane %v2312_v30, 4  ;;  %v6846_v29 = vcombine.low %v4834_v11, %v4843_v49  ;;  %v4864_v53 = vor.u32 %v4862_v8, %v4861_v18  ;;  %v9379_v18 = vld [vmem:[#allocation2 + $0x108] sm:$0xf]  ;;  %v2663_v49 = vld [vmem:[#allocation2 + $0x30] sm:$0x8] }
 0x21c   : > { %v2317_v42 = vrot.slane %v2315_v35, 5  ;;  %v2323_v7 = vrot.slane %v2321_v50, 5  ;;  %v2327_v6 = vrot.slane %v2325_v38, 4  ;;  %v2333_v45 = vrot.slane %v2331_v54, 5  ;;  %v2660_v35 = vld [vmem:[#allocation2 + $0x20] sm:$0x8] }
 0x21d   : > { %v2706_v32 = vshrl.u32 %v2657_v36, 16  ;;  %v10236_v14 = vrot.slane %v10235_v1, 4  ;;  %7501 = vmatmul.mubr.msk.bf16.gmra.mrb[24].mxu1 %vm1409_vm4, %v6846_v29  ;;  %v4530_v26 = vld [vmem:[#allocation2 + $0x100] sm:$0x8]  ;;  %v4865_v24 = vsel %vm8131_vm12, %v4857_v58, %v4864_v53  ;;  %v4867_v25 = vshrl.u32 %v4533_v4, 16 }
 0x21e   : > { %v2318_v43 = vor.u32 %v2317_v42, %v2314_v46  ;;  %v4872_v31 = vshrl.u32 %v9360_v16, 16  ;;  %v4845_v12 = vshrl.u32 %v4530_v26, 16  ;;  %v2328_v44 = vor.u32 %v2327_v6, %v2323_v7 }
 0x21f   : > { %v2726_v3 = vsel %vm8131_vm12, %v10236_v14, %v10234_v28  ;;  %v6661_v39 = vrot.slane %v2706_v32, 11  ;;  %v4875_v15 = vshll.u32 %v9360_v16, 16  ;;  %v6824_v63 = vrot.slane %v4867_v25, 11  ;;  %v2666_v28 = vld [vmem:[#allocation2 + $0x40] sm:$0x8]  ;;  %v10242_v25 = vld [vmem:[#allocation20_spill] sm:$0xff] }
 0x220   : > { %v2319_v47 = vrot.slane %v2318_v43, 4  ;;  %v4874_v34 = vrot.slane %v4872_v31, 7  ;;  %v4881_v11 = vshrl.u32 %v9367_v27, 16  ;;  %v6823_v33 = vrot.slane %v4845_v12, 11  ;;  %v10239_v14 = vld [vmem:[#allocation19_spill] sm:$0xff]  ;;  %v10241_v43 = vld [vmem:[#allocation24_spill] sm:$0xff] }
 0x221   : > { %v2329_v8 = vrot.slane %v2328_v44, 4  ;;  %v2717_v37 = vsel %vm8131_vm12, %v6661_v39, %v10237_v5  ;;  %v4884_v30 = vshll.u32 %v9367_v27, 16  ;;  %v3050_v50 = vshrl.u32 %v9379_v18, 16  ;;  %v10244_v39 = vld [vmem:[#allocation25_spill] sm:$0xff] }
 0x222   : > { %v2324_v38 = vsel %vm8794_vm15, %v2319_v47, %v2323_v7  ;;  %v6685_v54 = vcombine.low %v2717_v37, %v2726_v3  ;;  %v4877_v36 = vor.u32 %v4875_v15, %v4874_v34  ;;  %v4856_v58 = vsel %vm8131_vm12, %v6823_v33, %v4855_v59  ;;  %v10238_v7 = vld [vmem:[#allocation90_spill] sm:$0xff]  ;;  %v10245_v15 = vld [vmem:[#allocation21_spill] sm:$0xff]  ;;  %v7958_v33 = vld [vmem:[#allocation2 + $0x28] sm:$0xf] }
 0x223   : > { %v2334_v46 = vsel %vm8794_vm15, %v2329_v8, %v2333_v45  ;;  %v4879_v4 = vrot.slane %v4874_v34, 4  ;;  %v4883_v29 = vrot.slane %v4881_v11, 7  ;;  %v6847_v53 = vcombine.low %v4856_v58, %v4865_v24  ;;  %v7957_v11 = vld [vmem:[#allocation2 + $0x24] sm:$0xf]  ;;  %v10248_v58 = vld [vmem:[#allocation26_spill] sm:$0xff] }
 0x224   : > { %v6640_v42 = vcombine.low %v2324_v38, %v2334_v46  ;;  %v4878_v6 = vsel %vm8131_vm12, %v6824_v63, %v4877_v36  ;;  %v2728_v32 = vshrl.u32 %v2660_v35, 16  ;;  %v10240_v3 = vrot.slane %v10239_v14, 4  ;;  %v10247_v38 = vld [vmem:[#allocation89_spill] sm:$0xff]  ;;  %v10249_v46 = vld [vmem:[#allocation22_spill] sm:$0xff] }
 0x225   : > { %v4886_v1 = vor.u32 %v4884_v30, %v4883_v29  ;;  %v2750_v59 = vshrl.u32 %v2663_v49, 16  ;;  %v10243_v45 = vshll.u32 %v10242_v25, 16  ;;  %v3053_v24 = vshll.u32 %v9379_v18, 16  ;;  %7504 = vmatprep.mubr.msk.bf16.mxu1 %vm1409_vm4, %v6847_v53  ;;  %v2669_v30 = vld [vmem:[#allocation2 + $0x50] sm:$0x8]  ;;  %v10255_v25 = vld [vmem:[#allocation27_spill] sm:$0xff] }
 0x226   : > { %v2748_v26 = vsel %vm8131_vm12, %v10240_v3, %v10238_v7  ;;  %7345 = vmatmul.mubr.msk.bf16.gmra.mrb[60].mxu0 %vm1409_vm4, %v6640_v42  ;;  %v6662_v12 = vrot.slane %v2728_v32, 11  ;;  %v2762_v44 = vrot.slane %v10241_v43, 4  ;;  %v10246_v47 = vshll.u32 %v10245_v15, 16  ;;  %v10252_v7 = vld [vmem:[#allocation23_spill] sm:$0xff]  ;;  %v7969_v18 = vld [vmem:[#allocation2 + $0x94] sm:$0xf] }
 0x227   : > { %v2760_v31 = vor.u32 %v10243_v45, %v10241_v43  ;;  %7356 = vmatprep.mubr.msk.bf16.mxu0 %vm1409_vm4, %v6685_v54  ;;  %v4887_v34 = vsel %vm8131_vm12, %v4879_v4, %v4886_v1  ;;  %v6877_v8 = vcombine.low %v7957_v11, %v7958_v33  ;;  %v6663_v5 = vrot.slane %v2750_v59, 11  ;;  %v10251_v1 = vld [vmem:[#allocation29_spill] sm:$0xff]  ;;  %v10254_v43 = vld [vmem:[#allocation34_spill] sm:$0xff]  ;;  %v10258_v15 = vld [vmem:[#allocation35_spill] sm:$0xff] }
 0x228   : > { %v2769_v63 = vor.u32 %v10246_v47, %v10244_v39  ;;  %v2772_v37 = vshrl.u32 %v2666_v28, 16  ;;  %v6848_v35 = vcombine.low %v4878_v6, %v4887_v34  ;;  %v2739_v36 = vsel %vm8131_vm12, %v6662_v12, %v10247_v38  ;;  %v2672_v28 = vld [vmem:[#allocation2 + $0x60] sm:$0x8]  ;;  %v10259_v47 = vld [vmem:[#allocation28_spill] sm:$0xff]  ;;  %v2675_v11 = vld [vmem:[#allocation2 + $0x70] sm:$0x8] }
 0x229   : > { %v10250_v54 = vshll.u32 %v10249_v46, 16  ;;  %v6686_v53 = vcombine.low %v2739_v36, %v2748_v26  ;;  %v2761_v4 = vsel %vm8131_vm12, %v6663_v5, %v2760_v31  ;;  %v2784_v32 = vrot.slane %v10248_v58, 4  ;;  %v10262_v38 = vld [vmem:[#allocation32_spill] sm:$0xff] }
 0x22a   : > { %v2770_v49 = vsel %vm8131_vm12, %v2762_v44, %v2769_v63  ;;  %v6664_v42 = vrot.slane %v2772_v37, 11  ;;  %7505 = vmatmul.mubr.msk.bf16.gmra.mrb[28].mxu1 %vm1409_vm4, %v6848_v35  ;;  %v10253_v14 = vshll.u32 %v10252_v7, 16  ;;  %v2794_v59 = vshrl.u32 %v2669_v30, 16 }
 0x22b   : > { %v2782_v29 = vor.u32 %v10250_v54, %v10248_v58  ;;  %v6687_v6 = vcombine.low %v2761_v4, %v2770_v49  ;;  %v10256_v45 = vshll.u32 %v10255_v25, 16  ;;  %v10257_v26 = vshrl.u32 %v8743_v0, 16  ;;  %7516 = vmatprep.mubr.msk.bf16.mxu1 %vm1409_vm4, %v6877_v8  ;;  %v10261_v8 = vld [vmem:[#allocation41_spill] sm:$0xff] }
 0x22c   : > { %v2791_v3 = vor.u32 %v10253_v14, %v10251_v1  ;;  %v9430_v31 = vrot.slane %v3050_v50, 7  ;;  %v2806_v39 = vrot.slane %v10254_v43, 4  ;;  %v10260_v63 = vshll.u32 %v10259_v47, 16  ;;  %v10265_v4 = vld [vmem:[#allocation33_spill] sm:$0xff]  ;;  %v2678_v1 = vld [vmem:[#allocation2 + $0x80] sm:$0x8] }
 0x22d   : > { %v2804_v12 = vor.u32 %v10256_v45, %v10254_v43  ;;  %v9428_v44 = vrot.slane %v10257_v26, 7  ;;  %v2783_v33 = vsel %vm8131_vm12, %v6664_v42, %v2782_v29  ;;  %v6665_v37 = vrot.slane %v2794_v59, 11  ;;  %v10264_v29 = vld [vmem:[#allocation43_spill] sm:$0xff]  ;;  %v10267_v14 = vld [vmem:[#allocation50_spill] sm:$0xff] }
 0x22e   : > { %v2813_v34 = vor.u32 %v10260_v63, %v10258_v15  ;;  %v2792_v5 = vsel %vm8131_vm12, %v2784_v32, %v2791_v3  ;;  %v2816_v30 = vshrl.u32 %v2672_v28, 16  ;;  %v10263_v36 = vshll.u32 %v10262_v38, 16  ;;  %7357 = vmatmul.mubr.msk.bf16.vlgmr.msra.gmra.mrb[32].mxu0 %vm1409_vm4, %v6686_v53  ;;  %v10268_v3 = vld [vmem:[#allocation40_spill] sm:$0xff]  ;;  %v10270_v53 = vld [vmem:[#allocation51_spill] sm:$0xff]  ;;  %v10271_v45 = vld [vmem:[#allocation42_spill] sm:$0xff] }
 0x22f   : > { %v6688_v35 = vcombine.low %v2783_v33, %v2792_v5  ;;  %v2828_v58 = vrot.slane %v10261_v8, 4  ;;  %v2805_v46 = vsel %vm8131_vm12, %v6665_v37, %v2804_v12  ;;  %v10266_v42 = vshll.u32 %v10265_v4, 16  ;;  %7360 = vmatprep.mubr.msk.bf16.mxu0 %vm1409_vm4, %v6687_v6  ;;  %v7960_v15 = vld [vmem:[#allocation2 + $0x38] sm:$0xf]  ;;  %v2681_v33 = vld [vmem:[#allocation2 + $0x90] sm:$0x8] }
 0x230   : > { %v2814_v50 = vsel %vm8131_vm12, %v2806_v39, %v2813_v34  ;;  %v2826_v49 = vor.u32 %v10263_v36, %v10261_v8  ;;  %v6666_v54 = vrot.slane %v2816_v30, 11  ;;  %v2838_v28 = vshrl.u32 %v2675_v11, 16  ;;  %v7959_v39 = vld [vmem:[#allocation2 + $0x34] sm:$0xf]  ;;  %v7942_v34 = vld [vmem:[%s9991_s3 + $0x108] sm:$0xff]  }
 0x231   : > { %v2835_v32 = vor.u32 %v10266_v42, %v10264_v29  ;;  %v6689_v7 = vcombine.low %v2805_v46, %v2814_v50  ;;  %v10269_v59 = vshll.u32 %v10268_v3, 16  ;;  %v2850_v25 = vrot.slane %v10267_v14, 4  ;;  %v7961_v5 = vld [vmem:[#allocation2 + $0x44] sm:$0xf]  ;;  %v7962_v37 = vld [vmem:[#allocation2 + $0x48] sm:$0xf] }
 0x232   : > { %v10272_v26 = vshll.u32 %v10271_v45, 16  ;;  %v6878_v47 = vcombine.low %v7959_v39, %v7960_v15  ;;  %v2827_v63 = vsel %vm8131_vm12, %v6666_v54, %v2826_v49  ;;  %v6667_v11 = vrot.slane %v2838_v28, 11  ;;  %v10273_v49 = vld [vmem:[#allocation55_spill] sm:$0xff]  ;;  %v10276_v4 = vld [vmem:[#allocation57_spill] sm:$0xff]  ;;  %v7965_v39 = vld [vmem:[#allocation2 + $0x58] sm:$0xf] }
 0x233   : > { %v2848_v43 = vor.u32 %v10269_v59, %v10267_v14  ;;  %v2836_v6 = vsel %vm8131_vm12, %v2828_v58, %v2835_v32  ;;  %v6879_v30 = vcombine.low %v7961_v5, %v7962_v37  ;;  %v2860_v38 = vshrl.u32 %v2678_v1, 16  ;;  %v10274_v58 = vld [vmem:[#allocation47_spill] sm:$0xff]  ;;  %v10277_v42 = vld [vmem:[#allocation49_spill] sm:$0xff] }
 0x234   : > { %v2857_v12 = vor.u32 %v10272_v26, %v10270_v53  ;;  %v9468_v50 = vcombine.low %v2827_v63, %v2836_v6  ;;  %7517 = vmatmul.mubr.msk.bf16.vlgmr.msra.gmra.mrb[0].mxu1 %vm1409_vm4, %v6878_v47  ;;  %v10275_v46 = vshll.u32 %v10274_v58, 16  ;;  %v2872_v29 = vrot.slane %v10273_v49, 4  ;;  %v2684_v14 = vld [vmem:[#allocation2 + $0xa0] sm:$0x8]  ;;  %v10280_v53 = vld [vmem:[#allocation54_spill] sm:$0xff] }
 0x235   : > { %v2849_v36 = vsel %vm8131_vm12, %v6667_v11, %v2848_v43  ;;  %v10278_v32 = vshll.u32 %v10277_v42, 16  ;;  %v7963_v1 = vld [vmem:[%s9991_s3 + $0x100] sm:$0xff]   ;;  %7520 = vmatprep.mubr.msk.bf16.mxu1 %vm1409_vm4, %v6879_v30  ;;  %v6668_v59 = vrot.slane %v2860_v38, 11  ;;  %v2882_v43 = vshrl.u32 %v2681_v33, 16  ;;  %v10283_v11 = vld [vmem:[#allocation56_spill] sm:$0xff]  ;;  %v7947_v33 = vld [vmem:[%s9991_s3 + $0x110] sm:$0xff]  }
 0x236   : > { %v2858_v8 = vsel %vm8131_vm12, %v2850_v25, %v2857_v12  ;;  %v2870_v54 = vor.u32 %v10275_v46, %v10273_v49  ;;  %7549 = vmatpush3.bf16.msra.mxu1 %v7963_v1  ;;  %v10279_v25 = vld [vmem:[#allocation62_spill] sm:$0xff]  ;;  %v10281_v45 = vshll.u32 %v10280_v53, 16  ;;  %v7964_v12 = vld [vmem:[#allocation2 + $0x54] sm:$0xf]  ;;  %v10282_v6 = vld [vmem:[#allocation63_spill] sm:$0xff]  ;;  %v10284_v5 = vshll.u32 %v10283_v11, 16  ;;  %7361 = vmatmul.mubr.msk.bf16.gmra.mrb[36].mxu0 %vm1409_vm4, %v6688_v35 }
 0x237   : > { %v2879_v28 = vor.u32 %v10278_v32, %v10276_v4  ;;  %v9486_v3 = vcombine.low %v2849_v36, %v2858_v8  ;;  %v6880_v15 = vcombine.low %v7964_v12, %v7965_v39  ;;  %7550 = vmatprep.subr.bf16.mxu1 %v7942_v34  ;;  %v2894_v63 = vrot.slane %v10279_v25, 4  ;;  %v2687_v30 = vld [vmem:[#allocation2 + $0xb0] sm:$0x8]  ;;  %v7966_v8 = vld [vmem:[#allocation2 + $0x64] sm:$0xf]  ;;  %v10286_v32 = vld [vmem:[#allocation60_spill] sm:$0xff]  ;;  %7364 = vmatprep.mubr.msk.bf16.mxu0 %vm1409_vm4, %v6689_v7 }
 0x238   : > { %v2892_v26 = vor.u32 %v10281_v45, %v10279_v25  ;;  %v2901_v37 = vor.u32 %v10284_v5, %v10282_v6  ;;  %v7967_v38 = vld [vmem:[#allocation2 + $0x68] sm:$0xf]  ;;  %v2871_v49 = vsel %vm8131_vm12, %v6668_v59, %v2870_v54  ;;  %v6669_v58 = vrot.slane %v2882_v43, 11  ;;  %v10285_v42 = vld [vmem:[#allocation65_spill] sm:$0xff]  ;;  %v2690_v12 = vld [vmem:[#allocation2 + $0xc0] sm:$0x8] }
 0x239   : > { %v2880_v47 = vsel %vm8131_vm12, %v2872_v29, %v2879_v28  ;;  %v6881_v36 = vcombine.low %v7966_v8, %v7967_v38  ;;  %v2904_v46 = vshrl.u32 %v2684_v14, 16  ;;  %v10287_v28 = vshll.u32 %v10286_v32, 16  ;;  %v10288_v59 = vld [vmem:[#allocation68_spill] sm:$0xff]  ;;  %v10289_v35 = vld [vmem:[#allocation61_spill] sm:$0xff]  ;;  %v10295_v5 = vld [vmem:[#allocation67_spill] sm:$0xff] }
 0x23a   : > { %v9503_v29 = vcombine.low %v2871_v49, %v2880_v47  ;;  %v2902_v4 = vsel %vm8131_vm12, %v2894_v63, %v2901_v37  ;;  %v2916_v25 = vrot.slane %v10285_v42, 4  ;;  %7551 = vmatpush3.bf16.msra.mxu1 %v7942_v34  ;;  %v2893_v54 = vsel %vm8131_vm12, %v6669_v58, %v2892_v26  ;;  %v10291_v47 = vld [vmem:[#allocation74_spill] sm:$0xff]  ;;  %v10294_v34 = vld [vmem:[#allocation76_spill] sm:$0xff]  ;;  %v7968_v38 = vld [vmem:[#allocation2 + $0x74] sm:$0xf] }
 0x23b   : > { %v2914_v1 = vor.u32 %v10287_v28, %v10285_v42  ;;  %v6670_v14 = vrot.slane %v2904_v46, 11  ;;  %v10290_v43 = vshll.u32 %v10289_v35, 16  ;;  %v2926_v45 = vshrl.u32 %v2687_v30, 16  ;;  %7552 = vmatprep.subr.bf16.mxu1 %v7947_v33  ;;  %v10292_v63 = vld [vmem:[#allocation66_spill] sm:$0xff]  ;;  %v10300_v35 = vld [vmem:[#allocation84_spill] sm:$0xff] }
 0x23c   : > { %v9517_v39 = vcombine.low %v2893_v54, %v2902_v4  ;;  %v10293_v6 = vshll.u32 %v10292_v63, 16  ;;  %v2938_v7 = vrot.slane %v10291_v47, 4  ;;  %v10296_v37 = vshll.u32 %v10295_v5, 16  ;;  %v7952_v8 = vld [vmem:[%s9991_s3 + $0x118] sm:$0xff]   ;;  %v2693_v4 = vld [vmem:[#allocation2 + $0xd0] sm:$0x8]  ;;  %7521 = vmatmul.mubr.msk.bf16.gmra.mrb[4].mxu1 %vm1409_vm4, %v6880_v15 }
 0x23d   : > { %v2923_v53 = vor.u32 %v10290_v43, %v10288_v59  ;;  %v6882_v30 = vcombine.low %v7968_v38, %v9192_v61  ;;  %v2915_v49 = vsel %vm8131_vm12, %v6670_v14, %v2914_v1  ;;  %v6671_v46 = vrot.slane %v2926_v45, 11  ;;  %7524 = vmatprep.mubr.msk.bf16.mxu1 %vm1409_vm4, %v6881_v36  ;;  %v10297_v1 = vld [vmem:[#allocation82_spill] sm:$0xff]  ;;  %v10303_v63 = vld [vmem:[#allocation91_spill] sm:$0xff]  ;;  %v10304_v36 = vld [vmem:[#allocation77_spill] sm:$0xff] }
 0x23e   : > { %v2936_v11 = vor.u32 %v10293_v6, %v10291_v47  ;;  %v2945_v26 = vor.u32 %v10296_v37, %v10294_v34  ;;  %v6883_v42 = vcombine.low %v9198_v9, %v9202_v40  ;;  %v2948_v54 = vshrl.u32 %v2690_v12, 16  ;;  %7553 = vmatpush3.bf16.msra.mxu1 %v7947_v33  ;;  %v10301_v9 = vld [vmem:[#allocation72_spill] sm:$0xff]  ;;  %v10307_v5 = vld [vmem:[#allocation79_spill] sm:$0xff]  ;;  %7365 = vmatmul.mubr.msk.bf16.gmra.mrb[40].mxu0 %vm1409_vm4, %v9468_v50 }
 0x23f   : > { %v2924_v58 = vsel %vm8131_vm12, %v2916_v25, %v2923_v53  ;;  %v10298_v25 = vld [vmem:[#allocation71_spill] sm:$0xff]  ;;  %v2960_v15 = vrot.slane %v10297_v1, 4  ;;  %v10302_v40 = vshll.u32 %v10301_v9, 16  ;;  %v2970_v12 = vshrl.u32 %v2693_v4, 16  ;;  %7554 = vmatprep.subr.bf16.mxu1 %v7952_v8  ;;  %v10306_v34 = vld [vmem:[#allocation92_spill] sm:$0xff]  ;;  %7368 = vmatprep.mubr.msk.bf16.mxu0 %vm1409_vm4, %v9486_v3  ;;  %v10312_v9 = vld [vmem:[#allocation97_spill] sm:$0xff] }
 0x240   : > { %v9537_v32 = vcombine.low %v2915_v49, %v2924_v58  ;;  %v2946_v28 = vsel %vm8131_vm12, %v2938_v7, %v2945_v26  ;;  %v2937_v61 = vsel %vm8131_vm12, %v6671_v46, %v2936_v11  ;;  %v10299_v14 = vshll.u32 %v10298_v25, 16  ;;  %v2696_v53 = vld [vmem:[#allocation2 + $0xe0] sm:$0x8]  ;;  %v2699_v49 = vld [vmem:[#allocation2 + $0xf0] sm:$0x8]  ;;  %v10310_v25 = vld [vmem:[#allocation86_spill] sm:$0xff] }
 0x241   : > { %v2967_v43 = vor.u32 %v10302_v40, %v10300_v35  ;;  %v6695_v45 = vcombine.low %v2937_v61, %v2946_v28  ;;  %v6672_v47 = vrot.slane %v2948_v54, 11  ;;  %v10305_v6 = vshll.u32 %v10304_v36, 16  ;;  %v10313_v40 = vld [vmem:[#allocation88_spill] sm:$0xff]  ;;  %v10316_v36 = vld [vmem:[#allocation93_spill] sm:$0xff] }
 0x242   : > { %v2958_v59 = vor.u32 %v10299_v14, %v10297_v1  ;;  %v2982_v11 = vrot.slane %v10303_v63, 4  ;;  %v10308_v37 = vshll.u32 %v10307_v5, 16  ;;  %v6888_v38 = vcombine.low %v9291_v20, %v9296_v55  ;;  %v10309_v1 = vld [vmem:[#allocation96_spill] sm:$0xff]  ;;  %7555 = vmatpush3.bf16.msra.mxu1 %v7952_v8  ;;  %v10319_v5 = vld [vmem:[#allocation94_spill] sm:$0xff] }
 0x243   : > { %v2980_v7 = vor.u32 %v10305_v6, %v10303_v63  ;;  %v2968_v33 = vsel %vm8131_vm12, %v2960_v15, %v2967_v43  ;;  %v6673_v46 = vrot.slane %v2970_v12, 11  ;;  %v6889_v4 = vcombine.low %v9293_v13, %v9306_v17  ;;  %v10315_v63 = vld [vmem:[#allocation98_spill] sm:$0xff] }
 0x244   : > { %v2989_v26 = vor.u32 %v10308_v37, %v10306_v34  ;;  %v2959_v58 = vsel %vm8131_vm12, %v6672_v47, %v2958_v59  ;;  %v2992_v28 = vshrl.u32 %v2696_v53, 16  ;;  %v10311_v14 = vshll.u32 %v10310_v25, 16  ;;  %v2702_v47 = vld [vmem:[#allocation2 + $0x100] sm:$0x8]  ;;  %7525 = vmatmul.mubr.msk.bf16.gmra.mrb[8].mxu1 %vm1409_vm4, %v6882_v30  ;;  %v5574_v20 = vld [vmem:[#allocation2 + $0x58] sm:$0xf] }
 0x245   : > { %v6696_v54 = vcombine.low %v2959_v58, %v2968_v33  ;;  %v3004_v50 = vrot.slane %v10309_v1, 4  ;;  %v2981_v59 = vsel %vm8131_vm12, %v6673_v46, %v2980_v7  ;;  %v10314_v43 = vshll.u32 %v10313_v40, 16  ;;  %v10318_v34 = vld [vmem:[#allocation99_spill] sm:$0xff]  ;;  %7528 = vmatprep.mubr.msk.bf16.mxu1 %vm1409_vm4, %v6883_v42 }
 0x246   : > { %v2990_v61 = vsel %vm8131_vm12, %v2982_v11, %v2989_v26  ;;  %v3002_v15 = vor.u32 %v10311_v14, %v10309_v1  ;;  %v6674_v35 = vrot.slane %v2992_v28, 11  ;;  %v3014_v3 = vshrl.u32 %v2699_v49, 16  ;;  %7369 = vmatmul.mubr.msk.bf16.gmra.mrb[44].mxu0 %vm1409_vm4, %v9503_v29  ;;  %v5565_v29 = vld [vmem:[#allocation2 + $0x28] sm:$0xf] }
 0x247   : > { %v3011_v53 = vor.u32 %v10314_v43, %v10312_v9  ;;  %v6697_v12 = vcombine.low %v2981_v59, %v2990_v61  ;;  %v10317_v6 = vshll.u32 %v10316_v36, 16  ;;  %v3026_v11 = vrot.slane %v10315_v63, 4  ;;  %7372 = vmatprep.mubr.msk.bf16.mxu0 %vm1409_vm4, %v9517_v39  ;;  %v5564_v39 = vld [vmem:[#allocation2 + $0x24] sm:$0xf] }
 0x248   : > { %v10320_v8 = vshll.u32 %v10319_v5, 16  ;;  %v3003_v7 = vsel %vm8131_vm12, %v6674_v35, %v3002_v15  ;;  %v6675_v49 = vrot.slane %v3014_v3, 11  ;;  %v6890_v58 = vcombine.low %v9327_v10, %v9330_v19  ;;  %v5580_v10 = vld [vmem:[#allocation2 + $0x78] sm:$0xf] }
 0x249   : > { %v3024_v33 = vor.u32 %v10317_v6, %v10315_v63  ;;  %v3012_v26 = vsel %vm8131_vm12, %v3004_v50, %v3011_v53  ;;  %v6891_v30 = vcombine.low %v9338_v57, %v9342_v52  ;;  %v3036_v61 = vshrl.u32 %v2702_v47, 16  ;;  %v5567_v53 = vld [vmem:[#allocation2 + $0x34] sm:$0xf]  ;;  %v5568_v47 = vld [vmem:[#allocation2 + $0x38] sm:$0xf] }
 0x24a   : > { %v3033_v37 = vor.u32 %v10320_v8, %v10318_v34  ;;  %v9596_v46 = vcombine.low %v3003_v7, %v3012_v26  ;;  %v10321_v25 = vshll.u32 %v8743_v0, 16  ;;  %v3048_v15 = vrot.slane %v9428_v44, 4  ;;  %v5566_v63 = vld [vmem:[#allocation2 + $0x2c] sm:$0x1]  ;;  %v5571_v34 = vld [vmem:[#allocation2 + $0x48] sm:$0xf] }
 0x24b   : > { %v3025_v1 = vsel %vm8131_vm12, %v6675_v49, %v3024_v33  ;;  %v3055_v42 = vor.u32 %v3053_v24, %v9430_v31  ;;  %v6676_v59 = vrot.slane %v3036_v61, 11  ;;  %v6892_v35 = vcombine.low %v9360_v16, %v9367_v27  ;;  %v5569_v7 = vld [vmem:[#allocation2 + $0x3c] sm:$0x1] }
 0x24c   : > { %v3034_v28 = vsel %vm8131_vm12, %v3026_v11, %v3033_v37  ;;  %v3046_v14 = vor.u32 %v10321_v25, %v9428_v44  ;;  %v6884_v24 = vcombine.low %v7969_v18, %v9224_v22  ;;  %v6885_v31 = vcombine.low %v9230_v2, %v9233_v23  ;;  %v5570_v11 = vld [vmem:[#allocation2 + $0x44] sm:$0xf]  ;;  %v5573_v18 = vld [vmem:[#allocation2 + $0x54] sm:$0xf] }
 0x24d   : > { %v9611_v50 = vcombine.low %v3025_v1, %v3034_v28  ;;  %v3056_v9 = vsel %vm8131_vm12, %v3048_v15, %v3055_v42  ;;  %v5622_v62 = vshll.u32 %v5565_v29, 16  ;;  %v5626_v40 = vshrl.u32 %v5565_v29, 16 }
 0x24e   : > { %v3047_v0 = vsel %vm8131_vm12, %v6676_v59, %v3046_v14  ;;  %7529 = vmatmul.mubr.msk.bf16.gmra.mrb[12].mxu1 %vm1409_vm4, %v6884_v24  ;;  %7373 = vmatmul.mubr.msk.bf16.gmra.mrb[48].mxu0 %vm1409_vm4, %v9537_v32  ;;  %v6886_v22 = vcombine.low %v9255_v51, %v9258_v48  ;;  %v6887_v43 = vcombine.low %v9263_v21, %v9270_v56  ;;  %v5613_v2 = vshrl.u32 %v5564_v39, 16 }
 0x24f   : > { %v9624_v44 = vcombine.low %v3047_v0, %v3056_v9  ;;  %7532 = vmatprep.mubr.msk.bf16.mxu1 %vm1409_vm4, %v6885_v31  ;;  %7376 = vmatprep.mubr.msk.bf16.mxu0 %vm1409_vm4, %v6695_v45  ;;  %v5616_v23 = vshll.u32 %v5564_v39, 16  ;;  %v5624_v3 = vrot.slane %v5622_v62, 5  ;;  %v5628_v32 = vrot.slane %v5626_v40, 4  ;;  %v5577_v9 = vld [vmem:[#allocation2 + $0x68] sm:$0xf] }
 0x250   : > { %v5615_v45 = vrot.slane %v5613_v2, 4  ;;  %v5637_v6 = vshrl.u32 %v5567_v53, 16  ;;  %v5640_v33 = vshll.u32 %v5567_v53, 16  ;;  %v5646_v51 = vshll.u32 %v5568_v47, 16  ;;  %v5572_v0 = vld [vmem:[#allocation2 + $0x4c] sm:$0x1] }
 0x251   : > { %v5618_v36 = vrot.slane %v5616_v23, 5  ;;  %v5650_v48 = vshrl.u32 %v5568_v47, 16  ;;  %v5629_v21 = vor.u32 %v5628_v32, %v5624_v3  ;;  %v5632_v56 = vshll.u32 %v5566_v63, 16  ;;  %v5576_v39 = vld [vmem:[#allocation2 + $0x64] sm:$0xf] }
 0x252   : > { %v5639_v8 = vrot.slane %v5637_v6, 4  ;;  %v5642_v37 = vrot.slane %v5640_v33, 5  ;;  %v9645_v26 = vrot.slane %v5646_v51, 5  ;;  %v5661_v49 = vshrl.u32 %v5570_v11, 16  ;;  %v5579_v23 = vld [vmem:[#allocation2 + $0x74] sm:$0xf] }
 0x253   : > { %v5619_v5 = vor.u32 %v5618_v36, %v5615_v45  ;;  %v5664_v28 = vshll.u32 %v5570_v11, 16  ;;  %v5634_v61 = vrot.slane %v5632_v56, 5  ;;  %v5670_v1 = vshll.u32 %v5571_v34, 16  ;;  %v5575_v36 = vld [vmem:[#allocation2 + $0x5c] sm:$0x1] }
 0x254   : > { %v5674_v25 = vshrl.u32 %v5571_v34, 16  ;;  %v5656_v15 = vshll.u32 %v5569_v7, 16  ;;  %v5643_v55 = vor.u32 %v5642_v37, %v5639_v8  ;;  %v5663_v42 = vrot.slane %v5661_v49, 4  ;;  %v5582_v37 = vld [vmem:[#allocation2 + $0x84] sm:$0xf] }
 0x255   : > { %v5620_v14 = vrot.slane %v5619_v5, 4  ;;  %v5666_v59 = vrot.slane %v5664_v28, 5  ;;  %v9658_v17 = vrot.slane %v5670_v1, 5  ;;  %v5694_v24 = vshll.u32 %v5574_v20, 16 }
 0x256   : > { %7533 = vmatmul.mubr.msk.bf16.gmra.mrb[16].mxu1 %vm1409_vm4, %v6886_v22  ;;  %7377 = vmatmul.mubr.msk.bf16.gmra.mrb[52].mxu0 %vm1409_vm4, %v6696_v54  ;;  %v5652_v54 = vrot.slane %v5650_v48, 4  ;;  %v5698_v31 = vshrl.u32 %v5574_v20, 16  ;;  %v9662_v29 = vrot.slane %v5656_v15, 5  ;;  %v5718_v62 = vshll.u32 %v5577_v9, 16 }
 0x257   : > { %7536 = vmatprep.mubr.msk.bf16.mxu1 %vm1409_vm4, %v6887_v43  ;;  %7380 = vmatprep.mubr.msk.bf16.mxu0 %vm1409_vm4, %v6697_v12  ;;  %v5630_v12 = vrot.slane %v5629_v21, 4  ;;  %v5722_v40 = vshrl.u32 %v5577_v9, 16  ;;  %v9668_v22 = vrot.slane %v5643_v55, 4  ;;  %v5667_v2 = vor.u32 %v5666_v59, %v5663_v42 }
 0x258   : > { %v5685_v32 = vshrl.u32 %v5573_v18, 16  ;;  %v5688_v47 = vshll.u32 %v5573_v18, 16  ;;  %v9677_v19 = vrot.slane %v5694_v24, 5  ;;  %v5709_v63 = vshrl.u32 %v5576_v39, 16 }
 0x259   : > { %v5635_v13 = vsel %vm8794_vm15, %v5630_v12, %v5634_v61  ;;  %v5712_v45 = vshll.u32 %v5576_v39, 16  ;;  %v9679_v6 = vrot.slane %v5718_v62, 5  ;;  %v5724_v33 = vrot.slane %v5722_v40, 4 }
 0x25a   : > { %v5733_v51 = vshrl.u32 %v5579_v23, 16  ;;  %v5736_v48 = vshll.u32 %v5579_v23, 16  ;;  %v5649_v57 = vsel %vm8794_vm15, %v9668_v22, %v9645_v26  ;;  %v5668_v52 = vrot.slane %v5667_v2, 4 }
 0x25b   : > { %v5742_v21 = vshll.u32 %v5580_v10, 16  ;;  %v5746_v56 = vshrl.u32 %v5580_v10, 16  ;;  %v5687_v5 = vrot.slane %v5685_v32, 4  ;;  %v5690_v8 = vrot.slane %v5688_v47, 5 }
 0x25c   : > { %v5711_v49 = vrot.slane %v5709_v63, 4  ;;  %v5714_v28 = vrot.slane %v5712_v45, 5  ;;  %v5725_v12 = vor.u32 %v5724_v33, %v9679_v6  ;;  %v5735_v1 = vrot.slane %v5733_v51, 4  ;;  %v5588_v45 = vld [vmem:[#allocation2 + $0xa4] sm:$0xf] }
 0x25d   : > { %v5748_v15 = vrot.slane %v5746_v56, 4  ;;  %v5757_v20 = vshrl.u32 %v5582_v37, 16  ;;  %v5760_v55 = vshll.u32 %v5582_v37, 16  ;;  %v5673_v42 = vsel %vm8794_vm15, %v5668_v52, %v9658_v17 }
 0x25e   : > { %7537 = vmatmul.mubr.msk.bf16.gmra.mrb[20].mxu1 %vm1409_vm4, %v6888_v38  ;;  %7381 = vmatmul.mubr.msk.bf16.gmra.mrb[56].mxu0 %vm1409_vm4, %v9596_v46  ;;  %v5653_v38 = vor.u32 %v5652_v54, %v9645_v26  ;;  %v5625_v46 = vsel %vm8794_vm15, %v5620_v14, %v5624_v3  ;;  %v5680_v3 = vshll.u32 %v5572_v0, 16  ;;  %v5704_v54 = vshll.u32 %v5575_v36, 16 }
 0x25f   : > { %7540 = vmatprep.mubr.msk.bf16.mxu1 %vm1409_vm4, %v6889_v4  ;;  %7384 = vmatprep.mubr.msk.bf16.mxu0 %vm1409_vm4, %v9611_v50  ;;  %v5676_v4 = vrot.slane %v5674_v25, 4  ;;  %v6921_v50 = vcombine.low %v5625_v46, %v5635_v13  ;;  %v5738_v26 = vrot.slane %v5736_v48, 5  ;;  %v5581_v25 = vld [vmem:[#allocation2 + $0x7c] sm:$0x1]  ;;  %v9693_v14 = vrot.slane %v5742_v21, 5 }
 0x260   : > { %v9670_v43 = vrot.slane %v5653_v38, 4  ;;  %v5682_v34 = vrot.slane %v5680_v3, 5  ;;  %v5691_v59 = vor.u32 %v5690_v8, %v5687_v5  ;;  %v5706_v9 = vrot.slane %v5704_v54, 5  ;;  %v5586_v46 = vld [vmem:[#allocation2 + $0x98] sm:$0xf] }
 0x261   : > { %v5677_v53 = vor.u32 %v5676_v4, %v9658_v17  ;;  %v5715_v13 = vor.u32 %v5714_v28, %v5711_v49  ;;  %v5585_v4 = vld [vmem:[#allocation2 + $0x94] sm:$0xf]  ;;  %v5726_v18 = vrot.slane %v5725_v12, 4  ;;  %v5739_v39 = vor.u32 %v5738_v26, %v5735_v1  ;;  %v5584_v17 = vld [vmem:[#allocation2 + $0x8c] sm:$0x1] }
 0x262   : > { %v5659_v38 = vsel %vm8794_vm15, %v9670_v43, %v9662_v29  ;;  %v5749_v29 = vor.u32 %v5748_v15, %v9693_v14  ;;  %v5759_v62 = vrot.slane %v5757_v20, 4  ;;  %v5762_v40 = vrot.slane %v5760_v55, 5  ;;  %v5591_v26 = vld [vmem:[#allocation2 + $0xb4] sm:$0xf] }
 0x263   : > { %v5678_v11 = vrot.slane %v5677_v53, 4  ;;  %v5781_v43 = vshrl.u32 %v5585_v4, 16  ;;  %v5784_v2 = vshll.u32 %v5585_v4, 16  ;;  %v6922_v23 = vcombine.low %v5649_v57, %v5659_v38  ;;  %v5589_v57 = vld [vmem:[#allocation2 + $0xa8] sm:$0xf] }
 0x264   : > { %v5790_v3 = vshll.u32 %v5586_v46, 16  ;;  %v5794_v32 = vshrl.u32 %v5586_v46, 16  ;;  %v5692_v47 = vrot.slane %v5691_v59, 4  ;;  %v9713_v36 = vrot.slane %v5739_v39, 4  ;;  %v5592_v38 = vld [vmem:[#allocation2 + $0xb8] sm:$0xf] }
 0x265   : > { %v9715_v33 = vrot.slane %v5749_v29, 4  ;;  %v5776_v48 = vshll.u32 %v5584_v17, 16  ;;  %v5763_v52 = vor.u32 %v5762_v40, %v5759_v62  ;;  %v5783_v21 = vrot.slane %v5781_v43, 4  ;;  %v5595_v4 = vld [vmem:[#allocation2 + $0xc8] sm:$0xf] }
 0x266   : > { %7541 = vmatmul.mubr.msk.bf16.gmra.mrb[24].mxu1 %vm1409_vm4, %v6890_v58  ;;  %v5700_v58 = vrot.slane %v5698_v31, 4  ;;  %7385 = vmatmul.mubr.msk.bf16.gmra.mrb[60].mxu0 %vm1409_vm4, %v9624_v44  ;;  %v5583_v44 = vld [vmem:[#allocation2 + $0x88] sm:$0xf]  ;;  %v5752_v31 = vshll.u32 %v5581_v25, 16  ;;  %v5786_v56 = vrot.slane %v5784_v2, 5  ;;  %v5796_v5 = vrot.slane %v5794_v32, 4 }
 0x267   : > { %7544 = vmatprep.mubr.msk.bf16.mxu1 %vm1409_vm4, %v6891_v30  ;;  %v5578_v30 = vld [vmem:[#allocation2 + $0x6c] sm:$0x1]  ;;  %v5766_v16 = vshll.u32 %v5583_v44, 16  ;;  %v5770_v27 = vshrl.u32 %v5583_v44, 16  ;;  %v5805_v8 = vshrl.u32 %v5588_v45, 16  ;;  %v5808_v37 = vshll.u32 %v5588_v45, 16 }
 0x268   : > { %v5701_v7 = vor.u32 %v5700_v58, %v9677_v19  ;;  %v5728_v61 = vshll.u32 %v5578_v30, 16  ;;  %v5716_v58 = vrot.slane %v5715_v13, 4  ;;  %v5754_v51 = vrot.slane %v5752_v31, 5  ;;  %v5594_v25 = vld [vmem:[#allocation2 + $0xc4] sm:$0xf] }
 0x269   : > { %v5772_v22 = vrot.slane %v5770_v27, 4  ;;  %v5814_v49 = vshll.u32 %v5589_v57, 16  ;;  %v5818_v28 = vshrl.u32 %v5589_v57, 16  ;;  %v5778_v1 = vrot.slane %v5776_v48, 5  ;;  %v5593_v32 = vld [vmem:[#allocation2 + $0xbc] sm:$0x1] }
 0x26a   : > { %v5702_v0 = vrot.slane %v5701_v7, 4  ;;  %v5730_v24 = vrot.slane %v5728_v61, 5  ;;  %v5697_v7 = vsel %vm8794_vm15, %v5692_v47, %v9677_v19  ;;  %v5721_v54 = vsel %vm8794_vm15, %v5716_v58, %v9679_v6 }
 0x26b   : > { %v5745_v61 = vsel %vm8794_vm15, %v9713_v36, %v9693_v14  ;;  %v5764_v15 = vrot.slane %v5763_v52, 4  ;;  %v5787_v55 = vor.u32 %v5786_v56, %v5783_v21  ;;  %v5755_v6 = vsel %vm8794_vm15, %v9715_v33, %v5754_v51  ;;  %v5596_v36 = vld [vmem:[#allocation2 + $0xcc] sm:$0x1]  ;;  %v5597_v33 = vld [vmem:[#allocation2 + $0xd4] sm:$0xf] }
 0x26c   : > { %v5707_v10 = vsel %vm8794_vm15, %v5702_v0, %v5706_v9  ;;  %v5731_v63 = vsel %vm8794_vm15, %v5726_v18, %v5730_v24  ;;  %v5807_v27 = vrot.slane %v5805_v8, 4  ;;  %v9735_v59 = vrot.slane %v5814_v49, 5  ;;  %v5598_v51 = vld [vmem:[#allocation2 + $0xd8] sm:$0xf]  ;;  %v623_v21 = vld [vmem:[#allocation2 + $0x11c] sm:$0x1] }
 0x26d   : > { %v6924_v44 = vcombine.low %v5697_v7, %v5707_v10  ;;  %v6925_v12 = vcombine.low %v5721_v54, %v5731_v63  ;;  %v5820_v14 = vrot.slane %v5818_v28, 4  ;;  %v5829_v9 = vshrl.u32 %v5591_v26, 16 }
 0x26e   : > { %7545 = vmatmul.mubr.msk.bf16.gmra.mrb[28].mxu1 %vm1409_vm4, %v6892_v35  ;;  %v5683_v35 = vsel %vm8794_vm15, %v5678_v11, %v5682_v34  ;;  %v5587_v11 = vld [vmem:[#allocation2 + $0x9c] sm:$0x1]  ;;  %v9719_v34 = vrot.slane %v5790_v3, 5  ;;  %v5832_v13 = vshll.u32 %v5591_v26, 16  ;;  %v5838_v0 = vshll.u32 %v5592_v38, 16 }
 0x26f   : > { %7556 = vmatprep.mubr.msk.bf16.mxu1 %vm1409_vm4, %v6921_v50  ;;  %v9706_v50 = vrot.slane %v5766_v16, 5  ;;  %v6923_v53 = vcombine.low %v5673_v42, %v5683_v35  ;;  %v5800_v19 = vshll.u32 %v5587_v11, 16  ;;  %v5590_v16 = vld [vmem:[#allocation2 + $0xac] sm:$0x1]  ;;  %v5810_v35 = vrot.slane %v5808_v37, 5 }
 0x270   : > { %v5797_v42 = vor.u32 %v5796_v5, %v9719_v34  ;;  %v5842_v18 = vshrl.u32 %v5592_v38, 16  ;;  %v5853_v24 = vshrl.u32 %v5594_v25, 16  ;;  %v5856_v31 = vshll.u32 %v5594_v25, 16  ;;  %v5600_v38 = vld [vmem:[#allocation2 + $0xe4] sm:$0xf] }
 0x271   : > { %v5773_v30 = vor.u32 %v5772_v22, %v9706_v50  ;;  %v5769_v46 = vsel %vm8794_vm15, %v5764_v15, %v9706_v50  ;;  %v5788_v29 = vrot.slane %v5787_v55, 4  ;;  %v5802_v62 = vrot.slane %v5800_v19, 5 }
 0x272   : > { %v5798_v40 = vrot.slane %v5797_v42, 4  ;;  %v5824_v17 = vshll.u32 %v5590_v16, 16  ;;  %v5862_v22 = vshll.u32 %v5595_v4, 16  ;;  %v5866_v43 = vshrl.u32 %v5595_v4, 16  ;;  %v5599_v4 = vld [vmem:[#allocation2 + $0xdc] sm:$0x1] }
 0x273   : > { %v5774_v20 = vrot.slane %v5773_v30, 4  ;;  %v5811_v2 = vor.u32 %v5810_v35, %v5807_v27  ;;  %v5834_v3 = vrot.slane %v5832_v13, 5  ;;  %v9745_v47 = vrot.slane %v5838_v0, 5 }
 0x274   : > { %v5844_v10 = vrot.slane %v5842_v18, 4  ;;  %v5855_v58 = vrot.slane %v5853_v24, 4  ;;  %v5858_v50 = vrot.slane %v5856_v31, 5  ;;  %v6926_v63 = vcombine.low %v5745_v61, %v5755_v6  ;;  %v5601_v61 = vld [vmem:[#allocation2 + $0xe8] sm:$0xf] }
 0x275   : > { %v5779_v39 = vsel %vm8794_vm15, %v5774_v20, %v5778_v1  ;;  %v5803_v48 = vsel %vm8794_vm15, %v5798_v40, %v5802_v62  ;;  %v5826_v57 = vrot.slane %v5824_v17, 5  ;;  %v9749_v52 = vrot.slane %v5862_v22, 5  ;;  %v5602_v31 = vld [vmem:[#allocation2 + $0xec] sm:$0x1]  ;;  %v5603_v62 = vld [vmem:[#allocation2 + $0xf4] sm:$0xf] }
 0x276   : > { %7557 = vmatmul.mubr.msk.bf16.vlgmr.msra.gmra.mrb[0].mxu1 %vm1409_vm4, %v6922_v23  ;;  %v5821_v23 = vor.u32 %v5820_v14, %v9735_v59  ;;  %v6927_v45 = vcombine.low %v5769_v46, %v5779_v39  ;;  %v5868_v30 = vrot.slane %v5866_v43, 4  ;;  %v5812_v56 = vrot.slane %v5811_v2, 4  ;;  %v5604_v40 = vld [vmem:[#allocation2 + $0xf8] sm:$0xf] }
 0x277   : > { %7560 = vmatprep.mubr.msk.bf16.mxu1 %vm1409_vm4, %v6923_v53  ;;  %v5831_v53 = vrot.slane %v5829_v9, 4  ;;  %v5848_v8 = vshll.u32 %v5593_v32, 16  ;;  %v5793_v37 = vsel %vm8794_vm15, %v5788_v29, %v9719_v34  ;;  %v5845_v7 = vor.u32 %v5844_v10, %v9745_v47 }
 0x278   : > { %v5822_v11 = vrot.slane %v5821_v23, 4  ;;  %v5859_v54 = vor.u32 %v5858_v50, %v5855_v58  ;;  %v5872_v49 = vshll.u32 %v5596_v36, 16  ;;  %v5877_v28 = vshrl.u32 %v5597_v33, 16  ;;  %v5607_v23 = vld [vmem:[#allocation2 + $0x108] sm:$0xf] }
 0x279   : > { %v5835_v5 = vor.u32 %v5834_v3, %v5831_v53  ;;  %v624_v1 = vsel %vm8102_vm7, 0, %v623_v21  ;;  %v6928_v26 = vcombine.low %v5793_v37, %v5803_v48  ;;  %v5869_v25 = vor.u32 %v5868_v30, %v9749_v52 }
 0x27a   : > { %v5890_v15 = vshrl.u32 %v5598_v51, 16  ;;  %625 = vst [vmem:[#allocation2 + $0x11c] sm:$0x1] %v624_v1  ;;  %v5817_v34 = vsel %vm8794_vm15, %v5812_v56, %v9735_v59  ;;  %v5827_v20 = vsel %vm8794_vm15, %v5822_v11, %v5826_v57  ;;  %v5850_v19 = vrot.slane %v5848_v8, 5  ;;  %v5609_v56 = vld [vmem:[#allocation2 + $0x114] sm:$0xf] }
 0x27b   : > { %v5836_v55 = vrot.slane %v5835_v5, 4  ;;  %v5846_v6 = vrot.slane %v5845_v7, 4  ;;  %v5860_v42 = vrot.slane %v5859_v54, 4  ;;  %v5910_v16 = vshll.u32 %v5601_v61, 16  ;;  %v5610_v7 = vld [vmem:[#allocation2 + $0x118] sm:$0xf] }
 0x27c   : > { %v5914_v60 = vshrl.u32 %v5601_v61, 16  ;;  %v5874_v27 = vrot.slane %v5872_v49, 5  ;;  %v5879_v35 = vrot.slane %v5877_v28, 4  ;;  %v5870_v13 = vrot.slane %v5869_v25, 4  ;;  %v5605_v61 = vld [vmem:[#allocation2 + $0xfc] sm:$0x1] }
 0x27d   : > { %v5892_v0 = vrot.slane %v5890_v15, 4  ;;  %v5901_v18 = vshrl.u32 %v5600_v38, 16  ;;  %v5904_v59 = vshll.u32 %v5600_v38, 16  ;;  %v6929_v24 = vcombine.low %v5817_v34, %v5827_v20  ;;  %v5608_v15 = vld [vmem:[#allocation2 + $0x10c] sm:$0x1] }
 0x27e   : > { %7561 = vmatmul.mubr.msk.bf16.gmra.mrb[4].mxu1 %vm1409_vm4, %v6924_v44  ;;  %v5880_v44 = vshll.u32 %v5597_v33, 16  ;;  %v5841_v46 = vsel %vm8794_vm15, %v5836_v55, %v9745_v47  ;;  %v9771_v39 = vrot.slane %v5910_v16, 5  ;;  %v5916_v29 = vrot.slane %v5914_v60, 4 }
 0x27f   : > { %7564 = vmatprep.mubr.msk.bf16.mxu1 %vm1409_vm4, %v6925_v12  ;;  %v5886_v12 = vshll.u32 %v5598_v51, 16  ;;  %v5851_v17 = vsel %vm8794_vm15, %v5846_v6, %v5850_v19  ;;  %v5865_v22 = vsel %vm8794_vm15, %v5860_v42, %v9749_v52  ;;  %v5896_v2 = vshll.u32 %v5599_v4, 16 }
 0x280   : > { %v5882_v14 = vrot.slane %v5880_v44, 5  ;;  %v5875_v53 = vsel %vm8794_vm15, %v5870_v13, %v5874_v27  ;;  %v5903_v32 = vrot.slane %v5901_v18, 4  ;;  %v5906_v47 = vrot.slane %v5904_v59, 5 }
 0x281   : > { %v9765_v9 = vrot.slane %v5886_v12, 5  ;;  %v5920_v10 = vshll.u32 %v5602_v31, 16  ;;  %v5925_v58 = vshrl.u32 %v5603_v62, 16  ;;  %v5934_v50 = vshll.u32 %v5604_v40, 16 }
 0x282   : > { %v5883_v43 = vor.u32 %v5882_v14, %v5879_v35  ;;  %v5917_v36 = vor.u32 %v5916_v29, %v9771_v39  ;;  %v5928_v33 = vshll.u32 %v5603_v62, 16  ;;  %v5958_v51 = vshll.u32 %v5607_v23, 16  ;;  %v5611_v62 = vld [vmem:[#allocation2 + $0x11c] sm:$0x1] }
 0x283   : > { %v5893_v3 = vor.u32 %v5892_v0, %v9765_v9  ;;  %v5962_v48 = vshrl.u32 %v5607_v23, 16  ;;  %v6930_v57 = vcombine.low %v5841_v46, %v5851_v17  ;;  %v6931_v52 = vcombine.low %v5865_v22, %v5875_v53 }
 0x284   : > { %v5884_v30 = vrot.slane %v5883_v43, 4  ;;  %v5898_v21 = vrot.slane %v5896_v2, 5  ;;  %v5907_v5 = vor.u32 %v5906_v47, %v5903_v32  ;;  %v5922_v54 = vrot.slane %v5920_v10, 5 }
 0x285   : > { %v5894_v11 = vrot.slane %v5893_v3, 4  ;;  %v5927_v49 = vrot.slane %v5925_v58, 4  ;;  %v5936_v28 = vrot.slane %v5934_v50, 5  ;;  %v5918_v12 = vrot.slane %v5917_v36, 4 }
 0x286   : > { %7565 = vmatmul.mubr.msk.bf16.gmra.mrb[8].mxu1 %vm1409_vm4, %v6926_v63  ;;  %v5938_v63 = vshrl.u32 %v5604_v40, 16  ;;  %v5930_v1 = vrot.slane %v5928_v33, 5  ;;  %v5964_v25 = vrot.slane %v5962_v48, 4  ;;  %v5973_v34 = vshrl.u32 %v5609_v56, 16 }
 0x287   : > { %7568 = vmatprep.mubr.msk.bf16.mxu1 %vm1409_vm4, %v6927_v45  ;;  %v5606_v45 = vld [vmem:[#allocation2 + $0x104] sm:$0xf]  ;;  %v5976_v20 = vshll.u32 %v5609_v56, 16  ;;  %v5982_v55 = vshll.u32 %v5610_v7, 16  ;;  %v5986_v19 = vshrl.u32 %v5610_v7, 16  ;;  %v5908_v38 = vrot.slane %v5907_v5, 4 }
 0x288   : > { %v5949_v8 = vshrl.u32 %v5606_v45, 16  ;;  %v5952_v37 = vshll.u32 %v5606_v45, 16  ;;  %v5940_v44 = vrot.slane %v5938_v63, 4  ;;  %v5889_v16 = vsel %vm8794_vm15, %v5884_v30, %v9765_v9 }
 0x289   : > { %v5899_v60 = vsel %vm8794_vm15, %v5894_v11, %v5898_v21  ;;  %v5944_v35 = vshll.u32 %v5605_v61, 16  ;;  %v5923_v14 = vsel %vm8794_vm15, %v5918_v12, %v5922_v54  ;;  %v5931_v13 = vor.u32 %v5930_v1, %v5927_v49 }
 0x28a   : > { %v5951_v6 = vrot.slane %v5949_v8, 4  ;;  %v5954_v42 = vrot.slane %v5952_v37, 5  ;;  %v5941_v27 = vor.u32 %v5940_v44, %v5936_v28  ;;  %v5968_v0 = vshll.u32 %v5608_v15, 16 }
 0x28b   : > { %v5975_v18 = vrot.slane %v5973_v34, 4  ;;  %v5978_v59 = vrot.slane %v5976_v20, 5  ;;  %v5988_v31 = vrot.slane %v5986_v19, 4  ;;  %v6932_v46 = vcombine.low %v5889_v16, %v5899_v60 }
 0x28c   : > { %v5913_v9 = vsel %vm8794_vm15, %v5908_v38, %v9771_v39  ;;  %v5955_v29 = vor.u32 %v5954_v42, %v5951_v6  ;;  %v5942_v17 = vrot.slane %v5941_v27, 4  ;;  %v5946_v22 = vrot.slane %v5944_v35, 5 }
 0x28d   : > { %v6933_v40 = vcombine.low %v5913_v9, %v5923_v14  ;;  %v5970_v2 = vrot.slane %v5968_v0, 5  ;;  %v5932_v23 = vrot.slane %v5931_v13, 4  ;;  %v5979_v53 = vor.u32 %v5978_v59, %v5975_v18  ;;  %v9860_v0 = vld [vmem:[%s9992_s4] ss:$0 sm:$0xff] }
 0x28e   : > { %7569 = vmatmul.mubr.msk.bf16.gmra.mrb[12].mxu1 %vm1409_vm4, %v6928_v26  ;;  %v5960_v26 = vrot.slane %v5958_v51, 5  ;;  %v5992_v32 = vshll.u32 %v5611_v62, 16  ;;  %v5956_v47 = vrot.slane %v5955_v29, 4  ;;  %v5947_v10 = vsel %vm8794_vm15, %v5942_v17, %v5946_v22 }
 0x28f   : > { %7572 = vmatprep.mubr.msk.bf16.mxu1 %vm1409_vm4, %v6929_v24  ;;  %v5984_v24 = vrot.slane %v5982_v55, 5  ;;  %v5937_v58 = vsel %vm8794_vm15, %v5932_v23, %v5936_v28  ;;  %v5980_v50 = vrot.slane %v5979_v53, 4 }
 0x290   : > { %v5965_v4 = vor.u32 %v5964_v25, %v5960_v26  ;;  %v5994_v45 = vrot.slane %v5992_v32, 5  ;;  %v6934_v36 = vcombine.low %v5937_v58, %v5947_v10  ;;  %v5961_v33 = vsel %vm8794_vm15, %v5956_v47, %v5960_v26 }
 0x291   : > { %v5989_v3 = vor.u32 %v5988_v31, %v5984_v24  ;;  %v5985_v48 = vsel %vm8794_vm15, %v5980_v50, %v5984_v24 }
 0x292   : > { %v5966_v43 = vrot.slane %v5965_v4, 4 }
 0x293   : > { %v5990_v63 = vrot.slane %v5989_v3, 4 }
 0x294   : > { %v5971_v39 = vsel %vm8794_vm15, %v5966_v43, %v5970_v2 }
 0x295   : > { %v6935_v51 = vcombine.low %v5961_v33, %v5971_v39 }
 0x296   : > { %7573 = vmatmul.mubr.msk.bf16.gmra.mrb[16].mxu1 %vm1409_vm4, %v6930_v57  ;;  %v5995_v57 = vsel %vm8794_vm15, %v5990_v63, %v5994_v45 }
 0x297   : > { %7576 = vmatprep.mubr.msk.bf16.mxu1 %vm1409_vm4, %v6931_v52  ;;  %v6936_v52 = vcombine.low %v5985_v48, %v5995_v57 }
 0x29e   : > { %7577 = vmatmul.mubr.msk.bf16.gmra.mrb[20].mxu1 %vm1409_vm4, %v6932_v46 }
 0x29f   : > { %7580 = vmatprep.mubr.msk.bf16.mxu1 %vm1409_vm4, %v6933_v40 }
 0x2a6   : > { %7581 = vmatmul.mubr.msk.bf16.gmra.mrb[24].mxu1 %vm1409_vm4, %v6934_v36 }
 0x2a7   : > { %7584 = vmatprep.mubr.msk.bf16.mxu1 %vm1409_vm4, %v6935_v51 }
 0x2ae   : > { %7585 = vmatmul.mubr.msk.bf16.gmra.mrb[28].mxu1 %vm1409_vm4, %v6936_v52 }
 0x301   : > { %v7358_v30 = vpop.f32.mrb[32].mxu0 }
 0x302   : > { %v3220_v21 = vpop.f32.mrb[33].mxu0 }
 0x303   : > { %v7359_v56 = vpop.f32.mrb[34].mxu0 }
 0x304   : > { %v3223_v11 = vpop.f32.mrb[35].mxu0 }
 0x309   : > { %v7362_v5 = vpop.f32.mrb[36].mxu0 }
 0x30a   : > { %v3236_v8 = vpop.f32.mrb[37].mxu0 }
 0x30b   : > { %v7363_v37 = vpop.f32.mrb[38].mxu0 }
 0x30c   : > { %v3239_v7 = vpop.f32.mrb[39].mxu0 }
 0x311   : > { %v7366_v54 = vpop.f32.mrb[40].mxu0 }
 0x312   : > { %v3252_v49 = vpop.f32.mrb[41].mxu0 }
 0x313   : > { %v9812_v28 = vpop.f32.mrb[42].mxu0 }
 0x314   : > { %v9814_v44 = vpop.f32.mrb[43].mxu0 }
 0x319   : > { %v9816_v12 = vpop.f32.mrb[44].mxu0 }
 0x31a   : > { %v9818_v41 = vpop.f32.mrb[45].mxu0 }
 0x31b   : > { %v9820_v61 = vpop.f32.mrb[46].mxu0 }
 0x31c   : > { %v9822_v1 = vpop.f32.mrb[47].mxu0 }
 0x321   : > { %v9824_v26 = vpop.f32.mrb[48].mxu0 }
 0x322   : > { %v9826_v25 = vpop.f32.mrb[49].mxu0 }
 0x323   : > { %v9828_v15 = vpop.f32.mrb[50].mxu0 }
 0x324   : > { %v9830_v34 = vpop.f32.mrb[51].mxu0 }
 0x329   : > { %v9832_v20 = vpop.f32.mrb[52].mxu0 }
 0x32a   : > { %v9834_v55 = vpop.f32.mrb[53].mxu0 }
 0x32b   : > { %v9836_v19 = vpop.f32.mrb[54].mxu0 }
 0x32c   : > { %v9838_v38 = vpop.f32.mrb[55].mxu0 }
 0x331   : > { %v9840_v6 = vpop.f32.mrb[56].mxu0 }
 0x332   : > { %v9842_v42 = vpop.f32.mrb[57].mxu0 }
 0x333   : > { %v9844_v16 = vpop.f32.mrb[58].mxu0 }
 0x334   : > { %v9846_v60 = vpop.f32.mrb[59].mxu0 }
 0x339   : > { %v9848_v27 = vpop.f32.mrb[60].mxu0 }
 0x33a   : > { %v9850_v35 = vpop.f32.mrb[61].mxu0 }
 0x33b   : > { %v9852_v14 = vpop.f32.mrb[62].mxu0 }
 0x33c   : > { %v9854_v13 = vpop.f32.mrb[63].mxu0 }
 0x349   : > { %v7558_v4 = vpop.f32.mrb[0].mxu1 }
 0x34a   : > { %v7588_v18 = vadd.f32 %v7558_v4, %v7358_v30  ;;  %v6159_v59 = vpop.f32.mrb[1].mxu1 }
 0x34b   : > { %v7589_v24 = vadd.f32 %v6159_v59, %v3220_v21  ;;  %v7559_v31 = vpop.f32.mrb[2].mxu1 }
 0x34c   : > { %v6327_v46 = vadd.f32 %v7588_v18, %v9860_v0  ;;  %v7590_v9 = vadd.f32 %v7559_v31, %v7359_v56  ;;  %v6162_v29 = vpop.f32.mrb[3].mxu1 }
 0x34d   : > { %v6325_v62 = vadd.f32 %v7589_v24, %v9860_v0  ;;  %v7591_v40 = vadd.f32 %v6162_v29, %v3223_v11 }
 0x34e   : > { %6360 = vst.msk [vmem:[%s9865_s15 + $0x10] sm:$0xff] %vm6357_vm0, %v6327_v46  ;;  %v6328_v17 = vadd.f32 %v7590_v9, %v9860_v0 }
 0x34f   : > { %6358 = vst.msk [vmem:[%s9865_s15] sm:$0xff] %vm6357_vm0, %v6325_v62  ;;  %v6326_v22 = vadd.f32 %v7591_v40, %v9860_v0 }
 0x350   : > { %6361 = vst.msk [vmem:[%s9865_s15 + $0x18] sm:$0xff] %vm6357_vm0, %v6328_v17 }
 0x351   : > { %6359 = vst.msk [vmem:[%s9865_s15 + $0x8] sm:$0xff] %vm6357_vm0, %v6326_v22  ;;  %v7562_v43 = vpop.f32.mrb[4].mxu1 }
 0x352   : > { %v7592_v2 = vadd.f32 %v7562_v43, %v7362_v5  ;;  %v6175_v23 = vpop.f32.mrb[5].mxu1 }
 0x353   : > { %v7593_v53 = vadd.f32 %v6175_v23, %v3236_v8  ;;  %v7563_v3 = vpop.f32.mrb[6].mxu1 }
 0x354   : > { %v6331_v32 = vadd.f32 %v7592_v2, %v9860_v0  ;;  %v7594_v47 = vadd.f32 %v7563_v3, %v7363_v37  ;;  %v6178_v10 = vpop.f32.mrb[7].mxu1 }
 0x355   : > { %v6329_v39 = vadd.f32 %v7593_v53, %v9860_v0  ;;  %v7595_v58 = vadd.f32 %v6178_v10, %v3239_v7 }
 0x356   : > { %6364 = vst.msk [vmem:[%s9865_s15 + $0x30] sm:$0xff] %vm6357_vm0, %v6331_v32  ;;  %v6332_v50 = vadd.f32 %v7594_v47, %v9860_v0 }
 0x357   : > { %6362 = vst.msk [vmem:[%s9865_s15 + $0x20] sm:$0xff] %vm6357_vm0, %v6329_v39  ;;  %v6330_v63 = vadd.f32 %v7595_v58, %v9860_v0 }
 0x358   : > { %6365 = vst.msk [vmem:[%s9865_s15 + $0x38] sm:$0xff] %vm6357_vm0, %v6332_v50 }
 0x359   : > { %6363 = vst.msk [vmem:[%s9865_s15 + $0x28] sm:$0xff] %vm6357_vm0, %v6330_v63  ;;  %v7566_v45 = vpop.f32.mrb[8].mxu1 }
 0x35a   : > { %v7596_v36 = vadd.f32 %v7566_v45, %v7366_v54  ;;  %v6191_v33 = vpop.f32.mrb[9].mxu1 }
 0x35b   : > { %v7597_v51 = vadd.f32 %v6191_v33, %v3252_v49  ;;  %v7567_v48 = vpop.f32.mrb[10].mxu1 }
 0x35c   : > { %v6335_v57 = vadd.f32 %v7596_v36, %v9860_v0  ;;  %v7598_v52 = vadd.f32 %v7567_v48, %v9812_v28  ;;  %v6194_v30 = vpop.f32.mrb[11].mxu1 }
 0x35d   : > { %v6333_v21 = vadd.f32 %v7597_v51, %v9860_v0  ;;  %v7599_v56 = vadd.f32 %v6194_v30, %v9814_v44 }
 0x35e   : > { %6368 = vst.msk [vmem:[%s9865_s15 + $0x50] sm:$0xff] %vm6357_vm0, %v6335_v57  ;;  %v6336_v11 = vadd.f32 %v7598_v52, %v9860_v0 }
 0x35f   : > { %6366 = vst.msk [vmem:[%s9865_s15 + $0x40] sm:$0xff] %vm6357_vm0, %v6333_v21  ;;  %v6334_v5 = vadd.f32 %v7599_v56, %v9860_v0 }
 0x360   : > { %6369 = vst.msk [vmem:[%s9865_s15 + $0x58] sm:$0xff] %vm6357_vm0, %v6336_v11 }
 0x361   : > { %6367 = vst.msk [vmem:[%s9865_s15 + $0x48] sm:$0xff] %vm6357_vm0, %v6334_v5  ;;  %v7570_v8 = vpop.f32.mrb[12].mxu1 }
 0x362   : > { %v7600_v37 = vadd.f32 %v7570_v8, %v9816_v12  ;;  %v6207_v7 = vpop.f32.mrb[13].mxu1 }
 0x363   : > { %v7601_v54 = vadd.f32 %v6207_v7, %v9818_v41  ;;  %v7571_v49 = vpop.f32.mrb[14].mxu1 }
 0x364   : > { %v6339_v28 = vadd.f32 %v7600_v37, %v9860_v0  ;;  %v7602_v44 = vadd.f32 %v7571_v49, %v9820_v61  ;;  %v6210_v4 = vpop.f32.mrb[15].mxu1 }
 0x365   : > { %v6337_v18 = vadd.f32 %v7601_v54, %v9860_v0  ;;  %v7603_v59 = vadd.f32 %v6210_v4, %v9822_v1 }
 0x366   : > { %6372 = vst.msk [vmem:[%s9865_s15 + $0x70] sm:$0xff] %vm6357_vm0, %v6339_v28  ;;  %v6340_v24 = vadd.f32 %v7602_v44, %v9860_v0 }
 0x367   : > { %6370 = vst.msk [vmem:[%s9865_s15 + $0x60] sm:$0xff] %vm6357_vm0, %v6337_v18  ;;  %v6338_v12 = vadd.f32 %v7603_v59, %v9860_v0 }
 0x368   : > { %6373 = vst.msk [vmem:[%s9865_s15 + $0x78] sm:$0xff] %vm6357_vm0, %v6340_v24 }
 0x369   : > { %6371 = vst.msk [vmem:[%s9865_s15 + $0x68] sm:$0xff] %vm6357_vm0, %v6338_v12  ;;  %v7574_v41 = vpop.f32.mrb[16].mxu1 }
 0x36a   : > { %v7604_v61 = vadd.f32 %v7574_v41, %v9824_v26  ;;  %v6223_v1 = vpop.f32.mrb[17].mxu1 }
 0x36b   : > { %v7605_v31 = vadd.f32 %v6223_v1, %v9826_v25  ;;  %v7575_v46 = vpop.f32.mrb[18].mxu1 }
 0x36c   : > { %v6343_v9 = vadd.f32 %v7604_v61, %v9860_v0  ;;  %v7606_v29 = vadd.f32 %v7575_v46, %v9828_v15  ;;  %v6226_v62 = vpop.f32.mrb[19].mxu1 }
 0x36d   : > { %v6341_v40 = vadd.f32 %v7605_v31, %v9860_v0  ;;  %v7607_v17 = vadd.f32 %v6226_v62, %v9830_v34 }
 0x36e   : > { %6376 = vst.msk [vmem:[%s9865_s15 + $0x90] sm:$0xff] %vm6357_vm0, %v6343_v9  ;;  %v6344_v22 = vadd.f32 %v7606_v29, %v9860_v0 }
 0x36f   : > { %6374 = vst.msk [vmem:[%s9865_s15 + $0x80] sm:$0xff] %vm6357_vm0, %v6341_v40  ;;  %v6342_v26 = vadd.f32 %v7607_v17, %v9860_v0 }
 0x370   : > { %6377 = vst.msk [vmem:[%s9865_s15 + $0x98] sm:$0xff] %vm6357_vm0, %v6344_v22 }
 0x371   : > { %6375 = vst.msk [vmem:[%s9865_s15 + $0x88] sm:$0xff] %vm6357_vm0, %v6342_v26  ;;  %v7578_v25 = vpop.f32.mrb[20].mxu1 }
 0x372   : > { %v7608_v15 = vadd.f32 %v7578_v25, %v9832_v20  ;;  %v6239_v34 = vpop.f32.mrb[21].mxu1 }
 0x373   : > { %v7609_v43 = vadd.f32 %v6239_v34, %v9834_v55  ;;  %v7579_v2 = vpop.f32.mrb[22].mxu1 }
 0x374   : > { %v6347_v23 = vadd.f32 %v7608_v15, %v9860_v0  ;;  %v7610_v53 = vadd.f32 %v7579_v2, %v9836_v19  ;;  %v6242_v3 = vpop.f32.mrb[23].mxu1 }
 0x375   : > { %v6345_v32 = vadd.f32 %v7609_v43, %v9860_v0  ;;  %v7611_v47 = vadd.f32 %v6242_v3, %v9838_v38 }
 0x376   : > { %6380 = vst.msk [vmem:[%s9865_s15 + $0xb0] sm:$0xff] %vm6357_vm0, %v6347_v23  ;;  %v6348_v10 = vadd.f32 %v7610_v53, %v9860_v0 }
 0x377   : > { %6378 = vst.msk [vmem:[%s9865_s15 + $0xa0] sm:$0xff] %vm6357_vm0, %v6345_v32  ;;  %v6346_v20 = vadd.f32 %v7611_v47, %v9860_v0 }
 0x378   : > { %6381 = vst.msk [vmem:[%s9865_s15 + $0xb8] sm:$0xff] %vm6357_vm0, %v6348_v10 }
 0x379   : > { %6379 = vst.msk [vmem:[%s9865_s15 + $0xa8] sm:$0xff] %vm6357_vm0, %v6346_v20  ;;  %v7582_v55 = vpop.f32.mrb[24].mxu1 }
 0x37a   : > { %v7612_v19 = vadd.f32 %v7582_v55, %v9840_v6  ;;  %v6255_v38 = vpop.f32.mrb[25].mxu1 }
 0x37b   : > { %v7613_v39 = vadd.f32 %v6255_v38, %v9842_v42  ;;  %v7583_v58 = vpop.f32.mrb[26].mxu1 }
 0x37c   : > { %v6351_v50 = vadd.f32 %v7612_v19, %v9860_v0  ;;  %v7614_v63 = vadd.f32 %v7583_v58, %v9844_v16  ;;  %v6258_v45 = vpop.f32.mrb[27].mxu1 }
 0x37d   : > { %v6349_v36 = vadd.f32 %v7613_v39, %v9860_v0  ;;  %v7615_v33 = vadd.f32 %v6258_v45, %v9846_v60 }
 0x37e   : > { %6384 = vst.msk [vmem:[%s9865_s15 + $0xd0] sm:$0xff] %vm6357_vm0, %v6351_v50  ;;  %v6352_v51 = vadd.f32 %v7614_v63, %v9860_v0 }
 0x37f   : > { %6382 = vst.msk [vmem:[%s9865_s15 + $0xc0] sm:$0xff] %vm6357_vm0, %v6349_v36  ;;  %v6350_v6 = vadd.f32 %v7615_v33, %v9860_v0 }
 0x380   : > { %6385 = vst.msk [vmem:[%s9865_s15 + $0xd8] sm:$0xff] %vm6357_vm0, %v6352_v51 }
 0x381   : > { %6383 = vst.msk [vmem:[%s9865_s15 + $0xc8] sm:$0xff] %vm6357_vm0, %v6350_v6  ;;  %v7586_v42 = vpop.f32.mrb[28].mxu1 }
 0x382   : > { %v7616_v16 = vadd.f32 %v7586_v42, %v9848_v27  ;;  %v6271_v60 = vpop.f32.mrb[29].mxu1 }
 0x383   : > { %v7617_v48 = vadd.f32 %v6271_v60, %v9850_v35  ;;  %v7587_v57 = vpop.f32.mrb[30].mxu1 }
 0x384   : > { %v6355_v52 = vadd.f32 %v7616_v16, %v9860_v0  ;;  %v7618_v30 = vadd.f32 %v7587_v57, %v9852_v14  ;;  %v6274_v21 = vpop.f32.mrb[31].mxu1 }
 0x385   : > { %v6353_v56 = vadd.f32 %v7617_v48, %v9860_v0  ;;  %v7619_v11 = vadd.f32 %v6274_v21, %v9854_v13 }
 0x386   : > { %6388 = vst.msk [vmem:[%s9865_s15 + $0xf0] sm:$0xff] %vm6357_vm0, %v6355_v52  ;;  %v6356_v5 = vadd.f32 %v7618_v30, %v9860_v0 }
 0x387   : > { %6386 = vst.msk [vmem:[%s9865_s15 + $0xe0] sm:$0xff] %vm6357_vm0, %v6353_v56  ;;  %v6354_v27 = vadd.f32 %v7619_v11, %v9860_v0 }
 0x388   : > { %6389 = vst.msk [vmem:[%s9865_s15 + $0xf8] sm:$0xff] %vm6357_vm0, %v6356_v5 }
 0x389   : > { %6387 = vst.msk [vmem:[%s9865_s15 + $0xe8] sm:$0xff] %vm6357_vm0, %v6354_v27 }
 0x38a PF: > { %s15_s18 = sadd.s32 1, %s7976_s18  }
 0x38b   : > { %p12_p4 = scmp.ge.s32.totalorder %s15_s18, 4  }
 0x38d   :  { %14 = sbr.rel (!%p12_p4) target bundleno = 1 (0x1), region = 81 }

</bundles_post_ra>
